<compile_context>
chip_gen: v7x
topology: tpu7x:2x2x1
jax: 0.10.0
libtpu: 0.0.40
codegen_flags: <defaults>
</compile_context>

<pallas_src>
import jax
import jax.numpy as jnp
from jax.experimental import pallas as pl
from jax.experimental.pallas import tpu as pltpu


def shared_mlp_kernel(x_ref, w1_ref, b1_ref, w2_ref, b2_ref, w3_ref, b3_ref, o_ref):
    x = x_ref[...]                                   # (tm, 3) f32
    w1 = w1_ref[...]                                 # (3, 64) f32

    # Layer 1 (3 -> 64): K=3 contraction on the VPU as broadcast FMAs.
    h1 = (x[:, 0:1] * w1[0:1, :]
          + x[:, 1:2] * w1[1:2, :]
          + x[:, 2:3] * w1[2:3, :]
          + b1_ref[...])
    h1 = jnp.maximum(h1, 0.0)                        # (tm, 64) f32

    # Layer 2 (64 -> 128): bf16 MXU inputs, f32 accumulation.
    h2 = jnp.dot(h1.astype(jnp.bfloat16), w2_ref[...],
                 preferred_element_type=jnp.float32)
    h2 = jnp.maximum(h2 + b2_ref[...], 0.0)          # (tm, 128) f32

    # Layer 3 (128 -> 1024): dominant matmul, bf16 MXU inputs, f32 accumulation.
    h3 = jnp.dot(h2.astype(jnp.bfloat16), w3_ref[...],
                 preferred_element_type=jnp.float32)
    o_ref[...] = (h3 + b3_ref[...]).astype(o_ref.dtype)   # (tm, 1024)


def shared_mlp(x, params, *, tm=1024, out_dtype=jnp.bfloat16):
    """x: (B, N, 3) float32 -> (B, N, 1024) out_dtype (bf16 by default)."""
    w1, b1, w2, b2, w3, b3 = params
    # Cast the heavy-matmul weights to bf16 once (kernel accumulates in f32).
    w2 = w2.astype(jnp.bfloat16)
    w3 = w3.astype(jnp.bfloat16)

    B, N, Cin = x.shape
    M = B * N
    x2d = x.reshape(M, Cin)

    # Keep >= 2 row tiles when there is enough work so v7x's two TensorCores
    # (parallel grid axis) both get a share; sublane-align the tile to 8.
    if M > 512 and pl.cdiv(M, tm) < 2:
        tm = (((M + 1) // 2) + 7) // 8 * 8
    grid_m = pl.cdiv(M, tm)   # ragged final block handled by Pallas (masked store)

    out_bytes = jnp.dtype(out_dtype).itemsize
    flops = 2 * M * (Cin * 64 + 64 * 128 + 128 * 1024)
    bytes_accessed = (
        M * Cin * 4                     # x read
        + M * 1024 * out_bytes          # output write (dominant)
        + w1.size * 4 + b1.size * 4
        + w2.size * 2 + b2.size * 4
        + w3.size * 2 + b3.size * 4)

    # Weights/biases: whole-array, resident in VMEM (no per-step re-DMA,
    # no double-buffer overhead).
    weight_spec = pl.BlockSpec(memory_space=pltpu.MemorySpace.VMEM)

    out = pl.pallas_call(
        shared_mlp_kernel,
        out_shape=jax.ShapeDtypeStruct((M, 1024), out_dtype),
        grid_spec=pltpu.PrefetchScalarGridSpec(
            num_scalar_prefetch=0,
            grid=(grid_m,),
            in_specs=[
                pl.BlockSpec((tm, Cin), lambda i: (i, 0)),      # x rows tile
                weight_spec,                                    # W1 (3, 64)
                weight_spec,                                    # b1 (1, 64)
                weight_spec,                                    # W2 (64, 128) bf16
                weight_spec,                                    # b2 (1, 128)
                weight_spec,                                    # W3 (128, 1024) bf16
                weight_spec,                                    # b3 (1, 1024)
            ],
            out_specs=pl.BlockSpec((tm, 1024), lambda i: (i, 0)),
        ),
        compiler_params=pltpu.CompilerParams(
            dimension_semantics=("parallel",),
            vmem_limit_bytes=32 * 1024 * 1024),
        cost_estimate=pl.CostEstimate(
            flops=flops, transcendentals=0, bytes_accessed=bytes_accessed),
    )(x2d, w1, b1, w2, b2, w3, b3)

    return out.reshape(B, N, 1024)


def init_params(key):
    """Deterministic init mimicking nn.Linear default (uniform +- 1/sqrt(fan_in)).
    Weights stored transposed vs. PyTorch: (in, out) so kernel does x @ W."""
    dims = [(3, 64), (64, 128), (128, 1024)]
    params = []
    for i, (fan_in, fan_out) in enumerate(dims):
        kw, kb = jax.random.split(jax.random.fold_in(key, i))
        bound = 1.0 / jnp.sqrt(float(fan_in))
        w = jax.random.uniform(kw, (fan_in, fan_out), jnp.float32, -bound, bound)
        b = jax.random.uniform(kb, (1, fan_out), jnp.float32, -bound, bound)
        params += [w, b]
    return tuple(params)


def shared_mlp_ref(x, params):
    """Reference mirroring the kernel numerics (bf16 MXU inputs, f32 accumulation)."""
    w1, b1, w2, b2, w3, b3 = params
    h1 = jnp.maximum(jnp.dot(x, w1) + b1, 0.0)
    h2 = jnp.dot(h1.astype(jnp.bfloat16), w2.astype(jnp.bfloat16),
                 preferred_element_type=jnp.float32)
    h2 = jnp.maximum(h2 + b2, 0.0)
    h3 = jnp.dot(h2.astype(jnp.bfloat16), w3.astype(jnp.bfloat16),
                 preferred_element_type=jnp.float32)
    return h3 + b3


if __name__ == "__main__":
    key = jax.random.PRNGKey(0)
    params = init_params(key)

    # Small point cloud; M = 600 is NOT a multiple of the row tile, exercising
    # the ragged final block (masked writeback) and the 2-tile split heuristic.
    B, N = 2, 300
    x = jax.random.normal(jax.random.fold_in(key, 100), (B, N, 3), jnp.float32)

    y_ref = shared_mlp_ref(x, params).reshape(B, N, 1024)

    # Default production path: bf16 output (halves the dominant HBM writeback).
    y_bf16 = jax.block_until_ready(shared_mlp(x, params))
    assert y_bf16.shape == (B, N, 1024)
    assert y_bf16.dtype == jnp.bfloat16
    err_bf16 = float(jnp.max(jnp.abs(y_bf16.astype(jnp.float32) - y_ref)))
    assert err_bf16 < 1e-1, err_bf16

    # Optional f32 output path (matches the PyTorch module's output dtype).
    y_f32 = jax.block_until_ready(shared_mlp(x, params, out_dtype=jnp.float32))
    assert y_f32.shape == (B, N, 1024)
    err_f32 = float(jnp.max(jnp.abs(y_f32 - y_ref)))
    assert err_f32 < 2e-2, err_f32

    print("KERNEL_OK")
</pallas_src>

<mosaic_0001>
module attributes {stable_mosaic.version = 11 : i64} {
  func.func @shared_mlp_kernel(%arg0: i32, %arg1: memref<304x3xf32, #tpu.memory_space<vmem>>, %arg2: memref<3x64xf32, #tpu.memory_space<vmem>>, %arg3: memref<1x64xf32, #tpu.memory_space<vmem>>, %arg4: memref<64x128xbf16, #tpu.memory_space<vmem>>, %arg5: memref<1x128xf32, #tpu.memory_space<vmem>>, %arg6: memref<128x1024xbf16, #tpu.memory_space<vmem>>, %arg7: memref<1x1024xf32, #tpu.memory_space<vmem>>, %arg8: memref<304x1024xbf16, #tpu.memory_space<vmem>>) attributes {dimension_semantics = [#tpu.dimension_semantics<parallel>], iteration_bounds = array<i64: 2>, scalar_prefetch = 0 : i64, scratch_operands = 0 : i64, tpu.core_type = #tpu.core_type<tc>, window_params = [{transform_indices = @transform_0, window_bounds = array<i64: 304, 3>}, {pipeline_mode = #tpu.pipeline_mode<synchronous>, transform_indices = @transform_1, window_bounds = array<i64: 3, 64>}, {pipeline_mode = #tpu.pipeline_mode<synchronous>, transform_indices = @transform_2, window_bounds = array<i64: 1, 64>}, {pipeline_mode = #tpu.pipeline_mode<synchronous>, transform_indices = @transform_3, window_bounds = array<i64: 64, 128>}, {pipeline_mode = #tpu.pipeline_mode<synchronous>, transform_indices = @transform_4, window_bounds = array<i64: 1, 128>}, {pipeline_mode = #tpu.pipeline_mode<synchronous>, transform_indices = @transform_5, window_bounds = array<i64: 128, 1024>}, {pipeline_mode = #tpu.pipeline_mode<synchronous>, transform_indices = @transform_6, window_bounds = array<i64: 1, 1024>}, {transform_indices = @transform_7, window_bounds = array<i64: 304, 1024>}]} {
    %c0 = arith.constant 0 : index
    %c0_0 = arith.constant 0 : index
    %0 = vector.load %arg1[%c0, %c0_0] : memref<304x3xf32, #tpu.memory_space<vmem>>, vector<304x3xf32>
    %c0_1 = arith.constant 0 : index
    %c0_2 = arith.constant 0 : index
    %1 = vector.load %arg2[%c0_1, %c0_2] : memref<3x64xf32, #tpu.memory_space<vmem>>, vector<3x64xf32>
    %2 = vector.extract_strided_slice %0 {offsets = [0, 0], sizes = [304, 1], strides = [1, 1]} : vector<304x3xf32> to vector<304x1xf32>
    %3 = vector.extract_strided_slice %1 {offsets = [0, 0], sizes = [1, 64], strides = [1, 1]} : vector<3x64xf32> to vector<1x64xf32>
    %4 = vector.broadcast %2 : vector<304x1xf32> to vector<304x64xf32>
    %5 = vector.broadcast %3 : vector<1x64xf32> to vector<304x64xf32>
    %6 = arith.mulf %4, %5 : vector<304x64xf32>
    %7 = vector.extract_strided_slice %0 {offsets = [0, 1], sizes = [304, 1], strides = [1, 1]} : vector<304x3xf32> to vector<304x1xf32>
    %8 = vector.extract_strided_slice %1 {offsets = [1, 0], sizes = [1, 64], strides = [1, 1]} : vector<3x64xf32> to vector<1x64xf32>
    %9 = vector.broadcast %7 : vector<304x1xf32> to vector<304x64xf32>
    %10 = vector.broadcast %8 : vector<1x64xf32> to vector<304x64xf32>
    %11 = arith.mulf %9, %10 : vector<304x64xf32>
    %12 = arith.addf %6, %11 : vector<304x64xf32>
    %13 = vector.extract_strided_slice %0 {offsets = [0, 2], sizes = [304, 1], strides = [1, 1]} : vector<304x3xf32> to vector<304x1xf32>
    %14 = vector.extract_strided_slice %1 {offsets = [2, 0], sizes = [1, 64], strides = [1, 1]} : vector<3x64xf32> to vector<1x64xf32>
    %15 = vector.broadcast %13 : vector<304x1xf32> to vector<304x64xf32>
    %16 = vector.broadcast %14 : vector<1x64xf32> to vector<304x64xf32>
    %17 = arith.mulf %15, %16 : vector<304x64xf32>
    %18 = arith.addf %12, %17 : vector<304x64xf32>
    %c0_3 = arith.constant 0 : index
    %c0_4 = arith.constant 0 : index
    %19 = vector.load %arg3[%c0_3, %c0_4] : memref<1x64xf32, #tpu.memory_space<vmem>>, vector<1x64xf32>
    %20 = vector.broadcast %19 : vector<1x64xf32> to vector<304x64xf32>
    %21 = arith.addf %18, %20 : vector<304x64xf32>
    %cst = arith.constant 0.000000e+00 : f32
    %22 = vector.broadcast %cst : f32 to vector<304x64xf32>
    %23 = arith.maximumf %21, %22 : vector<304x64xf32>
    %24 = arith.truncf %23 : vector<304x64xf32> to vector<304x64xbf16>
    %c0_5 = arith.constant 0 : index
    %c0_6 = arith.constant 0 : index
    %25 = vector.load %arg4[%c0_5, %c0_6] : memref<64x128xbf16, #tpu.memory_space<vmem>>, vector<64x128xbf16>
    %cst_7 = arith.constant dense<0.000000e+00> : vector<304x128xf32>
    %26 = tpu.matmul %24, %25, %cst_7 {dimension_numbers = #tpu.dot_dimension_numbers<[1], [0], [0], [1], [0, 0, 1, 1], [], []>} : vector<304x64xbf16>, vector<64x128xbf16>, vector<304x128xf32> -> vector<304x128xf32>
    %c0_8 = arith.constant 0 : index
    %c0_9 = arith.constant 0 : index
    %27 = vector.load %arg5[%c0_8, %c0_9] : memref<1x128xf32, #tpu.memory_space<vmem>>, vector<1x128xf32>
    %28 = vector.broadcast %27 : vector<1x128xf32> to vector<304x128xf32>
    %29 = arith.addf %26, %28 : vector<304x128xf32>
    %cst_10 = arith.constant 0.000000e+00 : f32
    %30 = vector.broadcast %cst_10 : f32 to vector<304x128xf32>
    %31 = arith.maximumf %29, %30 : vector<304x128xf32>
    %32 = arith.truncf %31 : vector<304x128xf32> to vector<304x128xbf16>
    %c0_11 = arith.constant 0 : index
    %c0_12 = arith.constant 0 : index
    %33 = vector.load %arg6[%c0_11, %c0_12] : memref<128x1024xbf16, #tpu.memory_space<vmem>>, vector<128x1024xbf16>
    %cst_13 = arith.constant dense<0.000000e+00> : vector<304x1024xf32>
    %34 = tpu.matmul %32, %33, %cst_13 {dimension_numbers = #tpu.dot_dimension_numbers<[1], [0], [0], [1], [0, 0, 1, 1], [], []>} : vector<304x128xbf16>, vector<128x1024xbf16>, vector<304x1024xf32> -> vector<304x1024xf32>
    %c0_14 = arith.constant 0 : index
    %c0_15 = arith.constant 0 : index
    %35 = vector.load %arg7[%c0_14, %c0_15] : memref<1x1024xf32, #tpu.memory_space<vmem>>, vector<1x1024xf32>
    %36 = vector.broadcast %35 : vector<1x1024xf32> to vector<304x1024xf32>
    %37 = arith.addf %34, %36 : vector<304x1024xf32>
    %38 = arith.truncf %37 : vector<304x1024xf32> to vector<304x1024xbf16>
    %c0_16 = arith.constant 0 : index
    %c0_17 = arith.constant 0 : index
    %39 = vector.load %arg8[%c0_16, %c0_17] : memref<304x1024xbf16, #tpu.memory_space<vmem>>, vector<304x1024xbf16>
    tpu.vector_store %arg8[%c0_16, %c0_17], %38 {strides = array<i32>} : memref<304x1024xbf16, #tpu.memory_space<vmem>>, vector<304x1024xbf16>,
    return
  }
  func.func @transform_0(%arg0: i32) -> (i32, i32) {
    %c0_i32 = arith.constant 0 : i32
    %c0_i32_0 = arith.constant 0 : i32
    return %arg0, %c0_i32 : i32, i32
  }
  func.func @transform_1(%arg0: i32) -> (i32, i32) {
    %c0_i32 = arith.constant 0 : i32
    %c0_i32_0 = arith.constant 0 : i32
    %c0_i32_1 = arith.constant 0 : i32
    return %c0_i32, %c0_i32_0 : i32, i32
  }
  func.func @transform_2(%arg0: i32) -> (i32, i32) {
    %c0_i32 = arith.constant 0 : i32
    %c0_i32_0 = arith.constant 0 : i32
    %c0_i32_1 = arith.constant 0 : i32
    return %c0_i32, %c0_i32_0 : i32, i32
  }
  func.func @transform_3(%arg0: i32) -> (i32, i32) {
    %c0_i32 = arith.constant 0 : i32
    %c0_i32_0 = arith.constant 0 : i32
    %c0_i32_1 = arith.constant 0 : i32
    return %c0_i32, %c0_i32_0 : i32, i32
  }
  func.func @transform_4(%arg0: i32) -> (i32, i32) {
    %c0_i32 = arith.constant 0 : i32
    %c0_i32_0 = arith.constant 0 : i32
    %c0_i32_1 = arith.constant 0 : i32
    return %c0_i32, %c0_i32_0 : i32, i32
  }
  func.func @transform_5(%arg0: i32) -> (i32, i32) {
    %c0_i32 = arith.constant 0 : i32
    %c0_i32_0 = arith.constant 0 : i32
    %c0_i32_1 = arith.constant 0 : i32
    return %c0_i32, %c0_i32_0 : i32, i32
  }
  func.func @transform_6(%arg0: i32) -> (i32, i32) {
    %c0_i32 = arith.constant 0 : i32
    %c0_i32_0 = arith.constant 0 : i32
    %c0_i32_1 = arith.constant 0 : i32
    return %c0_i32, %c0_i32_0 : i32, i32
  }
  func.func @transform_7(%arg0: i32) -> (i32, i32) {
    %c0_i32 = arith.constant 0 : i32
    %c0_i32_0 = arith.constant 0 : i32
    return %arg0, %c0_i32 : i32, i32
  }
}

</mosaic_0001>

<bundles_post_ra>
// kernel: tpu_custom_call.1
= control target key start
LH: loop header
LB: loop body
LE: loop exit
PB: predicated region body
PF: predicated region fallthrough
CT: control target
= control target key end

     0   :  { %s6623_s0 = inlined_call_operand.vmem [shape: f32[600,3], index: 0, kind: input, shape index: {}]   ;;  %s6624_s1 = inlined_call_operand.hbm [shape: f32[3,64], index: 1, kind: input, shape index: {}]   ;;  %s6625_s2 = inlined_call_operand.hbm [shape: f32[1,64], index: 2, kind: input, shape index: {}]   ;;  %s6626_s3 = inlined_call_operand.hbm [shape: bf16[64,128], index: 3, kind: input, shape index: {}]   ;;  %s6627_s4 = inlined_call_operand.hbm [shape: f32[1,128], index: 4, kind: input, shape index: {}]   ;;  %s6628_s5 = inlined_call_operand.hbm [shape: bf16[128,1024], index: 5, kind: input, shape index: {}]   ;;  %s6629_s6 = inlined_call_operand.hbm [shape: f32[1,1024], index: 6, kind: input, shape index: {}]   ;;  %s6630_s7 = inlined_call_operand.hbm [shape: bf16[600,1024], index: 7, kind: output, shape index: {}]  }
   0x1   :  { %6633 = sst [smem:[#allocation20_spill]] %s6624_s1 }
   0x2   :  { %6634 = sst [smem:[#allocation21_spill]] %s6625_s2 }
   0x3   :  { %12 = vsyncpa [#allocation3], 0 }
   0x4   :  { %13 = vsyncpa [#allocation6], 0 }
   0x5   :  { %14 = vsyncpa [#allocation9], 0 }
   0x6   :  { %15 = vsyncpa [#allocation12], 0 }
   0x7   :  { %16 = vsyncpa [#allocation4], 0 }
   0x8   :  { %18 = vsyncpa [#allocation4 + $0x1], 0  ;;  %s5114_s24 = smov 0   ;;  %s5116_s25 = smov 0  }
   0x9   :  { %s5118_s26 = smov 0   ;;  %s5120_s27 = smov 0  }
   0xa LB: > { %s5135_s28 = sadd.s32 4294967295, %s5054_s27   ;;  %s4088_s29 = sadd.s32 4294967294, %s5054_s27   ;;  %s5054_s27 = sphi %s5120_s27, %s6658_s27   ;;  %s5050_s26 = sphi %s5118_s26, %s6657_s26   ;;  %s5046_s25 = sphi %s5116_s25, %s6656_s25   ;;  %s5042_s24 = sphi %s5114_s24, %s6655_s24  }
   0xb   : > { %s5139_s30 = sadd.s32 1, %s5054_s27   ;;  %s183_s8 = sadd.s32 1, %s5050_s26 }
   0xc   : > { %s180_s9 = ssub.s32 %s5054_s27, %s5139_s30  ;;  %p193_p0 = scmp.ne.s32.totalorder %s5050_s26, %s5046_s25 }
   0xd   : > { %p181_p1 = scmp.eq.s32.totalorder %s180_s9, 0  ;;  %p194_p2 = scmp.eq.s32.totalorder %s5135_s28, 1 }
   0xe   : > { %p199_p3 = scmp.ne.s32.totalorder %s5046_s25, %s5042_s24  ;;  %p200_p4 = scmp.eq.s32.totalorder %s4088_s29, 1 }
   0xf   : > { %s5150_s10 = scalar_select %p181_p1, %s5050_s26, %s183_s8  }
  0x10   : > { %p5152_p5 = por %p194_p2, %p193_p0  ;;  %p5156_p6 = por %p200_p4, %p199_p3 }
  0x11   : > { %6635 = sst [smem:[#allocation19_spill]] %s5150_s10  ;;  %p4089_p7 = scmp.ge.s32.totalorder %s5054_s27, 1 }
  0x12   : > { %s6636_s11 = scalar_select %p5152_p5, 1, 0 }
  0x13   : > { %s6637_s12 = scalar_select %p5156_p6, 1, 0 }
  0x14   : > { %p207_p8 = scmp.lt.s32.totalorder %s5054_s27, 3  ;;  %p6631_p9 = scmp.eq.s32.totalorder %s5135_s28, 0 }
  0x15   : > { %s5056_s14 = smov [#allocation5]   ;;  %s5057_s16 = smov [#allocation8]  }
  0x16   : > { %p5163_p10 = pnand %p4089_p7, %p207_p8  ;;  %s231_s15 = sshll.u32 %s5056_s14, 4  ;;  %s232_s15 = int_to_ptr.vmem [resolvable:$true] %s231_s15 }
  0x17   : > { %s255_s17 = sshll.u32 %s5057_s16, 4  ;;  %s5058_s19 = smov [#allocation2]   ;;  %s5175_s17 = int_to_ptr.vmem [resolvable:$true] %s255_s17 }
  0x18   : > { %s6638_s13 = scalar_select %p5163_p10, 1, 0 }
  0x19   : > { %p4652_p11 = pneg %p5163_p10  ;;  %s220_s20 = sshll.u32 %s5058_s19, 4  ;;  %s5177_s20 = int_to_ptr.vmem [resolvable:$true] %s220_s20 }
  0x1a   : > { %s6640_s2 = sld [smem:[#allocation21_spill]] }
  0x1b   : > { %p5171_p12 = pnand %p6631_p9, %p4652_p11 }
  0x1d   : > { %p5187_p0 = pneg %p5171_p12 }
  0x20   : > { %s4808_s23 = scalar_lea.hbm %s6640_s2, 16 }
  0x21   : > { %p4809_p13 = scmp.ne.s32.totalorder %s6640_s2, %s4808_s23  ;;  %p4815_p3 = scmp.lt.u32.totalorder %s4808_s23, %s6640_s2 }
  0x23   : > { %p4811_p1 = pnand %p5187_p0, %p4809_p13 }
  0x25   : > { %p4812_p2 = pneg %p4811_p1 }
  0x27   : > { %p4817_p4 = pnand %p4815_p3, %p4812_p2 }
  0x29   : > { %4820 = shalt.err (!%p4817_p4)
}
  0x2a   : > { %s4821_s19 = scalar_lea.vmem %s232_s15, 16  ;;  %s4828_s21 = scalar_lea.vmem %s232_s15, 32 }
  0x2b   : > { %p4822_p7 = scmp.ne.s32.totalorder %s232_s15, %s4821_s19  ;;  %p4829_p9 = scmp.lt.s32.totalorder %s232_s15, %s232_s15 }
  0x2c   : > { %p4830_p6 = scmp.lt.s32.totalorder %s4828_s21, %s4821_s19 }
  0x2d   : > { %p4824_p8 = pnand %p4822_p7, %p5187_p0 }
  0x2e   : > { %p4831_p5 = por %p4830_p6, %p4829_p9 }
  0x2f   : > { %p4825_p11 = pneg %p4824_p8 }
  0x31   : > { %p4832_p10 = pnand %p4831_p5, %p4825_p11 }
  0x33   : > { %4835 = shalt.err (!%p4832_p10)
}
  0x34   : > { %4658 = dma.hbm_to_vmem [thread:$0]  (!%p5171_p12), %s6640_s2, 16, %s232_s15, [#allocation6]  }
  0x35   : > { %s4836_s14 = scalar_lea.hbm %s6627_s4, 16 }
  0x36   : > { %p4837_p13 = scmp.ne.s32.totalorder %s6627_s4, %s4836_s14  ;;  %p4843_p5 = scmp.lt.u32.totalorder %s4836_s14, %s6627_s4 }
  0x38   : > { %p4839_p1 = pnand %p4837_p13, %p5187_p0 }
  0x3a   : > { %p4840_p6 = pneg %p4839_p1 }
  0x3c   : > { %p4845_p9 = pnand %p4843_p5, %p4840_p6 }
  0x3e   : > { %4848 = shalt.err (!%p4845_p9)
}
  0x3f   : > { %s4849_s15 = scalar_lea.vmem %s5175_s17, 16  ;;  %s4856_s10 = scalar_lea.vmem %s5175_s17, 32 }
  0x40   : > { %p4850_p10 = scmp.ne.s32.totalorder %s5175_s17, %s4849_s15  ;;  %p4857_p4 = scmp.lt.s32.totalorder %s5175_s17, %s5175_s17 }
  0x41   : > { %p4858_p7 = scmp.lt.s32.totalorder %s4856_s10, %s4849_s15 }
  0x42   : > { %p4852_p2 = pnand %p4850_p10, %p5187_p0 }
  0x43   : > { %p4859_p8 = por %p4858_p7, %p4857_p4 }
  0x44   : > { %p4853_p3 = pneg %p4852_p2 }
  0x46   : > { %p4860_p11 = pnand %p4859_p8, %p4853_p3 }
  0x48   : > { %4863 = shalt.err (!%p4860_p11)
}
  0x49   : > { %4664 = dma.hbm_to_vmem [thread:$0]  (!%p5171_p12), %s6627_s4, 16, %s5175_s17, [#allocation9]  }
  0x4a   : > { %s6642_s1 = sld [smem:[#allocation20_spill]] }
  0x50   : > { %s4864_s14 = scalar_lea.hbm %s6642_s1, 64 }
  0x51   : > { %p4865_p13 = scmp.ne.s32.totalorder %s6642_s1, %s4864_s14  ;;  %p4871_p5 = scmp.lt.u32.totalorder %s4864_s14, %s6642_s1 }
  0x53   : > { %p4867_p1 = pnand %p4865_p13, %p5187_p0 }
  0x55   : > { %p4868_p6 = pneg %p4867_p1 }
  0x57   : > { %p4873_p9 = pnand %p4871_p5, %p4868_p6 }
  0x59   : > { %4876 = shalt.err (!%p4873_p9)
}
  0x5a   : > { %s4877_s17 = scalar_lea.vmem %s5177_s20, 64  ;;  %p4885_p4 = scmp.lt.s32.totalorder %s5177_s20, %s5177_s20 }
  0x5b   : > { %p4878_p10 = scmp.ne.s32.totalorder %s5177_s20, %s4877_s17  ;;  %p4886_p7 = scmp.lt.s32.totalorder %s4877_s17, %s4877_s17 }
  0x5d   : > { %p4880_p2 = pnand %p4878_p10, %p5187_p0  ;;  %p4887_p8 = por %p4886_p7, %p4885_p4 }
  0x5f   : > { %p4881_p3 = pneg %p4880_p2 }
  0x61   : > { %p4888_p11 = pnand %p4887_p8, %p4881_p3 }
  0x63   : > { %4891 = shalt.err (!%p4888_p11)
}
  0x64   : > { %4655 = dma.hbm_to_vmem [thread:$0]  (!%p5171_p12), %s6642_s1, 64, %s5177_s20, [#allocation3]  }
  0x65   : > { %s5059_s29 = smov [#allocation7]   ;;  %s4892_s16 = scalar_lea.hbm %s6626_s3, 512 }
  0x66   : > { %s241_s23 = sshll.u32 %s5059_s29, 4  ;;  %p4893_p13 = scmp.ne.s32.totalorder %s6626_s3, %s4892_s16  ;;  %s242_s23 = int_to_ptr.vmem [resolvable:$true] %s241_s23 }
  0x67   : > { %p4899_p5 = scmp.lt.u32.totalorder %s4892_s16, %s6626_s3 }
  0x68   : > { %p4895_p1 = pnand %p4893_p13, %p5187_p0 }
  0x6a   : > { %p4896_p6 = pneg %p4895_p1 }
  0x6c   : > { %p4901_p9 = pnand %p4899_p5, %p4896_p6 }
  0x6e   : > { %4904 = shalt.err (!%p4901_p9)
}
  0x6f   : > { %s4905_s20 = scalar_lea.vmem %s242_s23, 512  ;;  %p4913_p4 = scmp.lt.s32.totalorder %s242_s23, %s242_s23 }
  0x70   : > { %p4906_p10 = scmp.ne.s32.totalorder %s242_s23, %s4905_s20  ;;  %p4914_p7 = scmp.lt.s32.totalorder %s4905_s20, %s4905_s20 }
  0x72   : > { %p4908_p2 = pnand %p4906_p10, %p5187_p0  ;;  %p4915_p8 = por %p4914_p7, %p4913_p4 }
  0x74   : > { %p4909_p3 = pneg %p4908_p2 }
  0x76   : > { %p4916_p11 = pnand %p4915_p8, %p4909_p3 }
  0x78   : > { %4919 = shalt.err (!%p4916_p11)
}
  0x79   : > { %s5060_s10 = smov 64   ;;  %s5061_s22 = smov 4  }
  0x7a   : > { %4661 = dma.hbm_to_vmem [thread:$0]  (!%p5171_p12), %s6626_s3, 512, %s242_s23, [#allocation6], %s5060_s10, %s5060_s10, %s5061_s22  }
  0x7b   : > { %s5062_s14 = smov [#allocation10]   ;;  %s4920_s15 = scalar_lea.hbm %s6628_s5, 8192 }
  0x7c   : > { %s265_s16 = sshll.u32 %s5062_s14, 4  ;;  %p4921_p13 = scmp.ne.s32.totalorder %s6628_s5, %s4920_s15  ;;  %s266_s16 = int_to_ptr.vmem [resolvable:$true] %s265_s16 }
  0x7d   : > { %p4927_p5 = scmp.lt.u32.totalorder %s4920_s15, %s6628_s5 }
  0x7e   : > { %p4923_p1 = pnand %p4921_p13, %p5187_p0 }
  0x80   : > { %p4924_p6 = pneg %p4923_p1 }
  0x82   : > { %p4929_p9 = pnand %p4927_p5, %p4924_p6 }
  0x84   : > { %4932 = shalt.err (!%p4929_p9)
}
  0x85   : > { %s4933_s23 = scalar_lea.vmem %s266_s16, 8192  ;;  %p4941_p4 = scmp.lt.s32.totalorder %s266_s16, %s266_s16 }
  0x86   : > { %p4934_p10 = scmp.ne.s32.totalorder %s266_s16, %s4933_s23  ;;  %p4942_p7 = scmp.lt.s32.totalorder %s4933_s23, %s4933_s23 }
  0x88   : > { %p4936_p2 = pnand %p4934_p10, %p5187_p0  ;;  %p4943_p8 = por %p4942_p7, %p4941_p4 }
  0x8a   : > { %p4937_p3 = pneg %p4936_p2 }
  0x8c   : > { %p4944_p11 = pnand %p4943_p8, %p4937_p3 }
  0x8e   : > { %4947 = shalt.err (!%p4944_p11)
}
  0x8f   : > { %s5063_s10 = smov 512   ;;  %s5064_s22 = smov 32  }
  0x90   : > { %4667 = dma.hbm_to_vmem [thread:$0]  (!%p5171_p12), %s6628_s5, 8192, %s266_s16, [#allocation9], %s5063_s10, %s5063_s10, %s5064_s22  }
  0x91   : > { %s5065_s29 = smov [#allocation11]   ;;  %s4948_s21 = scalar_lea.hbm %s6629_s6, 128 }
  0x92   : > { %s279_s8 = sshll.u32 %s5065_s29, 4  ;;  %p4949_p13 = scmp.ne.s32.totalorder %s6629_s6, %s4948_s21  ;;  %s280_s8 = int_to_ptr.vmem [resolvable:$true] %s279_s8 }
  0x93   : > { %p4955_p5 = scmp.lt.u32.totalorder %s4948_s21, %s6629_s6 }
  0x94   : > { %p4951_p1 = pnand %p4949_p13, %p5187_p0 }
  0x96   : > { %p4952_p6 = pneg %p4951_p1 }
  0x98   : > { %p4957_p9 = pnand %p4955_p5, %p4952_p6 }
  0x9a   : > { %4960 = shalt.err (!%p4957_p9)
}
  0x9b   : > { %s4961_s16 = scalar_lea.vmem %s280_s8, 128  ;;  %p4969_p4 = scmp.lt.s32.totalorder %s280_s8, %s280_s8 }
  0x9c   : > { %p4962_p10 = scmp.ne.s32.totalorder %s280_s8, %s4961_s16  ;;  %p4970_p7 = scmp.lt.s32.totalorder %s4961_s16, %s4961_s16 }
  0x9e   : > { %p4964_p2 = pnand %p4962_p10, %p5187_p0  ;;  %p4971_p8 = por %p4970_p7, %p4969_p4 }
  0xa0   : > { %p4965_p3 = pneg %p4964_p2 }
  0xa2   : > { %p4972_p11 = pnand %p4971_p8, %p4965_p3 }
  0xa4   : > { %4975 = shalt.err (!%p4972_p11)
}
  0xa5   : > { %4670 = dma.hbm_to_vmem [thread:$0]  (!%p5171_p12), %s6629_s6, 128, %s280_s8, [#allocation12]  }
  0xa6   : > { %p6643_p13 = scmp.ne.s32.totalorder %s6638_s13, 0 }
  0xa7   : > { %p6644_p1 = scmp.eq.s32.totalorder (!%p6643_p13), %s5135_s28, 0 }
  0xa8   : > { %309 = sbr.rel (%p6643_p13) target bundleno = 1305 (0x519), region = 48 }
  0xaf   : > { %5021 = dma.done.wait (%p6644_p1), [#allocation3], 64   ;;  %p6645_p0 = pmov %p6644_p1 }
  0xb1   : > { %5023 = vsyncadd (%p6645_p0), [#allocation3], 4294967232  ;;  %p6646_p6 = pmov %p6645_p0 }
  0xb2   : > { %p6647_p5 = pmov %p6645_p0 }
  0xb3   : > { %5025 = dma.done.wait (%p6646_p6), [#allocation6], 528  }
  0xb4   : > { %5027 = vsyncadd (%p6647_p5), [#allocation6], 4294966768  ;;  %p6648_p9 = pmov %p6645_p0 }
  0xb5   : > { %p6649_p12 = pmov %p6645_p0 }
  0xb6   : > { %5029 = dma.done.wait (%p6648_p9), [#allocation9], 8208  }
  0xb7   : > { %5031 = vsyncadd (%p6649_p12), [#allocation9], 4294959088  ;;  %p6650_p10 = pmov %p6645_p0 }
  0xb8   : > { %p6651_p2 = pmov %p6645_p0 }
  0xb9   : > { %5033 = dma.done.wait (%p6650_p10), [#allocation12], 128  }
  0xba   : > { %5035 = vsyncadd (%p6651_p2), [#allocation12], 4294967168  ;;  %s5323_s13 = smul.u32 38, %s5135_s28  ;;  %v5066_v0 = vmov 1   ;;  %v5067_v1 = vmov 0   ;;  %v5068_v4 = vmov 0.0   ;;  %v615_v35 = vlaneseq }
  0xbb   : > { %4738 = vset.pattern.permute.xlu1 %v5066_v0  ;;  %4737 = vset.pattern.permute.xlu0 %v5067_v1  ;;  %v4801_v5 = vld [vmem:[#allocation7] sm:$0xff]   ;;  %v4802_v6 = vld [vmem:[#allocation7 + $0x8] sm:$0xff]   ;;  %v5069_v7 = vmov 2   ;;  %v4803_v9 = vld [vmem:[#allocation7 + $0x10] sm:$0xff]   ;;  %vm5070_vm0 = vmmov 0   ;;  %vm1262_vm1 = vcmask 523264  }
  0xbc   : > { %p370_p3 = scmp.lt.s32.totalorder %s5323_s13, 74  ;;  %4534 = vmatprep.subr.bf16.mxu0 %v5068_v4  ;;  %4618 = vmatprep.subr.bf16.mxu1 %v5068_v4  ;;  %v4804_v11 = vld [vmem:[#allocation7 + $0x18] sm:$0xff]   ;;  %v5431_v36 = vshrl.u32 %v615_v35, 7  ;;  %s362_s8 = sand.u32 1, %s5046_s25  }
  0xbd   : > { %4535 = vmatpush3.bf16.msra.mxu0 %v4801_v5  ;;  %4622 = vmatpush3.bf16.msra.mxu1 %v4801_v5  ;;  %v424_v40 = vld [vmem:[#allocation2] sm:$0x7]  ;;  %v5474_v62 = vld [vmem:[#allocation5] ss:$0 sm:$0xff]  ;;  %s4626_s14 = smul.u32 1216, %s362_s8  ;;  %s6562_s21 = scalar_lea.sflag [#allocation4], %s362_s8 }
  0xbe   : > { %s371_s18 = scalar_select %p370_p3, %s5323_s13, 74  ;;  %4536 = vmatprep.subr.bf16.mxu0 %v5068_v4  ;;  %4619 = vmatprep.subr.bf16.mxu1 %v5068_v4  ;;  %v811_v38 = vsub.s32 1, %v5431_v36  ;;  %v617_v39 = vsub.s32 0, %v5431_v36  ;;  %v1043_v44 = vsub.s32 2, %v5431_v36 }
  0xbf   : > { %4542 = vmatprep.mubr.msk.bf16.mxu0 %vm5070_vm0, %v5068_v4  ;;  %4582 = vmatprep.mubr.msk.bf16.mxu1 %vm5070_vm0, %v5068_v4  ;;  %s5950_s19 = scalar_lea.vmem [#allocation13], %s4626_s14  ;;  %p6652_p4 = scmp.ne.s32.totalorder %s6636_s11, 0 }
  0xc0   : > { %s4104_s9 = sshll.u32 %s371_s18, 3  ;;  %v5448_v45 = vrot.slane %v424_v40, %v811_v38  ;;  %v5452_v46 = vrot.slane %v424_v40, %v617_v39  ;;  %v5461_v50 = vrot.slane %v424_v40, %v1043_v44  ;;  %s3953_s15 = ssub.s32 (%p6652_p4), 75, %s5323_s13 }
  0xc1   : > { %s5332_s29 = scalar_lea.vmem %s6623_s0, %s4104_s9  ;;  %4537 = vmatpush3.bf16.msra.mxu0 %v4802_v6  ;;  %4623 = vmatpush3.bf16.msra.mxu1 %v4802_v6  ;;  %p3954_p7 = scmp.lt.s32.totalorder (%p6652_p4), %s3953_s15, 38 }
  0xc2   : > { %v386_v2 = vld [vmem:[%s5332_s29] sm:$0xff]  ;;  %v387_v3 = vld [vmem:[%s5332_s29 + $0x8] sm:$0xff]  ;;  %v388_v8 = vld [vmem:[%s5332_s29 + $0x10] sm:$0xff]  ;;  %4538 = vmatprep.subr.bf16.mxu0 %v5068_v4  ;;  %4620 = vmatprep.subr.bf16.mxu1 %v5068_v4 }
  0xc3   : > { %658 = vperm.xlu1 %4738, %v386_v2   ;;  %427 = vperm.xlu0 %4737, %v386_v2   ;;  %v390_v10 = vld [vmem:[%s5332_s29 + $0x20] sm:$0xff]  ;;  %v392_v12 = vld [vmem:[%s5332_s29 + $0x30] sm:$0xff]  ;;  %v389_v13 = vld [vmem:[%s5332_s29 + $0x18] sm:$0xff] }
  0xc4   : > { %v394_v14 = vld [vmem:[%s5332_s29 + $0x40] sm:$0xff]  ;;  %v396_v15 = vld [vmem:[%s5332_s29 + $0x50] sm:$0xff]  ;;  %v391_v16 = vld [vmem:[%s5332_s29 + $0x28] sm:$0xff] }
  0xc5   : > { %4539 = vmatpush3.bf16.msra.mxu0 %v4803_v9  ;;  %4624 = vmatpush3.bf16.msra.mxu1 %v4803_v9  ;;  %v393_v17 = vld [vmem:[%s5332_s29 + $0x38] sm:$0xff]  ;;  %v395_v18 = vld [vmem:[%s5332_s29 + $0x48] sm:$0xff]  ;;  %v398_v25 = vld [vmem:[%s5332_s29 + $0x60] sm:$0xff] }
  0xc6   : > { %4540 = vmatprep.subr.bf16.mxu0 %v5068_v4  ;;  %4621 = vmatprep.subr.bf16.mxu1 %v5068_v4  ;;  %v397_v19 = vld [vmem:[%s5332_s29 + $0x58] sm:$0xff]  ;;  %v399_v20 = vld [vmem:[%s5332_s29 + $0x68] sm:$0xff]  ;;  %v400_v26 = vld [vmem:[%s5332_s29 + $0x70] sm:$0xff] }
  0xc7   : > { %662 = vperm.xlu1 %4738, %v387_v3   ;;  %432 = vperm.xlu0 %4737, %v387_v3   ;;  %v5370_v21 = vld [vmem:[%s5332_s29 + $0x78] sm:$0xff]  ;;  %v5375_v22 = vld [vmem:[%s5332_s29 + $0x88] sm:$0xff]  ;;  %v5393_v27 = vld [vmem:[%s5332_s29 + $0x80] sm:$0xff] }
  0xc8   : > { %v5379_v23 = vld [vmem:[%s5332_s29 + $0x98] sm:$0xff]  ;;  %v5384_v24 = vld [vmem:[%s5332_s29 + $0xa8] sm:$0xff]  ;;  %v5398_v28 = vld [vmem:[%s5332_s29 + $0x90] sm:$0xff] }
  0xc9   : > { %4541 = vmatpush3.bf16.msra.mxu0 %v4804_v11  ;;  %4625 = vmatpush3.bf16.msra.mxu1 %v4804_v11  ;;  %v5403_v29 = vld [vmem:[%s5332_s29 + $0xa0] sm:$0xff]  ;;  %v5407_v30 = vld [vmem:[%s5332_s29 + $0xb0] sm:$0xff]  ;;  %v5421_v33 = vld [vmem:[%s5332_s29 + $0xb8] sm:$0xff] }
  0xca   : > { %v5412_v31 = vld [vmem:[%s5332_s29 + $0xc0] sm:$0xff]  ;;  %v5416_v32 = vld [vmem:[%s5332_s29 + $0xd0] sm:$0xff]  ;;  %v5427_v34 = vld [vmem:[%s5332_s29 + $0xc8] sm:$0xff] }
  0xcb   : > { %4740 = vset.pattern.permute.xlu1 %v5069_v7  ;;  %4739 = vset.pattern.permute.xlu0 %v5069_v7  ;;  %v5435_v37 = vld [vmem:[%s5332_s29 + $0xd8] sm:$0xff]  ;;  %v5441_v41 = vld [vmem:[%s5332_s29 + $0xe8] sm:$0xff] }
  0xcc   : > { %894 = vperm.xlu1 %4740, %v387_v3   ;;  %890 = vperm.xlu0 %4739, %v386_v2   ;;  %v5455_v47 = vld [vmem:[%s5332_s29 + $0xf8] sm:$0xff]  ;;  %v5468_v55 = vld [vmem:[%s5332_s29 + $0x108] sm:$0xff]  ;;  %v5477_v3 = vld [vmem:[%s5332_s29 + $0xe0] sm:$0xff] }
  0xd0   : > { %4741 = vset.pattern.permute.xlu1 %v5067_v1  ;;  %898 = vperm.xlu0 %4739, %v388_v8  }
  0xd1   : > { %437 = vperm.xlu1 %4741, %v388_v8  }
  0xd4   : > { %906 = vperm.xlu0 %4739, %v390_v10  }
  0xd5   : > { %4742 = vset.pattern.permute.xlu1 %v5066_v0 }
  0xd6   : > { %666 = vperm.xlu1 %4742, %v388_v8  }
  0xd8   : > { %914 = vperm.xlu0 %4739, %v392_v12  }
  0xda   : > { %670 = vperm.xlu1 %4742, %v389_v13  }
  0xdc   : > { %922 = vperm.xlu0 %4739, %v394_v14  }
  0xde   : > { %4743 = vset.pattern.permute.xlu1 %v5069_v7 }
  0xdf   : > { %902 = vperm.xlu1 %4743, %v389_v13  }
  0xe0   : > { %930 = vperm.xlu0 %4739, %v396_v15  }
  0xe3   : > { %4744 = vset.pattern.permute.xlu1 %v5067_v1 }
  0xe4   : > { %447 = vperm.xlu1 %4744, %v390_v10   ;;  %4755 = vset.pattern.permute.xlu0 %v5067_v1 }
  0xe5   : > { %442 = vperm.xlu0 %4755, %v389_v13  }
  0xe8   : > { %4745 = vset.pattern.permute.xlu1 %v5066_v0 }
  0xe9   : > { %674 = vperm.xlu1 %4745, %v390_v10   ;;  %452 = vperm.xlu0 %4755, %v391_v16  }
  0xed   : > { %678 = vperm.xlu1 %4745, %v391_v16   ;;  %462 = vperm.xlu0 %4755, %v393_v17  }
  0xf1   : > { %4746 = vset.pattern.permute.xlu1 %v5069_v7  ;;  %472 = vperm.xlu0 %4755, %v395_v18  }
  0xf2   : > { %910 = vperm.xlu1 %4746, %v391_v16  }
  0xf5   : > { %482 = vperm.xlu0 %4755, %v397_v19  }
  0xf6   : > { %4747 = vset.pattern.permute.xlu1 %v5067_v1 }
  0xf7   : > { %457 = vperm.xlu1 %4747, %v392_v12  }
  0xf9   : > { %492 = vperm.xlu0 %4755, %v399_v20  }
  0xfb   : > { %4748 = vset.pattern.permute.xlu1 %v5066_v0 }
  0xfc   : > { %682 = vperm.xlu1 %4748, %v392_v12  }
  0xfd   : > { %502 = vperm.xlu0 %4755, %v5370_v21  }
 0x100   : > { %686 = vperm.xlu1 %4748, %v393_v17  }
 0x101   : > { %512 = vperm.xlu0 %4755, %v5375_v22  }
 0x104   : > { %4749 = vset.pattern.permute.xlu1 %v5069_v7 }
 0x105   : > { %918 = vperm.xlu1 %4749, %v393_v17   ;;  %522 = vperm.xlu0 %4755, %v5379_v23   ;;  %v5494_v17 = vld [vmem:[%s5332_s29 + $0xf0] sm:$0xff] }
 0x109   : > { %4750 = vset.pattern.permute.xlu1 %v5067_v1  ;;  %532 = vperm.xlu0 %4755, %v5384_v24  }
 0x10a   : > { %467 = vperm.xlu1 %4750, %v394_v14  }
 0x10d   : > { %4770 = vset.pattern.permute.xlu0 %v5069_v7 }
 0x10e   : > { %4751 = vset.pattern.permute.xlu1 %v5066_v0  ;;  %938 = vperm.xlu0 %4770, %v398_v25  }
 0x10f   : > { %690 = vperm.xlu1 %4751, %v394_v14  }
 0x112   : > { %946 = vperm.xlu0 %4770, %v400_v26  }
 0x113   : > { %694 = vperm.xlu1 %4751, %v395_v18  }
 0x116   : > { %954 = vperm.xlu0 %4770, %v5393_v27  }
 0x117   : > { %4752 = vset.pattern.permute.xlu1 %v5069_v7 }
 0x118   : > { %926 = vperm.xlu1 %4752, %v395_v18  }
 0x11a   : > { %962 = vperm.xlu0 %4770, %v5398_v28  }
 0x11c   : > { %4753 = vset.pattern.permute.xlu1 %v5067_v1 }
 0x11d   : > { %477 = vperm.xlu1 %4753, %v396_v15  }
 0x11e   : > { %970 = vperm.xlu0 %4770, %v5403_v29  }
 0x121   : > { %4754 = vset.pattern.permute.xlu1 %v5066_v0 }
 0x122   : > { %698 = vperm.xlu1 %4754, %v396_v15   ;;  %978 = vperm.xlu0 %4770, %v5407_v30  }
 0x126   : > { %702 = vperm.xlu1 %4754, %v397_v19   ;;  %986 = vperm.xlu0 %4770, %v5412_v31  }
 0x12a   : > { %4756 = vset.pattern.permute.xlu1 %v5069_v7  ;;  %994 = vperm.xlu0 %4770, %v5416_v32  }
 0x12b   : > { %934 = vperm.xlu1 %4756, %v397_v19  }
 0x12e   : > { %4781 = vset.pattern.permute.xlu0 %v5067_v1 }
 0x12f   : > { %4757 = vset.pattern.permute.xlu1 %v5067_v1  ;;  %542 = vperm.xlu0 %4781, %v5421_v33  }
 0x130   : > { %487 = vperm.xlu1 %4757, %v398_v25  }
 0x133   : > { %552 = vperm.xlu0 %4781, %v5427_v34  }
 0x134   : > { %4758 = vset.pattern.permute.xlu1 %v5066_v0 }
 0x135   : > { %706 = vperm.xlu1 %4758, %v398_v25  }
 0x137   : > { %562 = vperm.xlu0 %4781, %v5435_v37  }
 0x139   : > { %710 = vperm.xlu1 %4758, %v399_v20  }
 0x13b   : > { %572 = vperm.xlu0 %4781, %v5441_v41  }
 0x13d   : > { %4759 = vset.pattern.permute.xlu1 %v5069_v7 }
 0x13e   : > { %942 = vperm.xlu1 %4759, %v399_v20  }
 0x13f   : > { %582 = vperm.xlu0 %4781, %v5455_v47  }
 0x142   : > { %4760 = vset.pattern.permute.xlu1 %v5067_v1  ;;  %v659_v42 = vpop.permute.xlu1 %658  ;;  %v428_v43 = vpop.permute.xlu0 %427 }
 0x143   : > { %497 = vperm.xlu1 %4760, %v400_v26   ;;  %v813_v51 = vmul.f32 %v5448_v45, %v659_v42  ;;  %v619_v52 = vmul.f32 %v5452_v46, %v428_v43  ;;  %592 = vperm.xlu0 %4781, %v5468_v55  }
 0x145   : > { %v851_v58 = vadd.f32 %v813_v51, %v619_v52 }
 0x146   : > { %v663_v48 = vpop.permute.xlu1 %662  ;;  %v433_v49 = vpop.permute.xlu0 %432 }
 0x147   : > { %4761 = vset.pattern.permute.xlu1 %v5066_v0  ;;  %v814_v53 = vmul.f32 %v5448_v45, %v663_v48  ;;  %v620_v54 = vmul.f32 %v5452_v46, %v433_v49  ;;  %4790 = vset.pattern.permute.xlu0 %v5069_v7 }
 0x148   : > { %714 = vperm.xlu1 %4761, %v400_v26   ;;  %1002 = vperm.xlu0 %4790, %v5477_v3  }
 0x149   : > { %v852_v59 = vadd.f32 %v814_v53, %v620_v54 }
 0x14b   : > { %v895_v56 = vpop.permute.xlu1 %894  ;;  %v891_v57 = vpop.permute.xlu0 %890 }
 0x14c   : > { %v1046_v60 = vmul.f32 %v5461_v50, %v895_v56  ;;  %v1045_v61 = vmul.f32 %v5461_v50, %v891_v57  ;;  %718 = vperm.xlu1 %4761, %v5370_v21   ;;  %1010 = vperm.xlu0 %4790, %v5494_v17  }
 0x14e   : > { %v1084_v63 = vadd.f32 %v1046_v60, %v852_v59  ;;  %v1083_v2 = vadd.f32 %v1045_v61, %v851_v58 }
 0x14f   : > { %v899_v5 = vpop.permute.xlu0 %898 }
 0x150   : > { %v1129_v6 = vadd.f32 %v5474_v62, %v1084_v63  ;;  %v1128_v8 = vadd.f32 %v5474_v62, %v1083_v2  ;;  %4762 = vset.pattern.permute.xlu1 %v5069_v7  ;;  %v438_v9 = vpop.permute.xlu1 %437  ;;  %v1047_v26 = vmul.f32 %v5461_v50, %v899_v5  ;;  %v5520_v5 = vld [vmem:[%s5332_s29 + $0x100] sm:$0xff] }
 0x151   : > { %950 = vperm.xlu1 %4762, %v5370_v21   ;;  %v621_v21 = vmul.f32 %v5452_v46, %v438_v9  ;;  %1018 = vperm.xlu0 %4790, %v5520_v5  }
 0x152   : > { %v1167_v10 = vmax.f32 %v1129_v6, 0.0  ;;  %v1166_v11 = vmax.f32 %v1128_v8, 0.0 }
 0x153   : > { %v907_v12 = vpop.permute.xlu0 %906 }
 0x154   : > { %v1204_v13 = vpack.c.bf16 %v1167_v10, %v1166_v11  ;;  %v1049_v59 = vmul.f32 %v5461_v50, %v907_v12 }
 0x155   : > { %4763 = vset.pattern.permute.xlu1 %v5067_v1  ;;  %v667_v14 = vpop.permute.xlu1 %666 }
 0x156   : > { %507 = vperm.xlu1 %4763, %v5393_v27   ;;  %4543 = vmatmul.mubr.msk.bf16.vlgmr.msra.gmra.mrb[0].mxu0 %vm1262_vm1, %v1204_v13  ;;  %v815_v19 = vmul.f32 %v5448_v45, %v667_v14 }
 0x157   : > { %v5488_v15 = vpop.permute.xlu0 %914  ;;  %4546 = vmatprep.mubr.msk.bf16.mxu0 %vm5070_vm0, %v5068_v4 }
 0x158   : > { %v853_v35 = vadd.f32 %v815_v19, %v621_v21 }
 0x159   : > { %v671_v16 = vpop.permute.xlu1 %670 }
 0x15a   : > { %4764 = vset.pattern.permute.xlu1 %v5066_v0  ;;  %v1085_v42 = vadd.f32 %v1047_v26, %v853_v35  ;;  %v816_v43 = vmul.f32 %v5448_v45, %v671_v16 }
 0x15b   : > { %722 = vperm.xlu1 %4764, %v5393_v27   ;;  %v5497_v18 = vpop.permute.xlu0 %922 }
 0x15c   : > { %v1130_v53 = vadd.f32 %v5474_v62, %v1085_v42 }
 0x15e   : > { %v903_v20 = vpop.permute.xlu1 %902  ;;  %v1168_v63 = vmax.f32 %v1130_v53, 0.0 }
 0x15f   : > { %726 = vperm.xlu1 %4764, %v5375_v22   ;;  %v5503_v25 = vpop.permute.xlu0 %930  ;;  %v1048_v49 = vmul.f32 %v5461_v50, %v903_v20 }
 0x163   : > { %4765 = vset.pattern.permute.xlu1 %v5069_v7  ;;  %v448_v40 = vpop.permute.xlu1 %447 }
 0x164   : > { %958 = vperm.xlu1 %4765, %v5375_v22   ;;  %v443_v27 = vpop.permute.xlu0 %442  ;;  %v623_v22 = vmul.f32 %v5452_v46, %v448_v40 }
 0x165   : > { %v622_v48 = vmul.f32 %v5452_v46, %v443_v27 }
 0x167   : > { %v854_v51 = vadd.f32 %v816_v43, %v622_v48 }
 0x168   : > { %4766 = vset.pattern.permute.xlu1 %v5067_v1  ;;  %v675_v52 = vpop.permute.xlu1 %674  ;;  %v453_v58 = vpop.permute.xlu0 %452 }
 0x169   : > { %v1086_v54 = vadd.f32 %v1048_v49, %v854_v51  ;;  %v817_v56 = vmul.f32 %v5448_v45, %v675_v52  ;;  %517 = vperm.xlu1 %4766, %v5398_v28   ;;  %v624_v8 = vmul.f32 %v5452_v46, %v453_v58  ;;  %v5546_v49 = vld [vmem:[%s5332_s29 + $0x110] sm:$0xff] }
 0x16a   : > { %1026 = vperm.xlu0 %4790, %v5546_v49  }
 0x16b   : > { %v1131_v57 = vadd.f32 %v5474_v62, %v1086_v54  ;;  %v855_v60 = vadd.f32 %v817_v56, %v623_v22 }
 0x16c   : > { %v679_v61 = vpop.permute.xlu1 %678  ;;  %v463_v42 = vpop.permute.xlu0 %462 }
 0x16d   : > { %v1169_v2 = vmax.f32 %v1131_v57, 0.0  ;;  %4767 = vset.pattern.permute.xlu1 %v5066_v0  ;;  %v818_v6 = vmul.f32 %v5448_v45, %v679_v61  ;;  %v1087_v10 = vadd.f32 %v1049_v59, %v855_v60  ;;  %v626_v52 = vmul.f32 %v5452_v46, %v463_v42 }
 0x16e   : > { %730 = vperm.xlu1 %4767, %v5398_v28   ;;  %4795 = vset.pattern.permute.xlu0 %v5067_v1 }
 0x16f   : > { %v1205_v9 = vpack.c.bf16 %v1169_v2, %v1168_v63  ;;  %v856_v12 = vadd.f32 %v818_v6, %v624_v8  ;;  %v1132_v14 = vadd.f32 %v5474_v62, %v1087_v10  ;;  %v1567_v10 = vld [vmem:[#allocation10 + $0x28] sm:$0xff] }
 0x170   : > { %v473_v2 = vpop.permute.xlu0 %472 }
 0x171   : > { %v911_v11 = vpop.permute.xlu1 %910  ;;  %4547 = vmatmul.mubr.msk.bf16.gmra.mrb[4].mxu0 %vm1262_vm1, %v1205_v9  ;;  %v1170_v20 = vmax.f32 %v1132_v14, 0.0  ;;  %v1563_v9 = vld [vmem:[#allocation10 + $0x8] sm:$0xff]  ;;  %v1053_v14 = vmul.f32 %v5461_v50, %v5497_v18 }
 0x172   : > { %v1050_v13 = vmul.f32 %v5461_v50, %v911_v11  ;;  %734 = vperm.xlu1 %4767, %v5379_v23   ;;  %4550 = vmatprep.mubr.msk.bf16.mxu0 %vm5070_vm0, %v5068_v4 }
 0x174   : > { %v1088_v16 = vadd.f32 %v1050_v13, %v856_v12  ;;  %v5570_v12 = vpop.permute.xlu0 %482  ;;  %v4132_v13 = vcombine.low %v1563_v9, %v1567_v10 }
 0x176   : > { %v1133_v28 = vadd.f32 %v5474_v62, %v1088_v16  ;;  %4768 = vset.pattern.permute.xlu1 %v5069_v7  ;;  %v458_v19 = vpop.permute.xlu1 %457 }
 0x177   : > { %966 = vperm.xlu1 %4768, %v5379_v23   ;;  %v625_v27 = vmul.f32 %v5452_v46, %v458_v19  ;;  %v1051_v23 = vmul.f32 %v5461_v50, %v5488_v15  ;;  %v1571_v19 = vld [vmem:[#allocation10 + $0x48] sm:$0xff] }
 0x178   : > { %v1171_v21 = vmax.f32 %v1133_v28, 0.0 }
 0x17a   : > { %v1206_v26 = vpack.c.bf16 %v1171_v21, %v1170_v20  ;;  %v1575_v20 = vld [vmem:[#allocation10 + $0x68] sm:$0xff] }
 0x17b   : > { %4769 = vset.pattern.permute.xlu1 %v5067_v1  ;;  %v683_v35 = vpop.permute.xlu1 %682 }
 0x17c   : > { %v819_v40 = vmul.f32 %v5448_v45, %v683_v35  ;;  %527 = vperm.xlu1 %4769, %v5403_v29   ;;  %4551 = vmatmul.mubr.msk.bf16.gmra.mrb[8].mxu0 %vm1262_vm1, %v1206_v26  ;;  %v628_v26 = vmul.f32 %v5452_v46, %v473_v2  ;;  %v4141_v35 = vcombine.high %v1571_v19, %v1575_v20 }
 0x17d   : > { %4554 = vmatprep.mubr.msk.bf16.mxu0 %vm5070_vm0, %v5068_v4 }
 0x17e   : > { %v857_v43 = vadd.f32 %v819_v40, %v625_v27  ;;  %v5579_v40 = vld [vmem:[%s5332_s29 + $0x128] sm:$0xff]  ;;  %v4140_v27 = vcombine.low %v1571_v19, %v1575_v20  ;;  %v1607_v19 = vld [vmem:[#allocation10 + $0x168] sm:$0xff] }
 0x17f   : > { %v687_v48 = vpop.permute.xlu1 %686 }
 0x180   : > { %4771 = vset.pattern.permute.xlu1 %v5066_v0  ;;  %v820_v51 = vmul.f32 %v5448_v45, %v687_v48  ;;  %v1089_v53 = vadd.f32 %v1051_v23, %v857_v43  ;;  %v5582_v23 = vpop.permute.xlu0 %492  ;;  %v1579_v43 = vld [vmem:[#allocation10 + $0x88] sm:$0xff] }
 0x181   : > { %738 = vperm.xlu1 %4771, %v5403_v29   ;;  %v5559_v29 = vld [vmem:[%s5332_s29 + $0x118] sm:$0xff]  ;;  %v1583_v48 = vld [vmem:[#allocation10 + $0xa8] sm:$0xff] }
 0x182   : > { %v858_v56 = vadd.f32 %v820_v51, %v626_v52  ;;  %v1134_v22 = vadd.f32 %v5474_v62, %v1089_v53  ;;  %602 = vperm.xlu0 %4795, %v5559_v29   ;;  %v4148_v53 = vcombine.low %v1579_v43, %v1583_v48 }
 0x184   : > { %v919_v54 = vpop.permute.xlu1 %918  ;;  %v1172_v60 = vmax.f32 %v1134_v22, 0.0  ;;  %v1587_v22 = vld [vmem:[#allocation10 + $0xc8] sm:$0xff] }
 0x185   : > { %v1052_v15 = vmul.f32 %v5461_v50, %v919_v54  ;;  %742 = vperm.xlu1 %4771, %v5384_v24  }
 0x186   : > { %612 = vperm.xlu0 %4795, %v5579_v40  }
 0x187   : > { %v1090_v57 = vadd.f32 %v1052_v15, %v858_v56  ;;  %v5588_v15 = vld [vmem:[%s5332_s29 + $0x120] sm:$0xff] }
 0x189   : > { %v1135_v58 = vadd.f32 %v5474_v62, %v1090_v57  ;;  %4772 = vset.pattern.permute.xlu1 %v5069_v7  ;;  %v468_v59 = vpop.permute.xlu1 %467  ;;  %v1591_v57 = vld [vmem:[#allocation10 + $0xe8] sm:$0xff] }
 0x18a   : > { %974 = vperm.xlu1 %4772, %v5384_v24   ;;  %v627_v11 = vmul.f32 %v5452_v46, %v468_v59  ;;  %v4133_v24 = vcombine.high %v1563_v9, %v1567_v10  ;;  %4799 = vset.pattern.permute.xlu0 %v5069_v7  ;;  %v1599_v9 = vld [vmem:[#allocation10 + $0x128] sm:$0xff] }
 0x18b   : > { %v1173_v61 = vmax.f32 %v1135_v58, 0.0  ;;  %1034 = vperm.xlu0 %4799, %v5588_v15  }
 0x18c   : > { %2211 = vmatprep.subr.bf16.mxu0 %v4133_v24 }
 0x18d   : > { %v1207_v63 = vpack.c.bf16 %v1173_v61, %v1172_v60  ;;  %2212 = vmatpush1.bf16.msra.mxu0 %v4132_v13  ;;  %v4157_v60 = vcombine.high %v1587_v22, %v1591_v57  ;;  %v5595_v61 = vpop.permute.xlu0 %502 }
 0x18e   : > { %4773 = vset.pattern.permute.xlu1 %v5067_v1  ;;  %v691_v6 = vpop.permute.xlu1 %690  ;;  %2213 = vmatprep.subr.bf16.mxu0 %v4141_v35 }
 0x18f   : > { %v821_v8 = vmul.f32 %v5448_v45, %v691_v6  ;;  %537 = vperm.xlu1 %4773, %v5407_v30   ;;  %4555 = vmatmul.mubr.msk.bf16.gmra.mrb[12].mxu0 %vm1262_vm1, %v1207_v63  ;;  %v4156_v63 = vcombine.low %v1587_v22, %v1591_v57  ;;  %v1623_v22 = vld [vmem:[#allocation10 + $0x1e8] sm:$0xff] }
 0x190   : > { %4558 = vmatprep.mubr.msk.bf16.mxu0 %vm5070_vm0, %v5068_v4 }
 0x191   : > { %v859_v16 = vadd.f32 %v821_v8, %v627_v11  ;;  %2214 = vmatpush1.bf16.msra.mxu0 %v4140_v27  ;;  %v1595_v8 = vld [vmem:[#allocation10 + $0x108] sm:$0xff] }
 0x192   : > { %v695_v28 = vpop.permute.xlu1 %694  ;;  %v4165_v11 = vcombine.high %v1595_v8, %v1599_v9  ;;  %v4164_v13 = vcombine.low %v1595_v8, %v1599_v9 }
 0x193   : > { %4774 = vset.pattern.permute.xlu1 %v5066_v0  ;;  %v822_v21 = vmul.f32 %v5448_v45, %v695_v28  ;;  %v1091_v18 = vadd.f32 %v1053_v14, %v859_v16  ;;  %v5602_v16 = vpop.permute.xlu0 %512  ;;  %v1603_v28 = vld [vmem:[#allocation10 + $0x148] sm:$0xff] }
 0x194   : > { %746 = vperm.xlu1 %4774, %v5407_v30   ;;  %v4149_v30 = vcombine.high %v1579_v43, %v1583_v48  ;;  %v4173_v20 = vcombine.high %v1603_v28, %v1607_v19  ;;  %v4172_v27 = vcombine.low %v1603_v28, %v1607_v19  ;;  %v1611_v43 = vld [vmem:[#allocation10 + $0x188] sm:$0xff]  ;;  %v632_v28 = vmul.f32 %v5452_v46, %v5582_v23 }
 0x195   : > { %v860_v51 = vadd.f32 %v822_v21, %v628_v26  ;;  %v1136_v54 = vadd.f32 %v5474_v62, %v1091_v18  ;;  %v1055_v21 = vmul.f32 %v5461_v50, %v5503_v25  ;;  %v630_v18 = vmul.f32 %v5452_v46, %v5570_v12  ;;  %v1615_v48 = vld [vmem:[#allocation10 + $0x1a8] sm:$0xff] }
 0x196   : > { %2215 = vmatprep.subr.bf16.mxu0 %v4149_v30  ;;  %v4180_v25 = vcombine.low %v1611_v43, %v1615_v48  ;;  %v1619_v12 = vld [vmem:[#allocation10 + $0x1c8] sm:$0xff] }
 0x197   : > { %v927_v42 = vpop.permute.xlu1 %926  ;;  %2216 = vmatpush1.bf16.msra.mxu0 %v4148_v53  ;;  %v1174_v2 = vmax.f32 %v1136_v54, 0.0  ;;  %v5613_v30 = vpop.permute.xlu0 %522  ;;  %v4189_v57 = vcombine.high %v1619_v12, %v1623_v22 }
 0x198   : > { %v1054_v52 = vmul.f32 %v5461_v50, %v927_v42  ;;  %750 = vperm.xlu1 %4774, %v5421_v33   ;;  %2217 = vmatprep.subr.bf16.mxu0 %v4157_v60 }
 0x19a   : > { %v1092_v56 = vadd.f32 %v1054_v52, %v860_v51  ;;  %v4181_v51 = vcombine.high %v1611_v43, %v1615_v48 }
 0x19b   : > { %2218 = vmatpush1.bf16.msra.mxu0 %v4156_v63 }
 0x19c   : > { %v1137_v58 = vadd.f32 %v5474_v62, %v1092_v56  ;;  %4775 = vset.pattern.permute.xlu1 %v5069_v7  ;;  %v478_v59 = vpop.permute.xlu1 %477  ;;  %2219 = vmatprep.subr.bf16.mxu0 %v4165_v11 }
 0x19d   : > { %982 = vperm.xlu1 %4775, %v5421_v33   ;;  %v629_v33 = vmul.f32 %v5452_v46, %v478_v59  ;;  %v4188_v59 = vcombine.low %v1619_v12, %v1623_v22  ;;  %v634_v12 = vmul.f32 %v5452_v46, %v5595_v61 }
 0x19e   : > { %v1175_v6 = vmax.f32 %v1137_v58, 0.0 }
 0x19f   : > { %2220 = vmatpush1.bf16.msra.mxu0 %v4164_v13 }
 0x1a0   : > { %v1208_v10 = vpack.c.bf16 %v1175_v6, %v1174_v2  ;;  %2221 = vmatprep.subr.bf16.mxu0 %v4173_v20  ;;  %v5620_v2 = vpop.permute.xlu0 %532 }
 0x1a1   : > { %4776 = vset.pattern.permute.xlu1 %v5067_v1  ;;  %v699_v24 = vpop.permute.xlu1 %698 }
 0x1a2   : > { %v823_v14 = vmul.f32 %v5448_v45, %v699_v24  ;;  %547 = vperm.xlu1 %4776, %v5412_v31   ;;  %4559 = vmatmul.mubr.msk.bf16.gmra.mrb[16].mxu0 %vm1262_vm1, %v1208_v10 }
 0x1a3   : > { %4562 = vmatprep.mubr.msk.bf16.mxu0 %vm5070_vm0, %v5068_v4  ;;  %2222 = vmatpush1.bf16.msra.mxu0 %v4172_v27 }
 0x1a4   : > { %v861_v26 = vadd.f32 %v823_v14, %v629_v33  ;;  %2223 = vmatprep.subr.bf16.mxu0 %v4181_v51  ;;  %v939_v24 = vpop.permute.xlu0 %938 }
 0x1a5   : > { %v703_v35 = vpop.permute.xlu1 %702  ;;  %v1057_v14 = vmul.f32 %v5461_v50, %v939_v24 }
 0x1a6   : > { %4777 = vset.pattern.permute.xlu1 %v5066_v0  ;;  %v824_v42 = vmul.f32 %v5448_v45, %v703_v35  ;;  %v1093_v52 = vadd.f32 %v1055_v21, %v861_v26 }
 0x1a7   : > { %754 = vperm.xlu1 %4777, %v5412_v31   ;;  %2224 = vmatpush1.bf16.msra.mxu0 %v4180_v25 }
 0x1a8   : > { %v862_v54 = vadd.f32 %v824_v42, %v630_v18  ;;  %v1138_v31 = vadd.f32 %v5474_v62, %v1093_v52  ;;  %2225 = vmatprep.subr.bf16.mxu0 %v4189_v57  ;;  %v947_v25 = vpop.permute.xlu0 %946 }
 0x1aa   : > { %v935_v53 = vpop.permute.xlu1 %934  ;;  %v1176_v6 = vmax.f32 %v1138_v31, 0.0 }
 0x1ab   : > { %v1056_v56 = vmul.f32 %v5461_v50, %v935_v53  ;;  %758 = vperm.xlu1 %4777, %v5427_v34   ;;  %2226 = vmatpush1.bf16.msra.mxu0 %v4188_v59 }
 0x1ac   : > { %v955_v24 = vpop.permute.xlu0 %954 }
 0x1ad   : > { %v1094_v58 = vadd.f32 %v1056_v56, %v862_v54 }
 0x1af   : > { %v1139_v60 = vadd.f32 %v5474_v62, %v1094_v58  ;;  %4778 = vset.pattern.permute.xlu1 %v5069_v7  ;;  %v488_v63 = vpop.permute.xlu1 %487 }
 0x1b0   : > { %990 = vperm.xlu1 %4778, %v5427_v34   ;;  %v631_v13 = vmul.f32 %v5452_v46, %v488_v63 }
 0x1b1   : > { %v1177_v8 = vmax.f32 %v1139_v60, 0.0 }
 0x1b3   : > { %v1209_v9 = vpack.c.bf16 %v1177_v8, %v1176_v6 }
 0x1b4   : > { %4779 = vset.pattern.permute.xlu1 %v5067_v1  ;;  %v707_v10 = vpop.permute.xlu1 %706 }
 0x1b5   : > { %v825_v11 = vmul.f32 %v5448_v45, %v707_v10  ;;  %557 = vperm.xlu1 %4779, %v5416_v32   ;;  %4563 = vmatmul.mubr.msk.bf16.gmra.mrb[20].mxu0 %vm1262_vm1, %v1209_v9 }
 0x1b6   : > { %4566 = vmatprep.mubr.msk.bf16.mxu0 %vm5070_vm0, %v5068_v4 }
 0x1b7   : > { %v863_v34 = vadd.f32 %v825_v11, %v631_v13 }
 0x1b8   : > { %v711_v33 = vpop.permute.xlu1 %710 }
 0x1b9   : > { %4780 = vset.pattern.permute.xlu1 %v5066_v0  ;;  %v826_v19 = vmul.f32 %v5448_v45, %v711_v33  ;;  %v1095_v20 = vadd.f32 %v1057_v14, %v863_v34  ;;  %v636_v33 = vmul.f32 %v5452_v46, %v5602_v16 }
 0x1ba   : > { %762 = vperm.xlu1 %4780, %v5416_v32  }
 0x1bb   : > { %v864_v26 = vadd.f32 %v826_v19, %v632_v28  ;;  %v1140_v27 = vadd.f32 %v5474_v62, %v1095_v20 }
 0x1bd   : > { %v943_v21 = vpop.permute.xlu1 %942  ;;  %v1178_v23 = vmax.f32 %v1140_v27, 0.0 }
 0x1be   : > { %v1058_v35 = vmul.f32 %v5461_v50, %v943_v21  ;;  %766 = vperm.xlu1 %4780, %v5435_v37  }
 0x1c0   : > { %v1096_v18 = vadd.f32 %v1058_v35, %v864_v26 }
 0x1c2   : > { %v1141_v42 = vadd.f32 %v5474_v62, %v1096_v18  ;;  %4782 = vset.pattern.permute.xlu1 %v5069_v7  ;;  %v498_v43 = vpop.permute.xlu1 %497 }
 0x1c3   : > { %998 = vperm.xlu1 %4782, %v5435_v37   ;;  %v633_v53 = vmul.f32 %v5452_v46, %v498_v43  ;;  %v1059_v37 = vmul.f32 %v5461_v50, %v947_v25 }
 0x1c4   : > { %v1179_v48 = vmax.f32 %v1141_v42, 0.0 }
 0x1c6   : > { %v1210_v32 = vpack.c.bf16 %v1179_v48, %v1178_v23 }
 0x1c7   : > { %4783 = vset.pattern.permute.xlu1 %v5067_v1  ;;  %v715_v51 = vpop.permute.xlu1 %714 }
 0x1c8   : > { %v827_v52 = vmul.f32 %v5448_v45, %v715_v51  ;;  %567 = vperm.xlu1 %4783, %v5477_v3   ;;  %4567 = vmatmul.mubr.msk.bf16.gmra.mrb[24].mxu0 %vm1262_vm1, %v1210_v32  ;;  %v963_v32 = vpop.permute.xlu0 %962 }
 0x1c9   : > { %4570 = vmatprep.mubr.msk.bf16.mxu0 %vm5070_vm0, %v5068_v4 }
 0x1ca   : > { %v865_v54 = vadd.f32 %v827_v52, %v633_v53  ;;  %v638_v53 = vmul.f32 %v5452_v46, %v5613_v30 }
 0x1cb   : > { %v719_v56 = vpop.permute.xlu1 %718 }
 0x1cc   : > { %4784 = vset.pattern.permute.xlu1 %v5066_v0  ;;  %v828_v22 = vmul.f32 %v5448_v45, %v719_v56  ;;  %v1097_v57 = vadd.f32 %v1059_v37, %v865_v54 }
 0x1cd   : > { %770 = vperm.xlu1 %4784, %v5477_v3  }
 0x1ce   : > { %v866_v58 = vadd.f32 %v828_v22, %v634_v12  ;;  %v1142_v60 = vadd.f32 %v5474_v62, %v1097_v57 }
 0x1d0   : > { %v951_v31 = vpop.permute.xlu1 %950  ;;  %v1180_v61 = vmax.f32 %v1142_v60, 0.0 }
 0x1d1   : > { %v1060_v59 = vmul.f32 %v5461_v50, %v951_v31  ;;  %774 = vperm.xlu1 %4784, %v5441_v41  }
 0x1d3   : > { %v1098_v63 = vadd.f32 %v1060_v59, %v866_v58 }
 0x1d5   : > { %v1143_v6 = vadd.f32 %v5474_v62, %v1098_v63  ;;  %4785 = vset.pattern.permute.xlu1 %v5069_v7  ;;  %v508_v8 = vpop.permute.xlu1 %507 }
 0x1d6   : > { %1006 = vperm.xlu1 %4785, %v5441_v41   ;;  %v635_v13 = vmul.f32 %v5452_v46, %v508_v8  ;;  %v1061_v41 = vmul.f32 %v5461_v50, %v955_v24 }
 0x1d7   : > { %v1181_v9 = vmax.f32 %v1143_v6, 0.0  ;;  %v971_v6 = vpop.permute.xlu0 %970 }
 0x1d9   : > { %v1211_v3 = vpack.c.bf16 %v1181_v9, %v1180_v61 }
 0x1da   : > { %4786 = vset.pattern.permute.xlu1 %v5067_v1  ;;  %v723_v10 = vpop.permute.xlu1 %722 }
 0x1db   : > { %v829_v11 = vmul.f32 %v5448_v45, %v723_v10  ;;  %577 = vperm.xlu1 %4786, %v5494_v17   ;;  %4571 = vmatmul.mubr.msk.bf16.gmra.mrb[28].mxu0 %vm1262_vm1, %v1211_v3  ;;  %v979_v10 = vpop.permute.xlu0 %978 }
 0x1dc   : > { %4574 = vmatprep.mubr.msk.bf16.mxu0 %vm5070_vm0, %v5068_v4 }
 0x1dd   : > { %v867_v34 = vadd.f32 %v829_v11, %v635_v13  ;;  %v640_v11 = vmul.f32 %v5452_v46, %v5620_v2 }
 0x1de   : > { %v727_v14 = vpop.permute.xlu1 %726 }
 0x1df   : > { %4787 = vset.pattern.permute.xlu1 %v5066_v0  ;;  %v830_v28 = vmul.f32 %v5448_v45, %v727_v14  ;;  %v1099_v19 = vadd.f32 %v1061_v41, %v867_v34 }
 0x1e0   : > { %778 = vperm.xlu1 %4787, %v5494_v17  }
 0x1e1   : > { %v868_v21 = vadd.f32 %v830_v28, %v636_v33  ;;  %v1144_v35 = vadd.f32 %v5474_v62, %v1099_v19  ;;  %v5713_v33 = vpop.permute.xlu0 %986 }
 0x1e3   : > { %v959_v20 = vpop.permute.xlu1 %958  ;;  %v1182_v16 = vmax.f32 %v1144_v35, 0.0  ;;  %v1562_v35 = vld [vmem:[#allocation10] sm:$0xff] }
 0x1e4   : > { %v1062_v26 = vmul.f32 %v5461_v50, %v959_v20  ;;  %782 = vperm.xlu1 %4787, %v5455_v47  }
 0x1e6   : > { %v1100_v27 = vadd.f32 %v1062_v26, %v868_v21  ;;  %v5719_v26 = vpop.permute.xlu0 %994 }
 0x1e8   : > { %v1145_v18 = vadd.f32 %v5474_v62, %v1100_v27  ;;  %4788 = vset.pattern.permute.xlu1 %v5069_v7  ;;  %v518_v42 = vpop.permute.xlu1 %517  ;;  %v1566_v27 = vld [vmem:[#allocation10 + $0x20] sm:$0xff] }
 0x1e9   : > { %1014 = vperm.xlu1 %4788, %v5455_v47   ;;  %v637_v51 = vmul.f32 %v5452_v46, %v518_v42  ;;  %v1063_v47 = vmul.f32 %v5461_v50, %v963_v32  ;;  %v4131_v42 = vcombine.high %v1562_v35, %v1566_v27 }
 0x1ea   : > { %v1183_v43 = vmax.f32 %v1145_v18, 0.0  ;;  %v543_v32 = vpop.permute.xlu0 %542 }
 0x1eb   : > { %1988 = vmatprep.subr.bf16.mxu1 %v4131_v42 }
 0x1ec   : > { %v1212_v17 = vpack.c.bf16 %v1183_v43, %v1182_v16  ;;  %v4130_v43 = vcombine.low %v1562_v35, %v1566_v27  ;;  %v1614_v35 = vld [vmem:[#allocation10 + $0x1a0] sm:$0xff]  ;;  %v1069_v27 = vmul.f32 %v5461_v50, %v5713_v33 }
 0x1ed   : > { %4789 = vset.pattern.permute.xlu1 %v5067_v1  ;;  %v731_v23 = vpop.permute.xlu1 %730 }
 0x1ee   : > { %v831_v48 = vmul.f32 %v5448_v45, %v731_v23  ;;  %587 = vperm.xlu1 %4789, %v5520_v5   ;;  %4575 = vmatmul.mubr.msk.bf16.gmra.mrb[32].mxu0 %vm1262_vm1, %v1212_v17  ;;  %v1570_v23 = vld [vmem:[#allocation10 + $0x40] sm:$0xff] }
 0x1ef   : > { %4578 = vmatprep.mubr.msk.bf16.mxu0 %vm5070_vm0, %v5068_v4 }
 0x1f0   : > { %v869_v52 = vadd.f32 %v831_v48, %v637_v51  ;;  %v1574_v48 = vld [vmem:[#allocation10 + $0x60] sm:$0xff] }
 0x1f1   : > { %v735_v25 = vpop.permute.xlu1 %734  ;;  %v4139_v51 = vcombine.high %v1570_v23, %v1574_v48 }
 0x1f2   : > { %4791 = vset.pattern.permute.xlu1 %v5066_v0  ;;  %v832_v54 = vmul.f32 %v5448_v45, %v735_v25  ;;  %v1101_v37 = vadd.f32 %v1063_v47, %v869_v52  ;;  %v1067_v52 = vmul.f32 %v5461_v50, %v979_v10 }
 0x1f3   : > { %786 = vperm.xlu1 %4791, %v5520_v5  }
 0x1f4   : > { %v870_v12 = vadd.f32 %v832_v54, %v638_v53  ;;  %v1146_v57 = vadd.f32 %v5474_v62, %v1101_v37  ;;  %v4138_v53 = vcombine.low %v1570_v23, %v1574_v48  ;;  %v642_v37 = vmul.f32 %v5452_v46, %v543_v32 }
 0x1f6   : > { %v967_v56 = vpop.permute.xlu1 %966  ;;  %v1184_v30 = vmax.f32 %v1146_v57, 0.0 }
 0x1f7   : > { %v1064_v22 = vmul.f32 %v5461_v50, %v967_v56  ;;  %790 = vperm.xlu1 %4791, %v5468_v55   ;;  %v1578_v56 = vld [vmem:[#allocation10 + $0x80] sm:$0xff] }
 0x1f9   : > { %v1102_v31 = vadd.f32 %v1064_v22, %v870_v12  ;;  %v1582_v12 = vld [vmem:[#allocation10 + $0xa0] sm:$0xff] }
 0x1fa   : > { %v4147_v22 = vcombine.high %v1578_v56, %v1582_v12 }
 0x1fb   : > { %v1147_v58 = vadd.f32 %v5474_v62, %v1102_v31  ;;  %4792 = vset.pattern.permute.xlu1 %v5069_v7  ;;  %v528_v59 = vpop.permute.xlu1 %527  ;;  %v4146_v31 = vcombine.low %v1578_v56, %v1582_v12 }
 0x1fc   : > { %1022 = vperm.xlu1 %4792, %v5468_v55   ;;  %v639_v61 = vmul.f32 %v5452_v46, %v528_v59  ;;  %v1065_v55 = vmul.f32 %v5461_v50, %v971_v6 }
 0x1fd   : > { %v1185_v60 = vmax.f32 %v1147_v58, 0.0 }
 0x1ff   : > { %v1213_v5 = vpack.c.bf16 %v1185_v60, %v1184_v30  ;;  %v1590_v60 = vld [vmem:[#allocation10 + $0xe0] sm:$0xff] }
 0x200   : > { %4793 = vset.pattern.permute.xlu1 %v5067_v1  ;;  %v739_v63 = vpop.permute.xlu1 %738 }
 0x201   : > { %v833_v8 = vmul.f32 %v5448_v45, %v739_v63  ;;  %597 = vperm.xlu1 %4793, %v5546_v49   ;;  %4579 = vmatmul.mubr.msk.bf16.gmra.mrb[36].mxu0 %vm1262_vm1, %v1213_v5 }
 0x202   : > { %2243 = vmatprep.mubr.bf16.mxu0 %v5067_v1 }
 0x203   : > { %v871_v9 = vadd.f32 %v833_v8, %v639_v61 }
 0x204   : > { %v743_v3 = vpop.permute.xlu1 %742 }
 0x205   : > { %4794 = vset.pattern.permute.xlu1 %v5066_v0  ;;  %v834_v24 = vmul.f32 %v5448_v45, %v743_v3  ;;  %v1103_v13 = vadd.f32 %v1065_v55, %v871_v9  ;;  %v1594_v9 = vld [vmem:[#allocation10 + $0x100] sm:$0xff] }
 0x206   : > { %794 = vperm.xlu1 %4794, %v5546_v49   ;;  %v1598_v55 = vld [vmem:[#allocation10 + $0x120] sm:$0xff] }
 0x207   : > { %v872_v41 = vadd.f32 %v834_v24, %v640_v11  ;;  %v1148_v28 = vadd.f32 %v5474_v62, %v1103_v13  ;;  %v4163_v3 = vcombine.high %v1594_v9, %v1598_v55  ;;  %v4162_v24 = vcombine.low %v1594_v9, %v1598_v55 }
 0x208   : > { %v1071_v55 = vmul.f32 %v5461_v50, %v5719_v26 }
 0x209   : > { %v975_v34 = vpop.permute.xlu1 %974  ;;  %v1186_v49 = vmax.f32 %v1148_v28, 0.0 }
 0x20a   : > { %v1066_v14 = vmul.f32 %v5461_v50, %v975_v34  ;;  %798 = vperm.xlu1 %4794, %v5559_v29   ;;  %v1602_v34 = vld [vmem:[#allocation10 + $0x140] sm:$0xff] }
 0x20c   : > { %v1104_v19 = vadd.f32 %v1066_v14, %v872_v41  ;;  %v1606_v41 = vld [vmem:[#allocation10 + $0x160] sm:$0xff] }
 0x20d   : > { %v4171_v28 = vcombine.high %v1602_v34, %v1606_v41 }
 0x20e   : > { %v1149_v20 = vadd.f32 %v5474_v62, %v1104_v19  ;;  %4796 = vset.pattern.permute.xlu1 %v5069_v7  ;;  %v538_v2 = vpop.permute.xlu1 %537 }
 0x20f   : > { %1030 = vperm.xlu1 %4796, %v5559_v29   ;;  %v641_v29 = vmul.f32 %v5452_v46, %v538_v2 }
 0x210   : > { %v1187_v21 = vmax.f32 %v1149_v20, 0.0  ;;  %v4170_v20 = vcombine.low %v1602_v34, %v1606_v41 }
 0x212   : > { %v1214_v18 = vpack.c.bf16 %v1187_v21, %v1186_v49  ;;  %v553_v49 = vpop.permute.xlu0 %552  ;;  %v1610_v21 = vld [vmem:[#allocation10 + $0x180] sm:$0xff] }
 0x213   : > { %4797 = vset.pattern.permute.xlu1 %v5067_v1  ;;  %v747_v16 = vpop.permute.xlu1 %746  ;;  %v4178_v23 = vcombine.low %v1610_v21, %v1614_v35  ;;  %v644_v32 = vmul.f32 %v5452_v46, %v553_v49 }
 0x214   : > { %v835_v17 = vmul.f32 %v5448_v45, %v747_v16  ;;  %607 = vperm.xlu1 %4797, %v5588_v15   ;;  %4583 = vmatmul.mubr.msk.bf16.vlgmr.msra.gmra.mrb[0].mxu1 %vm1262_vm1, %v1214_v18 }
 0x215   : > { %4586 = vmatprep.mubr.msk.bf16.mxu1 %vm5070_vm0, %v5068_v4  ;;  %1989 = vmatpush1.bf16.msra.mxu1 %v4130_v43 }
 0x216   : > { %v873_v47 = vadd.f32 %v835_v17, %v641_v29  ;;  %1990 = vmatprep.subr.bf16.mxu1 %v4139_v51  ;;  %v4179_v17 = vcombine.high %v1610_v21, %v1614_v35  ;;  %v5775_v35 = vld [vmem:[#allocation5] ss:$0 sm:$0xff] }
 0x217   : > { %v751_v25 = vpop.permute.xlu1 %750 }
 0x218   : > { %4798 = vset.pattern.permute.xlu1 %v5066_v0  ;;  %v836_v54 = vmul.f32 %v5448_v45, %v751_v25  ;;  %v1105_v57 = vadd.f32 %v1067_v52, %v873_v47  ;;  %v1586_v0 = vld [vmem:[#allocation10 + $0xc0] sm:$0xff] }
 0x219   : > { %802 = vperm.xlu1 %4798, %v5588_v15   ;;  %1991 = vmatpush1.bf16.msra.mxu1 %v4138_v53  ;;  %v4155_v5 = vcombine.high %v1586_v0, %v1590_v60  ;;  %v4154_v6 = vcombine.low %v1586_v0, %v1590_v60  ;;  %v1618_v47 = vld [vmem:[#allocation10 + $0x1c0] sm:$0xff]  ;;  %v563_v60 = vpop.permute.xlu0 %562 }
 0x21a   : > { %1992 = vmatprep.subr.bf16.mxu1 %v4147_v22  ;;  %v874_v59 = vadd.f32 %v836_v54, %v642_v37  ;;  %v1150_v63 = vadd.f32 %v5474_v62, %v1105_v57  ;;  %v1622_v25 = vld [vmem:[#allocation10 + $0x1e0] sm:$0xff] }
 0x21b   : > { %v4187_v37 = vcombine.high %v1618_v47, %v1622_v25  ;;  %v4186_v12 = vcombine.low %v1618_v47, %v1622_v25 }
 0x21c   : > { %v983_v58 = vpop.permute.xlu1 %982  ;;  %v1188_v10 = vmax.f32 %v1150_v63, 0.0 }
 0x21d   : > { %v1068_v30 = vmul.f32 %v5461_v50, %v983_v58  ;;  %806 = vperm.xlu1 %4798, %v5579_v40   ;;  %1993 = vmatpush1.bf16.msra.mxu1 %v4146_v31 }
 0x21e   : > { %1994 = vmatprep.subr.bf16.mxu1 %v4155_v5 }
 0x21f   : > { %v1106_v15 = vadd.f32 %v1068_v30, %v874_v59 }
 0x221   : > { %v1151_v8 = vadd.f32 %v5474_v62, %v1106_v15  ;;  %4800 = vset.pattern.permute.xlu1 %v5069_v7  ;;  %v548_v61 = vpop.permute.xlu1 %547  ;;  %1995 = vmatpush1.bf16.msra.mxu1 %v4154_v6  ;;  %v5741_v7 = vld [vmem:[#allocation8] ss:$0 sm:$0xff] }
 0x222   : > { %1038 = vperm.xlu1 %4800, %v5579_v40   ;;  %1996 = vmatprep.subr.bf16.mxu1 %v4163_v3  ;;  %v643_v40 = vmul.f32 %v5452_v46, %v548_v61  ;;  %v573_v61 = vpop.permute.xlu0 %572 }
 0x223   : > { %v1189_v11 = vmax.f32 %v1151_v8, 0.0 }
 0x225   : > { %v1215_v13 = vpack.c.bf16 %v1189_v11, %v1188_v10  ;;  %1997 = vmatpush1.bf16.msra.mxu1 %v4162_v24  ;;  %v646_v24 = vmul.f32 %v5452_v46, %v563_v60 }
 0x226   : > { %v755_v14 = vpop.permute.xlu1 %754  ;;  %1998 = vmatprep.subr.bf16.mxu1 %v4171_v28 }
 0x227   : > { %v837_v19 = vmul.f32 %v5448_v45, %v755_v14  ;;  %4587 = vmatmul.mubr.msk.bf16.gmra.mrb[4].mxu1 %vm1262_vm1, %v1215_v13  ;;  %v5768_v13 = vpop.permute.xlu0 %582 }
 0x228   : > { %4590 = vmatprep.mubr.msk.bf16.mxu1 %vm5070_vm0, %v5068_v4 }
 0x229   : > { %v1354_v2 = vpop.f32.mrb[0].mxu0  ;;  %v875_v18 = vadd.f32 %v837_v19, %v643_v40  ;;  %1999 = vmatpush1.bf16.msra.mxu1 %v4170_v20 }
 0x22a   : > { %v1355_v42 = vadd.f32 %v5741_v7, %v1354_v2  ;;  %v759_v16 = vpop.permute.xlu1 %758  ;;  %v4544_v43 = vpop.f32.mrb[1].mxu0  ;;  %2000 = vmatprep.subr.bf16.mxu1 %v4179_v17 }
 0x22b   : > { %v1357_v29 = vpop.f32.mrb[2].mxu0  ;;  %v838_v48 = vmul.f32 %v5448_v45, %v759_v16  ;;  %v1107_v33 = vadd.f32 %v1069_v27, %v875_v18  ;;  %v5773_v21 = vpop.permute.xlu0 %592 }
 0x22c   : > { %v1358_v51 = vadd.f32 %v5741_v7, %v1357_v29  ;;  %v4545_v52 = vpop.f32.mrb[3].mxu0  ;;  %v1505_v53 = vmax.f32 %v1355_v42, 0.0 }
 0x22d   : > { %2001 = vmatpush1.bf16.msra.mxu1 %v4178_v23  ;;  %v876_v22 = vadd.f32 %v838_v48, %v644_v32  ;;  %v1152_v58 = vadd.f32 %v5474_v62, %v1107_v33 }
 0x22e   : > { %v1506_v54 = vmax.f32 %v1358_v51, 0.0  ;;  %2002 = vmatprep.subr.bf16.mxu1 %v4187_v37 }
 0x22f   : > { %v991_v56 = vpop.permute.xlu1 %990  ;;  %v1190_v5 = vmax.f32 %v1152_v58, 0.0  ;;  %v1003_v52 = vpop.permute.xlu0 %1002 }
 0x230   : > { %v5752_v57 = vpack.c.bf16 %v1506_v54, %v1505_v53  ;;  %v1070_v31 = vmul.f32 %v5461_v50, %v991_v56  ;;  %v1073_v53 = vmul.f32 %v5461_v50, %v1003_v52 }
 0x231   : > { %2003 = vmatpush1.bf16.msra.mxu1 %v4186_v12 }
 0x232   : > { %v1108_v59 = vadd.f32 %v1070_v31, %v876_v22  ;;  %2244 = vmatmul.mubr.bf16.vlgmr.msra.gmra.mrb[40].mxu0 %v5752_v57  ;;  %v648_v22 = vmul.f32 %v5452_v46, %v573_v61 }
 0x233   : > { %2253 = vmatprep.mubr.bf16.mxu0 %v5067_v1 }
 0x234   : > { %v1153_v30 = vadd.f32 %v5474_v62, %v1108_v59  ;;  %v558_v0 = vpop.permute.xlu1 %557 }
 0x235   : > { %v645_v9 = vmul.f32 %v5452_v46, %v558_v0 }
 0x236   : > { %v1191_v63 = vmax.f32 %v1153_v30, 0.0 }
 0x238   : > { %v1216_v15 = vpack.c.bf16 %v1191_v63, %v1190_v5 }
 0x239   : > { %v763_v6 = vpop.permute.xlu1 %762 }
 0x23a   : > { %v839_v8 = vmul.f32 %v5448_v45, %v763_v6  ;;  %4591 = vmatmul.mubr.msk.bf16.gmra.mrb[8].mxu1 %vm1262_vm1, %v1216_v15 }
 0x23b   : > { %4594 = vmatprep.mubr.msk.bf16.mxu1 %vm5070_vm0, %v5068_v4 }
 0x23c   : > { %v877_v3 = vadd.f32 %v839_v8, %v645_v9 }
 0x23d   : > { %v767_v10 = vpop.permute.xlu1 %766 }
 0x23e   : > { %v840_v11 = vmul.f32 %v5448_v45, %v767_v10  ;;  %v1109_v34 = vadd.f32 %v1071_v55, %v877_v3 }
 0x240   : > { %v878_v14 = vadd.f32 %v840_v11, %v646_v24  ;;  %v1154_v20 = vadd.f32 %v5474_v62, %v1109_v34 }
 0x242   : > { %v999_v41 = vpop.permute.xlu1 %998  ;;  %v1192_v43 = vmax.f32 %v1154_v20, 0.0 }
 0x243   : > { %v1072_v28 = vmul.f32 %v5461_v50, %v999_v41  ;;  %v1011_v41 = vpop.permute.xlu0 %1010 }
 0x244   : > { %v1362_v19 = vpop.f32.mrb[4].mxu0  ;;  %v1075_v20 = vmul.f32 %v5461_v50, %v1011_v41 }
 0x245   : > { %v1110_v40 = vadd.f32 %v1072_v28, %v878_v14  ;;  %v1363_v2 = vadd.f32 %v5741_v7, %v1362_v19  ;;  %v4548_v26 = vpop.f32.mrb[5].mxu0 }
 0x246   : > { %v1365_v49 = vpop.f32.mrb[6].mxu0 }
 0x247   : > { %v1155_v27 = vadd.f32 %v5775_v35, %v1110_v40  ;;  %v1366_v18 = vadd.f32 %v5741_v7, %v1365_v49  ;;  %v568_v42 = vpop.permute.xlu1 %567  ;;  %v4549_v16 = vpop.f32.mrb[7].mxu0  ;;  %v1507_v29 = vmax.f32 %v1363_v2, 0.0 }
 0x248   : > { %v647_v47 = vmul.f32 %v5452_v46, %v568_v42 }
 0x249   : > { %v1193_v17 = vmax.f32 %v1155_v27, 0.0  ;;  %v1508_v23 = vmax.f32 %v1366_v18, 0.0  ;;  %v650_v27 = vmul.f32 %v5452_v46, %v5768_v13 }
 0x24b   : > { %v1217_v62 = vpack.c.bf16 %v1193_v17, %v1192_v43  ;;  %v5779_v48 = vpack.c.bf16 %v1508_v23, %v1507_v29 }
 0x24c   : > { %v771_v32 = vpop.permute.xlu1 %770 }
 0x24d   : > { %v841_v51 = vmul.f32 %v5448_v45, %v771_v32  ;;  %4595 = vmatmul.mubr.msk.bf16.gmra.mrb[12].mxu1 %vm1262_vm1, %v1217_v62  ;;  %2254 = vmatmul.mubr.bf16.gmra.mrb[44].mxu0 %v5779_v48 }
 0x24e   : > { %2263 = vmatprep.mubr.bf16.mxu0 %v5067_v1  ;;  %4598 = vmatprep.mubr.msk.bf16.mxu1 %vm5070_vm0, %v5068_v4 }
 0x24f   : > { %v1370_v25 = vpop.f32.mrb[8].mxu0  ;;  %v879_v33 = vadd.f32 %v841_v51, %v647_v47 }
 0x250   : > { %v1371_v54 = vadd.f32 %v5741_v7, %v1370_v25  ;;  %v775_v37 = vpop.permute.xlu1 %774  ;;  %v4552_v56 = vpop.f32.mrb[9].mxu0 }
 0x251   : > { %v1373_v12 = vpop.f32.mrb[10].mxu0  ;;  %v842_v31 = vmul.f32 %v5448_v45, %v775_v37  ;;  %v1111_v30 = vadd.f32 %v1073_v53, %v879_v33  ;;  %v1019_v56 = vpop.permute.xlu0 %1018 }
 0x252   : > { %v1374_v58 = vadd.f32 %v5741_v7, %v1373_v12  ;;  %v4553_v59 = vpop.f32.mrb[11].mxu0  ;;  %v1509_v0 = vmax.f32 %v1371_v54, 0.0 }
 0x253   : > { %v880_v63 = vadd.f32 %v842_v31, %v648_v22  ;;  %v1156_v8 = vadd.f32 %v5775_v35, %v1111_v30  ;;  %v5823_v31 = vld [vmem:[#allocation10 + $0x10] sm:$0xff]  ;;  %v1565_v59 = vld [vmem:[#allocation10 + $0x18] sm:$0xff]  ;;  %v1077_v30 = vmul.f32 %v5461_v50, %v1019_v56 }
 0x254   : > { %v1510_v60 = vmax.f32 %v1374_v58, 0.0  ;;  %v5825_v58 = vld [vmem:[#allocation10 + $0x30] sm:$0xff] }
 0x255   : > { %v1007_v5 = vpop.permute.xlu1 %1006  ;;  %v1194_v3 = vmax.f32 %v1156_v8, 0.0 }
 0x256   : > { %v5793_v15 = vpack.c.bf16 %v1510_v60, %v1509_v0  ;;  %v1074_v6 = vmul.f32 %v5461_v50, %v1007_v5  ;;  %v4135_v60 = vcombine.high %v5823_v31, %v5825_v58  ;;  %v1569_v5 = vld [vmem:[#allocation10 + $0x38] sm:$0xff] }
 0x258   : > { %v1112_v9 = vadd.f32 %v1074_v6, %v880_v63  ;;  %2264 = vmatmul.mubr.bf16.gmra.mrb[48].mxu0 %v5793_v15  ;;  %2434 = vmatprep.subr.bf16.mxu1 %v4135_v60 }
 0x259   : > { %2273 = vmatprep.mubr.bf16.mxu0 %v5067_v1 }
 0x25a   : > { %v1157_v61 = vadd.f32 %v5775_v35, %v1112_v9  ;;  %v578_v55 = vpop.permute.xlu1 %577 }
 0x25b   : > { %v649_v14 = vmul.f32 %v5452_v46, %v578_v55  ;;  %v4137_v55 = vcombine.high %v1565_v59, %v1569_v5 }
 0x25c   : > { %v1195_v10 = vmax.f32 %v1157_v61, 0.0  ;;  %v4136_v61 = vcombine.low %v1565_v59, %v1569_v5 }
 0x25d   : > { %2657 = vmatprep.subr.bf16.mxu0 %v4137_v55 }
 0x25e   : > { %v1218_v11 = vpack.c.bf16 %v1195_v10, %v1194_v3  ;;  %2658 = vmatpush1.bf16.msra.mxu0 %v4136_v61 }
 0x25f   : > { %v779_v24 = vpop.permute.xlu1 %778 }
 0x260   : > { %v843_v34 = vmul.f32 %v5448_v45, %v779_v24  ;;  %4599 = vmatmul.mubr.msk.bf16.gmra.mrb[16].mxu1 %vm1262_vm1, %v1218_v11 }
 0x261   : > { %4602 = vmatprep.mubr.msk.bf16.mxu1 %vm5070_vm0, %v5068_v4 }
 0x262   : > { %v1378_v28 = vpop.f32.mrb[12].mxu0  ;;  %v881_v19 = vadd.f32 %v843_v34, %v649_v14  ;;  %v652_v34 = vmul.f32 %v5452_v46, %v5773_v21 }
 0x263   : > { %v1379_v40 = vadd.f32 %v5741_v7, %v1378_v28  ;;  %v783_v2 = vpop.permute.xlu1 %782  ;;  %v4556_v26 = vpop.f32.mrb[13].mxu0 }
 0x264   : > { %v1381_v49 = vpop.f32.mrb[14].mxu0  ;;  %v844_v18 = vmul.f32 %v5448_v45, %v783_v2  ;;  %v1113_v43 = vadd.f32 %v1075_v20, %v881_v19 }
 0x265   : > { %v1382_v42 = vadd.f32 %v5741_v7, %v1381_v49  ;;  %v4557_v16 = vpop.f32.mrb[15].mxu0  ;;  %v1511_v17 = vmax.f32 %v1379_v40, 0.0 }
 0x266   : > { %v882_v62 = vadd.f32 %v844_v18, %v650_v27  ;;  %v1158_v52 = vadd.f32 %v5775_v35, %v1113_v43  ;;  %v1027_v16 = vpop.permute.xlu0 %1026 }
 0x267   : > { %v1512_v29 = vmax.f32 %v1382_v42, 0.0 }
 0x268   : > { %v1015_v23 = vpop.permute.xlu1 %1014  ;;  %v1196_v33 = vmax.f32 %v1158_v52, 0.0 }
 0x269   : > { %v5811_v32 = vpack.c.bf16 %v1512_v29, %v1511_v17  ;;  %v1076_v51 = vmul.f32 %v5461_v50, %v1015_v23 }
 0x26b   : > { %v1114_v47 = vadd.f32 %v1076_v51, %v882_v62  ;;  %2274 = vmatmul.mubr.bf16.gmra.mrb[52].mxu0 %v5811_v32  ;;  %v603_v62 = vpop.permute.xlu0 %602 }
 0x26c   : > { %2283 = vmatprep.mubr.bf16.mxu0 %v5067_v1 }
 0x26d   : > { %v1159_v13 = vadd.f32 %v5775_v35, %v1114_v47  ;;  %v588_v25 = vpop.permute.xlu1 %587 }
 0x26e   : > { %v651_v22 = vmul.f32 %v5452_v46, %v588_v25 }
 0x26f   : > { %v1197_v53 = vmax.f32 %v1159_v13, 0.0 }
 0x271   : > { %v1219_v54 = vpack.c.bf16 %v1197_v53, %v1196_v33  ;;  %v654_v53 = vmul.f32 %v5452_v46, %v603_v62 }
 0x272   : > { %v787_v37 = vpop.permute.xlu1 %786 }
 0x273   : > { %v845_v12 = vmul.f32 %v5448_v45, %v787_v37  ;;  %4603 = vmatmul.mubr.msk.bf16.gmra.mrb[20].mxu1 %vm1262_vm1, %v1219_v54  ;;  %v1079_v37 = vmul.f32 %v5461_v50, %v1027_v16 }
 0x274   : > { %4606 = vmatprep.mubr.msk.bf16.mxu1 %vm5070_vm0, %v5068_v4 }
 0x275   : > { %v1386_v0 = vpop.f32.mrb[16].mxu0  ;;  %v883_v63 = vadd.f32 %v845_v12, %v651_v22 }
 0x276   : > { %v1387_v6 = vadd.f32 %v5741_v7, %v1386_v0  ;;  %v791_v8 = vpop.permute.xlu1 %790  ;;  %v4560_v9 = vpop.f32.mrb[17].mxu0  ;;  %v1573_v0 = vld [vmem:[#allocation10 + $0x58] sm:$0xff] }
 0x277   : > { %v1389_v3 = vpop.f32.mrb[18].mxu0  ;;  %v846_v10 = vmul.f32 %v5448_v45, %v791_v8  ;;  %v1115_v41 = vadd.f32 %v1077_v30, %v883_v63  ;;  %v1577_v63 = vld [vmem:[#allocation10 + $0x78] sm:$0xff] }
 0x278   : > { %v1390_v11 = vadd.f32 %v5741_v7, %v1389_v3  ;;  %v4561_v24 = vpop.f32.mrb[19].mxu0  ;;  %v1513_v14 = vmax.f32 %v1387_v6, 0.0  ;;  %v4144_v9 = vcombine.low %v1573_v0, %v1577_v63  ;;  %v4145_v61 = vcombine.high %v1573_v0, %v1577_v63 }
 0x279   : > { %v884_v20 = vadd.f32 %v846_v10, %v652_v34  ;;  %v1160_v26 = vadd.f32 %v5775_v35, %v1115_v41  ;;  %v613_v24 = vpop.permute.xlu0 %612 }
 0x27a   : > { %v1514_v28 = vmax.f32 %v1390_v11, 0.0  ;;  %2659 = vmatprep.subr.bf16.mxu0 %v4145_v61 }
 0x27b   : > { %v1023_v19 = vpop.permute.xlu1 %1022  ;;  %v1198_v21 = vmax.f32 %v1160_v26, 0.0  ;;  %2660 = vmatpush1.bf16.msra.mxu0 %v4144_v9 }
 0x27c   : > { %v5835_v40 = vpack.c.bf16 %v1514_v28, %v1513_v14  ;;  %v1078_v2 = vmul.f32 %v5461_v50, %v1023_v19  ;;  %v1581_v14 = vld [vmem:[#allocation10 + $0x98] sm:$0xff] }
 0x27d   : > { %v1585_v19 = vld [vmem:[#allocation10 + $0xb8] sm:$0xff] }
 0x27e   : > { %v1116_v49 = vadd.f32 %v1078_v2, %v884_v20  ;;  %2284 = vmatmul.mubr.bf16.gmra.mrb[56].mxu0 %v5835_v40  ;;  %v4152_v2 = vcombine.low %v1581_v14, %v1585_v19  ;;  %v4153_v26 = vcombine.high %v1581_v14, %v1585_v19 }
 0x27f   : > { %2293 = vmatprep.mubr.bf16.mxu0 %v5067_v1 }
 0x280   : > { %v1161_v27 = vadd.f32 %v5775_v35, %v1116_v49  ;;  %v598_v18 = vpop.permute.xlu1 %597  ;;  %2661 = vmatprep.subr.bf16.mxu0 %v4153_v26 }
 0x281   : > { %v653_v23 = vmul.f32 %v5452_v46, %v598_v18  ;;  %2662 = vmatpush1.bf16.msra.mxu0 %v4152_v2 }
 0x282   : > { %v1199_v42 = vmax.f32 %v1161_v27, 0.0  ;;  %v1035_v27 = vpop.permute.xlu0 %1034 }
 0x283   : > { %v1081_v16 = vmul.f32 %v5461_v50, %v1035_v27 }
 0x284   : > { %v1220_v43 = vpack.c.bf16 %v1199_v42, %v1198_v21 }
 0x285   : > { %v795_v17 = vpop.permute.xlu1 %794 }
 0x286   : > { %v847_v29 = vmul.f32 %v5448_v45, %v795_v17  ;;  %4607 = vmatmul.mubr.msk.bf16.gmra.mrb[24].mxu1 %vm1262_vm1, %v1220_v43 }
 0x287   : > { %4610 = vmatprep.mubr.msk.bf16.mxu1 %vm5070_vm0, %v5068_v4 }
 0x288   : > { %v1394_v51 = vpop.f32.mrb[20].mxu0  ;;  %v885_v52 = vadd.f32 %v847_v29, %v653_v23 }
 0x289   : > { %v1395_v47 = vadd.f32 %v5741_v7, %v1394_v51  ;;  %v799_v13 = vpop.permute.xlu1 %798  ;;  %v4564_v25 = vpop.f32.mrb[21].mxu0 }
 0x28a   : > { %v848_v33 = vmul.f32 %v5448_v45, %v799_v13  ;;  %v1397_v54 = vpop.f32.mrb[22].mxu0  ;;  %v1117_v22 = vadd.f32 %v1079_v37, %v885_v52 }
 0x28b   : > { %v1398_v56 = vadd.f32 %v5741_v7, %v1397_v54  ;;  %v4565_v12 = vpop.f32.mrb[23].mxu0  ;;  %v1515_v59 = vmax.f32 %v1395_v47, 0.0  ;;  %v656_v47 = vmul.f32 %v5452_v46, %v613_v24  ;;  %v1589_v24 = vld [vmem:[#allocation10 + $0xd8] sm:$0xff] }
 0x28c   : > { %v886_v60 = vadd.f32 %v848_v33, %v654_v53  ;;  %v1162_v55 = vadd.f32 %v5775_v35, %v1117_v22 }
 0x28d   : > { %v1516_v30 = vmax.f32 %v1398_v56, 0.0 }
 0x28e   : > { %v1031_v5 = vpop.permute.xlu1 %1030  ;;  %v1200_v34 = vmax.f32 %v1162_v55, 0.0 }
 0x28f   : > { %v5852_v6 = vpack.c.bf16 %v1516_v30, %v1515_v59  ;;  %v1080_v8 = vmul.f32 %v5461_v50, %v1031_v5  ;;  %v1576_v5 = vld [vmem:[#allocation10 + $0x70] sm:$0xff] }
 0x291   : > { %v1118_v3 = vadd.f32 %v1080_v8, %v886_v60  ;;  %2294 = vmatmul.mubr.bf16.gmra.mrb[60].mxu0 %v5852_v6  ;;  %v1572_v60 = vld [vmem:[#allocation10 + $0x50] sm:$0xff] }
 0x292   : > { %2303 = vmatprep.mubr.bf16.mxu0 %v5067_v1  ;;  %v4143_v61 = vcombine.high %v1572_v60, %v1576_v5 }
 0x293   : > { %v1163_v10 = vadd.f32 %v5775_v35, %v1118_v3  ;;  %v608_v11 = vpop.permute.xlu1 %607 }
 0x294   : > { %v655_v18 = vmul.f32 %v5452_v46, %v608_v11  ;;  %v1584_v11 = vld [vmem:[#allocation10 + $0xb0] sm:$0xff] }
 0x295   : > { %v1201_v41 = vmax.f32 %v1163_v10, 0.0  ;;  %v1580_v10 = vld [vmem:[#allocation10 + $0x90] sm:$0xff] }
 0x296   : > { %v4150_v2 = vcombine.low %v1580_v10, %v1584_v11 }
 0x297   : > { %v1221_v28 = vpack.c.bf16 %v1201_v41, %v1200_v34  ;;  %v4142_v34 = vcombine.low %v1572_v60, %v1576_v5  ;;  %v1593_v41 = vld [vmem:[#allocation10 + $0xf8] sm:$0xff] }
 0x298   : > { %v803_v20 = vpop.permute.xlu1 %802  ;;  %v4161_v19 = vcombine.high %v1589_v24, %v1593_v41  ;;  %v1609_v5 = vld [vmem:[#allocation10 + $0x178] sm:$0xff] }
 0x299   : > { %v849_v49 = vmul.f32 %v5448_v45, %v803_v20  ;;  %4611 = vmatmul.mubr.msk.bf16.gmra.mrb[28].mxu1 %vm1262_vm1, %v1221_v28  ;;  %v4160_v28 = vcombine.low %v1589_v24, %v1593_v41  ;;  %v4151_v20 = vcombine.high %v1580_v10, %v1584_v11 }
 0x29a   : > { %4614 = vmatprep.mubr.msk.bf16.mxu1 %vm5070_vm0, %v5068_v4  ;;  %2663 = vmatprep.subr.bf16.mxu0 %v4161_v19  ;;  %v1616_v19 = vld [vmem:[#allocation10 + $0x1b0] sm:$0xff] }
 0x29b   : > { %v1402_v21 = vpop.f32.mrb[24].mxu0  ;;  %v887_v42 = vadd.f32 %v849_v49, %v655_v18  ;;  %2664 = vmatpush1.bf16.msra.mxu0 %v4160_v28  ;;  %v1612_v28 = vld [vmem:[#allocation10 + $0x190] sm:$0xff] }
 0x29c   : > { %v1403_v43 = vadd.f32 %v5741_v7, %v1402_v21  ;;  %v807_v17 = vpop.permute.xlu1 %806  ;;  %v4568_v29 = vpop.f32.mrb[25].mxu0 }
 0x29d   : > { %v1405_v23 = vpop.f32.mrb[26].mxu0  ;;  %v850_v62 = vmul.f32 %v5448_v45, %v807_v17  ;;  %v1119_v13 = vadd.f32 %v1081_v16, %v887_v42 }
 0x29e   : > { %v1406_v51 = vadd.f32 %v5741_v7, %v1405_v23  ;;  %v4569_v52 = vpop.f32.mrb[27].mxu0  ;;  %v1517_v4 = vmax.f32 %v1403_v43, 0.0  ;;  %v1596_v23 = vld [vmem:[#allocation10 + $0x110] sm:$0xff] }
 0x29f   : > { %v888_v53 = vadd.f32 %v850_v62, %v656_v47  ;;  %v1164_v56 = vadd.f32 %v5775_v35, %v1119_v13  ;;  %v1600_v62 = vld [vmem:[#allocation10 + $0x130] sm:$0xff]  ;;  %v1601_v13 = vld [vmem:[#allocation10 + $0x138] sm:$0xff] }
 0x2a0   : > { %v1518_v25 = vmax.f32 %v1406_v51, 0.0  ;;  %v1597_v51 = vld [vmem:[#allocation10 + $0x118] sm:$0xff]  ;;  %v4166_v52 = vcombine.low %v1596_v23, %v1600_v62  ;;  %v4167_v47 = vcombine.high %v1596_v23, %v1600_v62 }
 0x2a1   : > { %v1039_v33 = vpop.permute.xlu1 %1038  ;;  %v1202_v22 = vmax.f32 %v1164_v56, 0.0 }
 0x2a2   : > { %v5869_v54 = vpack.c.bf16 %v1518_v25, %v1517_v4  ;;  %v1082_v37 = vmul.f32 %v5461_v50, %v1039_v33  ;;  %v4168_v25 = vcombine.low %v1597_v51, %v1601_v13  ;;  %v4169_v33 = vcombine.high %v1597_v51, %v1601_v13  ;;  %v1621_v13 = vld [vmem:[#allocation10 + $0x1d8] sm:$0xff] }
 0x2a3   : > { %v1642_v51 = vsub.s32 3, %v5431_v36 }
 0x2a4   : > { %v1120_v12 = vadd.f32 %v1082_v37, %v888_v53  ;;  %2304 = vmatmul.mubr.bf16.gmra.mrb[64].mxu0 %v5869_v54  ;;  %2665 = vmatprep.subr.bf16.mxu0 %v4169_v33  ;;  %v1625_v33 = vld [vmem:[#allocation10 + $0x1f8] sm:$0xff] }
 0x2a5   : > { %2313 = vmatprep.mubr.bf16.mxu0 %v5067_v1  ;;  %2666 = vmatpush1.bf16.msra.mxu0 %v4168_v25 }
 0x2a6   : > { %v1165_v45 = vadd.f32 %v5775_v35, %v1120_v12  ;;  %v4134_v35 = vcombine.low %v5823_v31, %v5825_v58  ;;  %v1588_v31 = vld [vmem:[#allocation10 + $0xd0] sm:$0xff] }
 0x2a7   : > { %v1592_v58 = vld [vmem:[#allocation10 + $0xf0] sm:$0xff] }
 0x2a8   : > { %v1203_v46 = vmax.f32 %v1165_v45, 0.0  ;;  %v4159_v26 = vcombine.high %v1588_v31, %v1592_v58  ;;  %v4158_v49 = vcombine.low %v1588_v31, %v1592_v58  ;;  %v4182_v31 = vcombine.low %v1612_v28, %v1616_v19 }
 0x2a9   : > { %v4183_v58 = vcombine.high %v1612_v28, %v1616_v19 }
 0x2aa   : > { %v1222_v59 = vpack.c.bf16 %v1203_v46, %v1202_v22 }
 0x2ac   : > { %4615 = vmatmul.mubr.msk.bf16.gmra.mrb[32].mxu1 %vm1262_vm1, %v1222_v59 }
 0x2ad   : > { %2020 = vmatprep.mubr.bf16.mxu1 %v5067_v1 }
 0x2ae   : > { %v1410_v30 = vpop.f32.mrb[28].mxu0 }
 0x2af   : > { %v1411_v0 = vadd.f32 %v5741_v7, %v1410_v30  ;;  %v4572_v50 = vpop.f32.mrb[29].mxu0  ;;  %v1604_v30 = vld [vmem:[#allocation10 + $0x150] sm:$0xff] }
 0x2b0   : > { %v1413_v63 = vpop.f32.mrb[30].mxu0  ;;  %v1605_v50 = vld [vmem:[#allocation10 + $0x158] sm:$0xff] }
 0x2b1   : > { %v1414_v8 = vadd.f32 %v5741_v7, %v1413_v63  ;;  %v4573_v9 = vpop.f32.mrb[31].mxu0  ;;  %v1519_v55 = vmax.f32 %v1411_v0, 0.0  ;;  %v1608_v0 = vld [vmem:[#allocation10 + $0x170] sm:$0xff] }
 0x2b2   : > { %v4175_v60 = vcombine.high %v1604_v30, %v1608_v0  ;;  %v4176_v9 = vcombine.low %v1605_v50, %v1609_v5 }
 0x2b3   : > { %v1520_v3 = vmax.f32 %v1414_v8, 0.0  ;;  %v4174_v8 = vcombine.low %v1604_v30, %v1608_v0 }
 0x2b4   : > { %2021 = vmatmul.mubr.bf16.vlgmr.msra.gmra.mrb[36].mxu1 %v5752_v57 }
 0x2b5   : > { %v5883_v14 = vpack.c.bf16 %v1520_v3, %v1519_v55  ;;  %2030 = vmatprep.mubr.bf16.mxu1 %v5067_v1  ;;  %2435 = vmatpush1.bf16.msra.mxu1 %v4134_v35  ;;  %v4177_v35 = vcombine.high %v1605_v50, %v1609_v5 }
 0x2b6   : > { %2436 = vmatprep.subr.bf16.mxu1 %v4143_v61 }
 0x2b7   : > { %2314 = vmatmul.mubr.bf16.gmra.mrb[68].mxu0 %v5883_v14  ;;  %2667 = vmatprep.subr.bf16.mxu0 %v4177_v35 }
 0x2b8   : > { %2323 = vmatprep.mubr.bf16.mxu0 %v5067_v1  ;;  %2668 = vmatpush1.bf16.msra.mxu0 %v4176_v9 }
 0x2b9   : > { %2437 = vmatpush1.bf16.msra.mxu1 %v4142_v34 }
 0x2ba   : > { %2438 = vmatprep.subr.bf16.mxu1 %v4151_v20  ;;  %v1613_v20 = vld [vmem:[#allocation10 + $0x198] sm:$0xff] }
 0x2bc   : > { %2031 = vmatmul.mubr.bf16.gmra.mrb[40].mxu1 %v5779_v48 }
 0x2bd   : > { %2040 = vmatprep.mubr.bf16.mxu1 %v5067_v1  ;;  %2439 = vmatpush1.bf16.msra.mxu1 %v4150_v2  ;;  %v1617_v2 = vld [vmem:[#allocation10 + $0x1b8] sm:$0xff] }
 0x2be   : > { %2440 = vmatprep.subr.bf16.mxu1 %v4159_v26 }
 0x2c1   : > { %v1418_v27 = vpop.f32.mrb[32].mxu0  ;;  %2441 = vmatpush1.bf16.msra.mxu1 %v4158_v49  ;;  %v4184_v49 = vcombine.low %v1613_v20, %v1617_v2 }
 0x2c2   : > { %v1419_v18 = vadd.f32 %v5741_v7, %v1418_v27  ;;  %v4576_v21 = vpop.f32.mrb[33].mxu0  ;;  %2442 = vmatprep.subr.bf16.mxu1 %v4167_v47  ;;  %v4185_v27 = vcombine.high %v1613_v20, %v1617_v2  ;;  %v1624_v47 = vld [vmem:[#allocation10 + $0x1f0] sm:$0xff] }
 0x2c3   : > { %v1421_v42 = vpop.f32.mrb[34].mxu0 }
 0x2c4   : > { %v1422_v16 = vadd.f32 %v5741_v7, %v1421_v42  ;;  %v4577_v43 = vpop.f32.mrb[35].mxu0  ;;  %2041 = vmatmul.mubr.bf16.gmra.mrb[44].mxu1 %v5793_v15  ;;  %v1521_v17 = vmax.f32 %v1419_v18, 0.0  ;;  %2669 = vmatprep.subr.bf16.mxu0 %v4185_v27 }
 0x2c5   : > { %2050 = vmatprep.mubr.bf16.mxu1 %v5067_v1  ;;  %2443 = vmatpush1.bf16.msra.mxu1 %v4166_v52  ;;  %v1620_v52 = vld [vmem:[#allocation10 + $0x1d0] sm:$0xff] }
 0x2c6   : > { %v1522_v29 = vmax.f32 %v1422_v16, 0.0  ;;  %2444 = vmatprep.subr.bf16.mxu1 %v4175_v60  ;;  %2670 = vmatpush1.bf16.msra.mxu0 %v4184_v49  ;;  %v4191_v25 = vcombine.high %v1620_v52, %v1624_v47 }
 0x2c8   : > { %v5894_v4 = vpack.c.bf16 %v1522_v29, %v1521_v17  ;;  %v5926_v29 = vld [vmem:[#allocation11] sm:$0xff] }
 0x2c9   : > { %2445 = vmatpush1.bf16.msra.mxu1 %v4174_v8 }
 0x2ca   : > { %2324 = vmatmul.mubr.bf16.gmra.mrb[72].mxu0 %v5894_v4  ;;  %2446 = vmatprep.subr.bf16.mxu1 %v4183_v58 }
 0x2cb   : > { %2333 = vmatprep.mubr.bf16.mxu0 %v5067_v1 }
 0x2cc   : > { %2051 = vmatmul.mubr.bf16.gmra.mrb[48].mxu1 %v5811_v32 }
 0x2cd   : > { %2060 = vmatprep.mubr.bf16.mxu1 %v5067_v1  ;;  %2447 = vmatpush1.bf16.msra.mxu1 %v4182_v31 }
 0x2ce   : > { %2448 = vmatprep.subr.bf16.mxu1 %v4191_v25 }
 0x2d4   : > { %v1426_v53 = vpop.f32.mrb[36].mxu0  ;;  %2061 = vmatmul.mubr.bf16.gmra.mrb[52].mxu1 %v5835_v40 }
 0x2d5   : > { %v1427_v37 = vadd.f32 %v5741_v7, %v1426_v53  ;;  %v4580_v56 = vpop.f32.mrb[37].mxu0  ;;  %2070 = vmatprep.mubr.bf16.mxu1 %v5067_v1 }
 0x2d6   : > { %v1429_v12 = vpop.f32.mrb[38].mxu0  ;;  %v4193_v56 = vcombine.high %v1621_v13, %v1625_v33 }
 0x2d7   : > { %v1430_v45 = vadd.f32 %v5741_v7, %v1429_v12  ;;  %v4581_v22 = vpop.f32.mrb[39].mxu0  ;;  %v1523_v46 = vmax.f32 %v1427_v37, 0.0  ;;  %v4190_v37 = vcombine.low %v1620_v52, %v1624_v47  ;;  %v5935_v12 = vrot.slane %v5926_v29, %v1043_v44 }
 0x2d8   : > { %v5939_v22 = vrot.slane %v5926_v29, %v1642_v51  ;;  %2671 = vmatprep.subr.bf16.mxu0 %v4193_v56 }
 0x2d9   : > { %v1524_v59 = vmax.f32 %v1430_v45, 0.0  ;;  %v4192_v45 = vcombine.low %v1621_v13, %v1625_v33  ;;  %2449 = vmatpush1.bf16.msra.mxu1 %v4190_v37 }
 0x2db   : > { %v5904_v63 = vpack.c.bf16 %v1524_v59, %v1523_v46  ;;  %2672 = vmatpush1.bf16.msra.mxu0 %v4192_v45 }
 0x2dc   : > { %2071 = vmatmul.mubr.bf16.gmra.mrb[56].mxu1 %v5852_v6 }
 0x2dd   : > { %2334 = vmatmul.mubr.bf16.gmra.mrb[76].mxu0 %v5904_v63  ;;  %2080 = vmatprep.mubr.bf16.mxu1 %v5067_v1 }
 0x2de   : > { %2343 = vmatprep.mubr.bf16.mxu0 %v5067_v1 }
 0x2e4   : > { %2081 = vmatmul.mubr.bf16.gmra.mrb[60].mxu1 %v5869_v54 }
 0x2e5   : > { %2090 = vmatprep.mubr.bf16.mxu1 %v5067_v1 }
 0x2e7   : > { %v1434_v61 = vpop.f32.mrb[0].mxu1 }
 0x2e8   : > { %v1435_v55 = vadd.f32 %v5741_v7, %v1434_v61  ;;  %v4584_v3 = vpop.f32.mrb[1].mxu1 }
 0x2e9   : > { %v1437_v10 = vpop.f32.mrb[2].mxu1 }
 0x2ea   : > { %v1438_v11 = vadd.f32 %v5741_v7, %v1437_v10  ;;  %v4585_v24 = vpop.f32.mrb[3].mxu1  ;;  %v1525_v34 = vmax.f32 %v1435_v55, 0.0 }
 0x2ec   : > { %v1526_v41 = vmax.f32 %v1438_v11, 0.0  ;;  %2091 = vmatmul.mubr.bf16.gmra.mrb[64].mxu1 %v5883_v14 }
 0x2ed   : > { %2100 = vmatprep.mubr.bf16.mxu1 %v5067_v1 }
 0x2ee   : > { %v5916_v26 = vpack.c.bf16 %v1526_v41, %v1525_v34 }
 0x2f0   : > { %2344 = vmatmul.mubr.bf16.gmra.mrb[80].mxu0 %v5916_v26 }
 0x2f1   : > { %2353 = vmatprep.mubr.bf16.mxu0 %v5067_v1 }
 0x2f4   : > { %2101 = vmatmul.mubr.bf16.gmra.mrb[68].mxu1 %v5894_v4 }
 0x2f5   : > { %2110 = vmatprep.mubr.bf16.mxu1 %v5067_v1 }
 0x2fa   : > { %v1442_v18 = vpop.f32.mrb[4].mxu1 }
 0x2fb   : > { %v1443_v21 = vadd.f32 %v5741_v7, %v1442_v18  ;;  %v4588_v42 = vpop.f32.mrb[5].mxu1 }
 0x2fc   : > { %v1445_v16 = vpop.f32.mrb[6].mxu1  ;;  %2111 = vmatmul.mubr.bf16.gmra.mrb[72].mxu1 %v5904_v63 }
 0x2fd   : > { %v1446_v43 = vadd.f32 %v5741_v7, %v1445_v16  ;;  %v4589_v17 = vpop.f32.mrb[7].mxu1  ;;  %2120 = vmatprep.mubr.bf16.mxu1 %v5067_v1  ;;  %v1527_v23 = vmax.f32 %v1443_v21, 0.0 }
 0x2ff   : > { %v1528_v62 = vmax.f32 %v1446_v43, 0.0 }
 0x301   : > { %v5929_v53 = vpack.c.bf16 %v1528_v62, %v1527_v23 }
 0x303   : > { %2354 = vmatmul.mubr.bf16.gmra.mrb[84].mxu0 %v5929_v53 }
 0x304   : > { %2121 = vmatmul.mubr.bf16.gmra.mrb[76].mxu1 %v5916_v26  ;;  %2363 = vmatprep.mubr.bf16.mxu0 %v5067_v1 }
 0x305   : > { %v2245_v46 = vpop.f32.mrb[40].mxu0  ;;  %2130 = vmatprep.mubr.bf16.mxu1 %v5067_v1 }
 0x306   : > { %v2246_v44 = vadd.f32 %v2245_v46, %v5935_v12  ;;  %v2247_v59 = vpop.f32.mrb[41].mxu0 }
 0x307   : > { %v2248_v30 = vadd.f32 %v2247_v59, %v5939_v22  ;;  %v2249_v0 = vpop.f32.mrb[42].mxu0 }
 0x308   : > { %v2250_v50 = vadd.f32 %v2249_v0, %v5935_v12  ;;  %v2251_v60 = vpop.f32.mrb[43].mxu0 }
 0x309   : > { %v4356_v5 = vpack.c.bf16 %v2248_v30, %v2246_v44  ;;  %v2252_v8 = vadd.f32 %v2251_v60, %v5939_v22 }
 0x30b   : > { %3793 = vst [vmem:[%s5950_s19 + $0x8] sm:$0xff] %v4356_v5  ;;  %v4360_v9 = vpack.c.bf16 %v2252_v8, %v2250_v50 }
 0x30c   : > { %2131 = vmatmul.mubr.bf16.gmra.mrb[80].mxu1 %v5929_v53 }
 0x30d   : > { %3797 = vst [vmem:[%s5950_s19 + $0x28] sm:$0xff] %v4360_v9  ;;  %v1450_v35 = vpop.f32.mrb[8].mxu1  ;;  %2140 = vmatprep.mubr.bf16.mxu1 %v5067_v1 }
 0x30e   : > { %v1451_v61 = vadd.f32 %v5741_v7, %v1450_v35  ;;  %v4592_v55 = vpop.f32.mrb[9].mxu1 }
 0x30f   : > { %v1453_v3 = vpop.f32.mrb[10].mxu1 }
 0x310   : > { %v1454_v10 = vadd.f32 %v5741_v7, %v1453_v3  ;;  %v4593_v11 = vpop.f32.mrb[11].mxu1  ;;  %v1529_v24 = vmax.f32 %v1451_v61, 0.0 }
 0x312   : > { %v1530_v34 = vmax.f32 %v1454_v10, 0.0 }
 0x314   : > { %v5958_v41 = vpack.c.bf16 %v1530_v34, %v1529_v24 }
 0x316   : > { %2141 = vmatmul.mubr.bf16.gmra.mrb[84].mxu1 %v5958_v41  ;;  %2364 = vmatmul.mubr.bf16.gmra.mrb[88].mxu0 %v5958_v41 }
 0x317   : > { %2150 = vmatprep.mubr.bf16.mxu1 %v5067_v1  ;;  %2373 = vmatprep.mubr.bf16.mxu0 %v5067_v1 }
 0x320   : > { %v1458_v28 = vpop.f32.mrb[12].mxu1  ;;  %v2255_v19 = vpop.f32.mrb[44].mxu0 }
 0x321   : > { %v1459_v20 = vadd.f32 %v5741_v7, %v1458_v28  ;;  %v2256_v31 = vadd.f32 %v2255_v19, %v5935_v12  ;;  %v4596_v58 = vpop.f32.mrb[13].mxu1  ;;  %v2257_v2 = vpop.f32.mrb[45].mxu0 }
 0x322   : > { %v2258_v49 = vadd.f32 %v2257_v2, %v5939_v22  ;;  %v1461_v27 = vpop.f32.mrb[14].mxu1  ;;  %v2259_v18 = vpop.f32.mrb[46].mxu0  ;;  %v5998_v2 = vld [vmem:[#allocation8] ss:$0 sm:$0xff] }
 0x323   : > { %v1462_v21 = vadd.f32 %v5741_v7, %v1461_v27  ;;  %v2260_v42 = vadd.f32 %v2259_v18, %v5935_v12  ;;  %v4597_v16 = vpop.f32.mrb[15].mxu1  ;;  %v2261_v43 = vpop.f32.mrb[47].mxu0  ;;  %v1531_v62 = vmax.f32 %v1459_v20, 0.0 }
 0x324   : > { %v4364_v17 = vpack.c.bf16 %v2258_v49, %v2256_v31  ;;  %v2262_v23 = vadd.f32 %v2261_v43, %v5939_v22 }
 0x325   : > { %v1532_v51 = vmax.f32 %v1462_v21, 0.0 }
 0x326   : > { %3801 = vst [vmem:[%s5950_s19 + $0x48] sm:$0xff] %v4364_v17  ;;  %v4368_v52 = vpack.c.bf16 %v2262_v23, %v2260_v42 }
 0x327   : > { %v5971_v47 = vpack.c.bf16 %v1532_v51, %v1531_v62 }
 0x328   : > { %3805 = vst [vmem:[%s5950_s19 + $0x68] sm:$0xff] %v4368_v52 }
 0x329   : > { %2151 = vmatmul.mubr.bf16.gmra.mrb[88].mxu1 %v5971_v47  ;;  %2374 = vmatmul.mubr.bf16.gmra.mrb[92].mxu0 %v5971_v47 }
 0x32a   : > { %2160 = vmatprep.mubr.bf16.mxu1 %v5067_v1  ;;  %2383 = vmatprep.mubr.bf16.mxu0 %v5067_v1 }
 0x32b   : > { %v2265_v13 = vpop.f32.mrb[48].mxu0 }
 0x32c   : > { %v2266_v25 = vadd.f32 %v2265_v13, %v5935_v12  ;;  %v2267_v33 = vpop.f32.mrb[49].mxu0 }
 0x32d   : > { %v2268_v37 = vadd.f32 %v2267_v33, %v5939_v22  ;;  %v2269_v56 = vpop.f32.mrb[50].mxu0 }
 0x32e   : > { %v2270_v45 = vadd.f32 %v2269_v56, %v5935_v12  ;;  %v2271_v46 = vpop.f32.mrb[51].mxu0 }
 0x32f   : > { %v4372_v44 = vpack.c.bf16 %v2268_v37, %v2266_v25  ;;  %v2272_v59 = vadd.f32 %v2271_v46, %v5939_v22 }
 0x331   : > { %3809 = vst [vmem:[%s5950_s19 + $0x88] sm:$0xff] %v4372_v44  ;;  %v4376_v30 = vpack.c.bf16 %v2272_v59, %v2270_v45 }
 0x333   : > { %3813 = vst [vmem:[%s5950_s19 + $0xa8] sm:$0xff] %v4376_v30  ;;  %v1466_v0 = vpop.f32.mrb[16].mxu1 }
 0x334   : > { %v1467_v50 = vadd.f32 %v5741_v7, %v1466_v0  ;;  %v4600_v60 = vpop.f32.mrb[17].mxu1 }
 0x335   : > { %v1469_v5 = vpop.f32.mrb[18].mxu1 }
 0x336   : > { %v1470_v8 = vadd.f32 %v5741_v7, %v1469_v5  ;;  %v4601_v9 = vpop.f32.mrb[19].mxu1  ;;  %v1533_v35 = vmax.f32 %v1467_v50, 0.0 }
 0x338   : > { %v1534_v61 = vmax.f32 %v1470_v8, 0.0 }
 0x33a   : > { %v5986_v55 = vpack.c.bf16 %v1534_v61, %v1533_v35 }
 0x33c   : > { %2161 = vmatmul.mubr.bf16.gmra.mrb[92].mxu1 %v5986_v55  ;;  %2384 = vmatmul.mubr.bf16.gmra.mrb[96].mxu0 %v5986_v55 }
 0x33d   : > { %2170 = vmatprep.mubr.bf16.mxu1 %v5067_v1  ;;  %2393 = vmatprep.mubr.bf16.mxu0 %v5067_v1 }
 0x33e   : > { %v2275_v3 = vpop.f32.mrb[52].mxu0 }
 0x33f   : > { %v2276_v10 = vadd.f32 %v2275_v3, %v5935_v12  ;;  %v2277_v11 = vpop.f32.mrb[53].mxu0 }
 0x340   : > { %v2278_v7 = vadd.f32 %v2277_v11, %v5939_v22  ;;  %v2279_v24 = vpop.f32.mrb[54].mxu0 }
 0x341   : > { %v2280_v34 = vadd.f32 %v2279_v24, %v5935_v12  ;;  %v2281_v28 = vpop.f32.mrb[55].mxu0 }
 0x342   : > { %v4380_v19 = vpack.c.bf16 %v2278_v7, %v2276_v10  ;;  %v2282_v20 = vadd.f32 %v2281_v28, %v5939_v22 }
 0x344   : > { %3817 = vst [vmem:[%s5950_s19 + $0xc8] sm:$0xff] %v4380_v19  ;;  %v4384_v31 = vpack.c.bf16 %v2282_v20, %v2280_v34 }
 0x346   : > { %3821 = vst [vmem:[%s5950_s19 + $0xe8] sm:$0xff] %v4384_v31  ;;  %v1474_v58 = vpop.f32.mrb[20].mxu1 }
 0x347   : > { %v1475_v49 = vadd.f32 %v5998_v2, %v1474_v58  ;;  %v4604_v27 = vpop.f32.mrb[21].mxu1 }
 0x348   : > { %v1477_v18 = vpop.f32.mrb[22].mxu1 }
 0x349   : > { %v1478_v21 = vadd.f32 %v5998_v2, %v1477_v18  ;;  %v4605_v42 = vpop.f32.mrb[23].mxu1  ;;  %v1535_v16 = vmax.f32 %v1475_v49, 0.0 }
 0x34b   : > { %v1536_v43 = vmax.f32 %v1478_v21, 0.0 }
 0x34d   : > { %v6002_v17 = vpack.c.bf16 %v1536_v43, %v1535_v16 }
 0x34f   : > { %2171 = vmatmul.mubr.bf16.gmra.mrb[96].mxu1 %v6002_v17  ;;  %2394 = vmatmul.mubr.bf16.gmra.mrb[100].mxu0 %v6002_v17 }
 0x350   : > { %2180 = vmatprep.mubr.bf16.mxu1 %v5067_v1  ;;  %2403 = vmatprep.mubr.bf16.mxu0 %v5067_v1 }
 0x351   : > { %v2285_v23 = vpop.f32.mrb[56].mxu0 }
 0x352   : > { %v2286_v62 = vadd.f32 %v2285_v23, %v5935_v12  ;;  %v2287_v51 = vpop.f32.mrb[57].mxu0 }
 0x353   : > { %v2288_v52 = vadd.f32 %v2287_v51, %v5939_v22  ;;  %v2289_v13 = vpop.f32.mrb[58].mxu0 }
 0x354   : > { %v2290_v25 = vadd.f32 %v2289_v13, %v5935_v12  ;;  %v2291_v33 = vpop.f32.mrb[59].mxu0 }
 0x355   : > { %v4388_v37 = vpack.c.bf16 %v2288_v52, %v2286_v62  ;;  %v2292_v56 = vadd.f32 %v2291_v33, %v5939_v22 }
 0x357   : > { %3825 = vst [vmem:[%s5950_s19 + $0x108] sm:$0xff] %v4388_v37  ;;  %v4392_v45 = vpack.c.bf16 %v2292_v56, %v2290_v25 }
 0x359   : > { %3829 = vst [vmem:[%s5950_s19 + $0x128] sm:$0xff] %v4392_v45  ;;  %v1482_v46 = vpop.f32.mrb[24].mxu1 }
 0x35a   : > { %v1483_v44 = vadd.f32 %v5998_v2, %v1482_v46  ;;  %v4608_v59 = vpop.f32.mrb[25].mxu1 }
 0x35b   : > { %v1485_v30 = vpop.f32.mrb[26].mxu1 }
 0x35c   : > { %v1486_v0 = vadd.f32 %v5998_v2, %v1485_v30  ;;  %v4609_v50 = vpop.f32.mrb[27].mxu1  ;;  %v1537_v60 = vmax.f32 %v1483_v44, 0.0 }
 0x35e   : > { %v1538_v5 = vmax.f32 %v1486_v0, 0.0 }
 0x360   : > { %v6016_v8 = vpack.c.bf16 %v1538_v5, %v1537_v60  ;;  %v6047_v60 = vrot.slane %v5926_v29, %v617_v39  ;;  %v6052_v5 = vrot.slane %v5926_v29, %v811_v38 }
 0x362   : > { %2181 = vmatmul.mubr.bf16.gmra.mrb[100].mxu1 %v6016_v8  ;;  %2404 = vmatmul.mubr.bf16.gmra.mrb[104].mxu0 %v6016_v8 }
 0x363   : > { %2190 = vmatprep.mubr.bf16.mxu1 %v5067_v1  ;;  %2413 = vmatprep.mubr.bf16.mxu0 %v5067_v1 }
 0x364   : > { %v2295_v9 = vpop.f32.mrb[60].mxu0 }
 0x365   : > { %v2296_v35 = vadd.f32 %v2295_v9, %v5935_v12  ;;  %v2297_v61 = vpop.f32.mrb[61].mxu0 }
 0x366   : > { %v2298_v3 = vadd.f32 %v2297_v61, %v5939_v22  ;;  %v2299_v10 = vpop.f32.mrb[62].mxu0 }
 0x367   : > { %v2300_v11 = vadd.f32 %v2299_v10, %v5935_v12  ;;  %v2301_v7 = vpop.f32.mrb[63].mxu0 }
 0x368   : > { %v4396_v24 = vpack.c.bf16 %v2298_v3, %v2296_v35  ;;  %v2302_v34 = vadd.f32 %v2301_v7, %v5939_v22 }
 0x36a   : > { %3833 = vst [vmem:[%s5950_s19 + $0x148] sm:$0xff] %v4396_v24  ;;  %v4400_v28 = vpack.c.bf16 %v2302_v34, %v2300_v11 }
 0x36c   : > { %3837 = vst [vmem:[%s5950_s19 + $0x168] sm:$0xff] %v4400_v28  ;;  %v1490_v19 = vpop.f32.mrb[28].mxu1 }
 0x36d   : > { %v1491_v20 = vadd.f32 %v5998_v2, %v1490_v19  ;;  %v4612_v31 = vpop.f32.mrb[29].mxu1 }
 0x36e   : > { %v1493_v58 = vpop.f32.mrb[30].mxu1 }
 0x36f   : > { %v1494_v49 = vadd.f32 %v5998_v2, %v1493_v58  ;;  %v4613_v27 = vpop.f32.mrb[31].mxu1  ;;  %v1539_v18 = vmax.f32 %v1491_v20, 0.0 }
 0x371   : > { %v1540_v21 = vmax.f32 %v1494_v49, 0.0 }
 0x373   : > { %v6030_v42 = vpack.c.bf16 %v1540_v21, %v1539_v18 }
 0x375   : > { %2191 = vmatmul.mubr.bf16.gmra.mrb[104].mxu1 %v6030_v42  ;;  %2414 = vmatmul.mubr.bf16.gmra.mrb[108].mxu0 %v6030_v42 }
 0x376   : > { %2200 = vmatprep.mubr.bf16.mxu1 %v5067_v1  ;;  %2423 = vmatprep.mubr.bf16.mxu0 %v5067_v1 }
 0x377   : > { %v2305_v16 = vpop.f32.mrb[64].mxu0 }
 0x378   : > { %v2306_v43 = vadd.f32 %v2305_v16, %v5935_v12  ;;  %v2307_v23 = vpop.f32.mrb[65].mxu0 }
 0x379   : > { %v2308_v62 = vadd.f32 %v2307_v23, %v5939_v22  ;;  %v2309_v51 = vpop.f32.mrb[66].mxu0 }
 0x37a   : > { %v2310_v52 = vadd.f32 %v2309_v51, %v5935_v12  ;;  %v2311_v13 = vpop.f32.mrb[67].mxu0 }
 0x37b   : > { %v4404_v25 = vpack.c.bf16 %v2308_v62, %v2306_v43  ;;  %v2312_v33 = vadd.f32 %v2311_v13, %v5939_v22 }
 0x37d   : > { %3841 = vst [vmem:[%s5950_s19 + $0x188] sm:$0xff] %v4404_v25  ;;  %v4408_v37 = vpack.c.bf16 %v2312_v33, %v2310_v52 }
 0x37f   : > { %3845 = vst [vmem:[%s5950_s19 + $0x1a8] sm:$0xff] %v4408_v37  ;;  %v1498_v56 = vpop.f32.mrb[32].mxu1 }
 0x380   : > { %v1499_v45 = vadd.f32 %v5998_v2, %v1498_v56  ;;  %v4616_v46 = vpop.f32.mrb[33].mxu1 }
 0x381   : > { %v1501_v44 = vpop.f32.mrb[34].mxu1 }
 0x382   : > { %v1502_v59 = vadd.f32 %v5998_v2, %v1501_v44  ;;  %v4617_v30 = vpop.f32.mrb[35].mxu1  ;;  %v1541_v0 = vmax.f32 %v1499_v45, 0.0 }
 0x384   : > { %v1542_v50 = vmax.f32 %v1502_v59, 0.0 }
 0x386   : > { %v6054_v9 = vpack.c.bf16 %v1542_v50, %v1541_v0 }
 0x387   : > { %v2022_v35 = vpop.f32.mrb[36].mxu1 }
 0x388   : > { %v2023_v61 = vadd.f32 %v2022_v35, %v6047_v60  ;;  %v2024_v3 = vpop.f32.mrb[37].mxu1  ;;  %2201 = vmatmul.mubr.bf16.gmra.mrb[108].mxu1 %v6054_v9  ;;  %2424 = vmatmul.mubr.bf16.gmra.mrb[112].mxu0 %v6054_v9 }
 0x389   : > { %v2025_v2 = vadd.f32 %v2024_v3, %v6052_v5  ;;  %v2026_v39 = vpop.f32.mrb[38].mxu1  ;;  %2466 = vmatprep.mubr.bf16.mxu1 %v5067_v1  ;;  %2689 = vmatprep.mubr.bf16.mxu0 %v5067_v1 }
 0x38a   : > { %v2027_v38 = vadd.f32 %v2026_v39, %v6047_v60  ;;  %v2028_v29 = vpop.f32.mrb[39].mxu1  ;;  %v2315_v10 = vpop.f32.mrb[68].mxu0 }
 0x38b   : > { %v4355_v11 = vpack.c.bf16 %v2025_v2, %v2023_v61  ;;  %v2029_v7 = vadd.f32 %v2028_v29, %v6052_v5  ;;  %v2316_v24 = vadd.f32 %v2315_v10, %v5935_v12  ;;  %v2317_v34 = vpop.f32.mrb[69].mxu0 }
 0x38c   : > { %v2318_v28 = vadd.f32 %v2317_v34, %v5939_v22  ;;  %v2319_v19 = vpop.f32.mrb[70].mxu0 }
 0x38d   : > { %3792 = vst [vmem:[%s5950_s19] sm:$0xff] %v4355_v11  ;;  %v4359_v20 = vpack.c.bf16 %v2029_v7, %v2027_v38  ;;  %v2320_v31 = vadd.f32 %v2319_v19, %v5935_v12  ;;  %v2321_v58 = vpop.f32.mrb[71].mxu0 }
 0x38e   : > { %v4412_v49 = vpack.c.bf16 %v2318_v28, %v2316_v24  ;;  %v2322_v27 = vadd.f32 %v2321_v58, %v5939_v22 }
 0x38f   : > { %3796 = vst [vmem:[%s5950_s19 + $0x20] sm:$0xff] %v4359_v20  ;;  %v2032_v18 = vpop.f32.mrb[40].mxu1 }
 0x390   : > { %3849 = vst [vmem:[%s5950_s19 + $0x1c8] sm:$0xff] %v4412_v49  ;;  %v4416_v21 = vpack.c.bf16 %v2322_v27, %v2320_v31  ;;  %v2033_v16 = vadd.f32 %v2032_v18, %v6047_v60  ;;  %v2034_v43 = vpop.f32.mrb[41].mxu1  ;;  %2467 = vmatmul.mubr.bf16.vlgmr.msra.gmra.mrb[112].mxu1 %v5752_v57  ;;  %2690 = vmatmul.mubr.bf16.vlgmr.msra.gmra.mrb[116].mxu0 %v5752_v57 }
 0x391   : > { %v2035_v23 = vadd.f32 %v2034_v43, %v6052_v5  ;;  %v2036_v62 = vpop.f32.mrb[42].mxu1  ;;  %2476 = vmatprep.mubr.bf16.mxu1 %v5067_v1  ;;  %2699 = vmatprep.mubr.bf16.mxu0 %v5067_v1 }
 0x392   : > { %3853 = vst [vmem:[%s5950_s19 + $0x1e8] sm:$0xff] %v4416_v21  ;;  %v2037_v51 = vadd.f32 %v2036_v62, %v6047_v60  ;;  %v2038_v52 = vpop.f32.mrb[43].mxu1 }
 0x393   : > { %v4363_v13 = vpack.c.bf16 %v2035_v23, %v2033_v16  ;;  %v2039_v25 = vadd.f32 %v2038_v52, %v6052_v5 }
 0x395   : > { %3800 = vst [vmem:[%s5950_s19 + $0x40] sm:$0xff] %v4363_v13  ;;  %v4367_v33 = vpack.c.bf16 %v2039_v25, %v2037_v51 }
 0x397   : > { %3804 = vst [vmem:[%s5950_s19 + $0x60] sm:$0xff] %v4367_v33  ;;  %v2042_v37 = vpop.f32.mrb[44].mxu1 }
 0x398   : > { %v2043_v57 = vadd.f32 %v2042_v37, %v6047_v60  ;;  %v2044_v56 = vpop.f32.mrb[45].mxu1  ;;  %2477 = vmatmul.mubr.bf16.gmra.mrb[116].mxu1 %v5779_v48  ;;  %2700 = vmatmul.mubr.bf16.gmra.mrb[120].mxu0 %v5779_v48 }
 0x399   : > { %v2045_v45 = vadd.f32 %v2044_v56, %v6052_v5  ;;  %v2046_v46 = vpop.f32.mrb[46].mxu1  ;;  %2486 = vmatprep.mubr.bf16.mxu1 %v5067_v1  ;;  %2709 = vmatprep.mubr.bf16.mxu0 %v5067_v1 }
 0x39a   : > { %v2047_v44 = vadd.f32 %v2046_v46, %v6047_v60  ;;  %v2048_v59 = vpop.f32.mrb[47].mxu1 }
 0x39b   : > { %v4371_v30 = vpack.c.bf16 %v2045_v45, %v2043_v57  ;;  %v2049_v0 = vadd.f32 %v2048_v59, %v6052_v5 }
 0x39d   : > { %3808 = vst [vmem:[%s5950_s19 + $0x80] sm:$0xff] %v4371_v30  ;;  %v4375_v50 = vpack.c.bf16 %v2049_v0, %v2047_v44  ;;  %v2325_v35 = vpop.f32.mrb[72].mxu0 }
 0x39e   : > { %v2326_v61 = vadd.f32 %v2325_v35, %v5935_v12  ;;  %v2327_v3 = vpop.f32.mrb[73].mxu0 }
 0x39f   : > { %3812 = vst [vmem:[%s5950_s19 + $0xa0] sm:$0xff] %v4375_v50  ;;  %v2328_v48 = vadd.f32 %v2327_v3, %v5939_v22  ;;  %v2052_v2 = vpop.f32.mrb[48].mxu1  ;;  %v2329_v39 = vpop.f32.mrb[74].mxu0 }
 0x3a0   : > { %v2053_v38 = vadd.f32 %v2052_v2, %v6047_v60  ;;  %v2330_v29 = vadd.f32 %v2329_v39, %v5935_v12  ;;  %v2054_v10 = vpop.f32.mrb[49].mxu1  ;;  %v2331_v11 = vpop.f32.mrb[75].mxu0  ;;  %2487 = vmatmul.mubr.bf16.gmra.mrb[120].mxu1 %v5793_v15  ;;  %2710 = vmatmul.mubr.bf16.gmra.mrb[124].mxu0 %v5793_v15 }
 0x3a1   : > { %v4420_v7 = vpack.c.bf16 %v2328_v48, %v2326_v61  ;;  %v2055_v24 = vadd.f32 %v2054_v10, %v6052_v5  ;;  %v2332_v34 = vadd.f32 %v2331_v11, %v5939_v22  ;;  %v2056_v28 = vpop.f32.mrb[50].mxu1  ;;  %2496 = vmatprep.mubr.bf16.mxu1 %v5067_v1  ;;  %2719 = vmatprep.mubr.bf16.mxu0 %v5067_v1 }
 0x3a2   : > { %v2057_v19 = vadd.f32 %v2056_v28, %v6047_v60  ;;  %v2058_v20 = vpop.f32.mrb[51].mxu1 }
 0x3a3   : > { %3857 = vst [vmem:[%s5950_s19 + $0x208] sm:$0xff] %v4420_v7  ;;  %v4379_v31 = vpack.c.bf16 %v2055_v24, %v2053_v38  ;;  %v4424_v58 = vpack.c.bf16 %v2332_v34, %v2330_v29  ;;  %v2059_v49 = vadd.f32 %v2058_v20, %v6052_v5 }
 0x3a5   : > { %3816 = vst [vmem:[%s5950_s19 + $0xc0] sm:$0xff] %v4379_v31  ;;  %3861 = vst [vmem:[%s5950_s19 + $0x228] sm:$0xff] %v4424_v58  ;;  %v4383_v15 = vpack.c.bf16 %v2059_v49, %v2057_v19 }
 0x3a7   : > { %3820 = vst [vmem:[%s5950_s19 + $0xe0] sm:$0xff] %v4383_v15  ;;  %v2062_v27 = vpop.f32.mrb[52].mxu1 }
 0x3a8   : > { %v2063_v18 = vadd.f32 %v2062_v27, %v6047_v60  ;;  %v2064_v21 = vpop.f32.mrb[53].mxu1  ;;  %2497 = vmatmul.mubr.bf16.gmra.mrb[124].mxu1 %v5811_v32  ;;  %2720 = vmatmul.mubr.bf16.gmra.mrb[128].mxu0 %v5811_v32 }
 0x3a9   : > { %v2065_v16 = vadd.f32 %v2064_v21, %v6052_v5  ;;  %v2066_v43 = vpop.f32.mrb[54].mxu1  ;;  %2506 = vmatprep.mubr.bf16.mxu1 %v5067_v1  ;;  %2729 = vmatprep.mubr.bf16.mxu0 %v5067_v1 }
 0x3aa   : > { %v2067_v23 = vadd.f32 %v2066_v43, %v6047_v60  ;;  %v2068_v62 = vpop.f32.mrb[55].mxu1 }
 0x3ab   : > { %v4387_v51 = vpack.c.bf16 %v2065_v16, %v2063_v18  ;;  %v2069_v52 = vadd.f32 %v2068_v62, %v6052_v5 }
 0x3ad   : > { %3824 = vst [vmem:[%s5950_s19 + $0x100] sm:$0xff] %v4387_v51  ;;  %v4391_v13 = vpack.c.bf16 %v2069_v52, %v2067_v23 }
 0x3af   : > { %3828 = vst [vmem:[%s5950_s19 + $0x120] sm:$0xff] %v4391_v13  ;;  %v2072_v25 = vpop.f32.mrb[56].mxu1 }
 0x3b0   : > { %v2073_v33 = vadd.f32 %v2072_v25, %v6047_v60  ;;  %v2074_v32 = vpop.f32.mrb[57].mxu1  ;;  %v2335_v37 = vpop.f32.mrb[76].mxu0  ;;  %2507 = vmatmul.mubr.bf16.gmra.mrb[128].mxu1 %v5835_v40  ;;  %2730 = vmatmul.mubr.bf16.gmra.mrb[132].mxu0 %v5835_v40 }
 0x3b1   : > { %v2075_v57 = vadd.f32 %v2074_v32, %v6052_v5  ;;  %v2336_v56 = vadd.f32 %v2335_v37, %v5935_v12  ;;  %v2076_v45 = vpop.f32.mrb[58].mxu1  ;;  %v2337_v46 = vpop.f32.mrb[77].mxu0  ;;  %2516 = vmatprep.mubr.bf16.mxu1 %v5067_v1  ;;  %2739 = vmatprep.mubr.bf16.mxu0 %v5067_v1 }
 0x3b2   : > { %v2077_v44 = vadd.f32 %v2076_v45, %v6047_v60  ;;  %v2338_v59 = vadd.f32 %v2337_v46, %v5939_v22  ;;  %v2078_v30 = vpop.f32.mrb[59].mxu1  ;;  %v2339_v40 = vpop.f32.mrb[78].mxu0 }
 0x3b3   : > { %v4395_v0 = vpack.c.bf16 %v2075_v57, %v2073_v33  ;;  %v2079_v50 = vadd.f32 %v2078_v30, %v6052_v5  ;;  %v2340_v35 = vadd.f32 %v2339_v40, %v5935_v12  ;;  %v2341_v61 = vpop.f32.mrb[79].mxu0 }
 0x3b4   : > { %v4428_v3 = vpack.c.bf16 %v2338_v59, %v2336_v56  ;;  %v2342_v48 = vadd.f32 %v2341_v61, %v5939_v22 }
 0x3b5   : > { %3832 = vst [vmem:[%s5950_s19 + $0x140] sm:$0xff] %v4395_v0  ;;  %v4399_v2 = vpack.c.bf16 %v2079_v50, %v2077_v44 }
 0x3b6   : > { %3865 = vst [vmem:[%s5950_s19 + $0x248] sm:$0xff] %v4428_v3  ;;  %v4432_v39 = vpack.c.bf16 %v2342_v48, %v2340_v35 }
 0x3b7   : > { %3836 = vst [vmem:[%s5950_s19 + $0x160] sm:$0xff] %v4399_v2  ;;  %v2082_v38 = vpop.f32.mrb[60].mxu1 }
 0x3b8   : > { %3869 = vst [vmem:[%s5950_s19 + $0x268] sm:$0xff] %v4432_v39  ;;  %v2083_v29 = vadd.f32 %v2082_v38, %v6047_v60  ;;  %v2084_v10 = vpop.f32.mrb[61].mxu1  ;;  %2517 = vmatmul.mubr.bf16.gmra.mrb[132].mxu1 %v5852_v6  ;;  %2740 = vmatmul.mubr.bf16.gmra.mrb[136].mxu0 %v5852_v6 }
 0x3b9   : > { %v2085_v11 = vadd.f32 %v2084_v10, %v6052_v5  ;;  %v2086_v7 = vpop.f32.mrb[62].mxu1  ;;  %2526 = vmatprep.mubr.bf16.mxu1 %v5067_v1  ;;  %2749 = vmatprep.mubr.bf16.mxu0 %v5067_v1 }
 0x3ba   : > { %v2087_v24 = vadd.f32 %v2086_v7, %v6047_v60  ;;  %v2088_v34 = vpop.f32.mrb[63].mxu1 }
 0x3bb   : > { %v4403_v28 = vpack.c.bf16 %v2085_v11, %v2083_v29  ;;  %v2089_v19 = vadd.f32 %v2088_v34, %v6052_v5 }
 0x3bd   : > { %3840 = vst [vmem:[%s5950_s19 + $0x180] sm:$0xff] %v4403_v28  ;;  %v4407_v20 = vpack.c.bf16 %v2089_v19, %v2087_v24 }
 0x3bf   : > { %3844 = vst [vmem:[%s5950_s19 + $0x1a0] sm:$0xff] %v4407_v20  ;;  %v2092_v31 = vpop.f32.mrb[64].mxu1 }
 0x3c0   : > { %v2093_v6 = vadd.f32 %v2092_v31, %v6047_v60  ;;  %v2094_v58 = vpop.f32.mrb[65].mxu1  ;;  %2527 = vmatmul.mubr.bf16.gmra.mrb[136].mxu1 %v5869_v54  ;;  %2750 = vmatmul.mubr.bf16.gmra.mrb[140].mxu0 %v5869_v54 }
 0x3c1   : > { %v2095_v49 = vadd.f32 %v2094_v58, %v6052_v5  ;;  %v2096_v15 = vpop.f32.mrb[66].mxu1  ;;  %2536 = vmatprep.mubr.bf16.mxu1 %v5067_v1  ;;  %2759 = vmatprep.mubr.bf16.mxu0 %v5067_v1 }
 0x3c2   : > { %v2097_v27 = vadd.f32 %v2096_v15, %v6047_v60  ;;  %v2098_v18 = vpop.f32.mrb[67].mxu1 }
 0x3c3   : > { %v4411_v21 = vpack.c.bf16 %v2095_v49, %v2093_v6  ;;  %v2099_v16 = vadd.f32 %v2098_v18, %v6052_v5  ;;  %v2345_v43 = vpop.f32.mrb[80].mxu0 }
 0x3c4   : > { %v2346_v23 = vadd.f32 %v2345_v43, %v5935_v12  ;;  %v2347_v62 = vpop.f32.mrb[81].mxu0 }
 0x3c5   : > { %3848 = vst [vmem:[%s5950_s19 + $0x1c0] sm:$0xff] %v4411_v21  ;;  %v4415_v54 = vpack.c.bf16 %v2099_v16, %v2097_v27  ;;  %v2348_v51 = vadd.f32 %v2347_v62, %v5939_v22  ;;  %v2349_v52 = vpop.f32.mrb[82].mxu0 }
 0x3c6   : > { %v2350_v13 = vadd.f32 %v2349_v52, %v5935_v12  ;;  %v2351_v25 = vpop.f32.mrb[83].mxu0 }
 0x3c7   : > { %3852 = vst [vmem:[%s5950_s19 + $0x1e0] sm:$0xff] %v4415_v54  ;;  %v4436_v33 = vpack.c.bf16 %v2348_v51, %v2346_v23  ;;  %v2352_v32 = vadd.f32 %v2351_v25, %v5939_v22  ;;  %v2102_v37 = vpop.f32.mrb[68].mxu1 }
 0x3c8   : > { %v2103_v57 = vadd.f32 %v2102_v37, %v6047_v60  ;;  %v2104_v56 = vpop.f32.mrb[69].mxu1  ;;  %2537 = vmatmul.mubr.bf16.gmra.mrb[140].mxu1 %v5883_v14  ;;  %2760 = vmatmul.mubr.bf16.gmra.mrb[144].mxu0 %v5883_v14 }
 0x3c9   : > { %3873 = vst [vmem:[%s5950_s19 + $0x288] sm:$0xff] %v4436_v33  ;;  %v4440_v45 = vpack.c.bf16 %v2352_v32, %v2350_v13  ;;  %v2105_v46 = vadd.f32 %v2104_v56, %v6052_v5  ;;  %v2106_v44 = vpop.f32.mrb[70].mxu1  ;;  %2546 = vmatprep.mubr.bf16.mxu1 %v5067_v1  ;;  %2769 = vmatprep.mubr.bf16.mxu0 %v5067_v1 }
 0x3ca   : > { %v2107_v59 = vadd.f32 %v2106_v44, %v6047_v60  ;;  %v2108_v30 = vpop.f32.mrb[71].mxu1 }
 0x3cb   : > { %3877 = vst [vmem:[%s5950_s19 + $0x2a8] sm:$0xff] %v4440_v45  ;;  %v4419_v40 = vpack.c.bf16 %v2105_v46, %v2103_v57  ;;  %v2109_v0 = vadd.f32 %v2108_v30, %v6052_v5 }
 0x3cd   : > { %3856 = vst [vmem:[%s5950_s19 + $0x200] sm:$0xff] %v4419_v40  ;;  %v4423_v50 = vpack.c.bf16 %v2109_v0, %v2107_v59 }
 0x3cf   : > { %3860 = vst [vmem:[%s5950_s19 + $0x220] sm:$0xff] %v4423_v50  ;;  %v2112_v14 = vpop.f32.mrb[72].mxu1 }
 0x3d0   : > { %v2113_v35 = vadd.f32 %v2112_v14, %v6047_v60  ;;  %v2114_v61 = vpop.f32.mrb[73].mxu1  ;;  %2547 = vmatmul.mubr.bf16.gmra.mrb[144].mxu1 %v5894_v4  ;;  %2770 = vmatmul.mubr.bf16.gmra.mrb[148].mxu0 %v5894_v4 }
 0x3d1   : > { %v2115_v3 = vadd.f32 %v2114_v61, %v6052_v5  ;;  %v2116_v48 = vpop.f32.mrb[74].mxu1  ;;  %2556 = vmatprep.mubr.bf16.mxu1 %v5067_v1  ;;  %2779 = vmatprep.mubr.bf16.mxu0 %v5067_v1 }
 0x3d2   : > { %v2117_v2 = vadd.f32 %v2116_v48, %v6047_v60  ;;  %v2118_v39 = vpop.f32.mrb[75].mxu1 }
 0x3d3   : > { %v4427_v38 = vpack.c.bf16 %v2115_v3, %v2113_v35  ;;  %v2119_v29 = vadd.f32 %v2118_v39, %v6052_v5 }
 0x3d5   : > { %3864 = vst [vmem:[%s5950_s19 + $0x240] sm:$0xff] %v4427_v38  ;;  %v4431_v10 = vpack.c.bf16 %v2119_v29, %v2117_v2 }
 0x3d6   : > { %v2355_v11 = vpop.f32.mrb[84].mxu0 }
 0x3d7   : > { %3868 = vst [vmem:[%s5950_s19 + $0x260] sm:$0xff] %v4431_v10  ;;  %v2356_v7 = vadd.f32 %v2355_v11, %v5935_v12  ;;  %v2122_v4 = vpop.f32.mrb[76].mxu1  ;;  %v2357_v24 = vpop.f32.mrb[85].mxu0 }
 0x3d8   : > { %v2123_v34 = vadd.f32 %v2122_v4, %v6047_v60  ;;  %v2358_v28 = vadd.f32 %v2357_v24, %v5939_v22  ;;  %v2124_v19 = vpop.f32.mrb[77].mxu1  ;;  %v2359_v20 = vpop.f32.mrb[86].mxu0  ;;  %2557 = vmatmul.mubr.bf16.gmra.mrb[148].mxu1 %v5904_v63  ;;  %2780 = vmatmul.mubr.bf16.gmra.mrb[152].mxu0 %v5904_v63 }
 0x3d9   : > { %v2125_v31 = vadd.f32 %v2124_v19, %v6052_v5  ;;  %v2360_v6 = vadd.f32 %v2359_v20, %v5935_v12  ;;  %v2126_v58 = vpop.f32.mrb[78].mxu1  ;;  %v2361_v49 = vpop.f32.mrb[87].mxu0  ;;  %2566 = vmatprep.mubr.bf16.mxu1 %v5067_v1  ;;  %2789 = vmatprep.mubr.bf16.mxu0 %v5067_v1 }
 0x3da   : > { %v4444_v15 = vpack.c.bf16 %v2358_v28, %v2356_v7  ;;  %v2127_v27 = vadd.f32 %v2126_v58, %v6047_v60  ;;  %v2362_v18 = vadd.f32 %v2361_v49, %v5939_v22  ;;  %v2128_v21 = vpop.f32.mrb[79].mxu1 }
 0x3db   : > { %v4435_v16 = vpack.c.bf16 %v2125_v31, %v2123_v34  ;;  %v2129_v63 = vadd.f32 %v2128_v21, %v6052_v5 }
 0x3dc   : > { %3881 = vst [vmem:[%s5950_s19 + $0x2c8] sm:$0xff] %v4444_v15  ;;  %v4448_v43 = vpack.c.bf16 %v2362_v18, %v2360_v6 }
 0x3dd   : > { %3872 = vst [vmem:[%s5950_s19 + $0x280] sm:$0xff] %v4435_v16  ;;  %v4439_v23 = vpack.c.bf16 %v2129_v63, %v2127_v27 }
 0x3de   : > { %3885 = vst [vmem:[%s5950_s19 + $0x2e8] sm:$0xff] %v4448_v43 }
 0x3df   : > { %3876 = vst [vmem:[%s5950_s19 + $0x2a0] sm:$0xff] %v4439_v23  ;;  %v2132_v62 = vpop.f32.mrb[80].mxu1 }
 0x3e0   : > { %v2133_v54 = vadd.f32 %v2132_v62, %v6047_v60  ;;  %v2134_v51 = vpop.f32.mrb[81].mxu1  ;;  %2567 = vmatmul.mubr.bf16.gmra.mrb[152].mxu1 %v5916_v26  ;;  %2790 = vmatmul.mubr.bf16.gmra.mrb[156].mxu0 %v5916_v26 }
 0x3e1   : > { %v2135_v52 = vadd.f32 %v2134_v51, %v6052_v5  ;;  %v2136_v13 = vpop.f32.mrb[82].mxu1  ;;  %2576 = vmatprep.mubr.bf16.mxu1 %v5067_v1  ;;  %2799 = vmatprep.mubr.bf16.mxu0 %v5067_v1 }
 0x3e2   : > { %v2137_v25 = vadd.f32 %v2136_v13, %v6047_v60  ;;  %v2138_v33 = vpop.f32.mrb[83].mxu1 }
 0x3e3   : > { %v4443_v32 = vpack.c.bf16 %v2135_v52, %v2133_v54  ;;  %v2139_v37 = vadd.f32 %v2138_v33, %v6052_v5 }
 0x3e5   : > { %3880 = vst [vmem:[%s5950_s19 + $0x2c0] sm:$0xff] %v4443_v32  ;;  %v4447_v57 = vpack.c.bf16 %v2139_v37, %v2137_v25 }
 0x3e7   : > { %3884 = vst [vmem:[%s5950_s19 + $0x2e0] sm:$0xff] %v4447_v57 }
 0x3e8   : > { %2577 = vmatmul.mubr.bf16.gmra.mrb[156].mxu1 %v5929_v53  ;;  %2800 = vmatmul.mubr.bf16.gmra.mrb[160].mxu0 %v5929_v53 }
 0x3e9   : > { %v2142_v26 = vpop.f32.mrb[84].mxu1  ;;  %v2365_v56 = vpop.f32.mrb[88].mxu0  ;;  %2586 = vmatprep.mubr.bf16.mxu1 %v5067_v1  ;;  %2809 = vmatprep.mubr.bf16.mxu0 %v5067_v1 }
 0x3ea   : > { %v2143_v45 = vadd.f32 %v2142_v26, %v6047_v60  ;;  %v2366_v46 = vadd.f32 %v2365_v56, %v5935_v12  ;;  %v2144_v44 = vpop.f32.mrb[85].mxu1  ;;  %v2367_v59 = vpop.f32.mrb[89].mxu0 }
 0x3eb   : > { %v2145_v30 = vadd.f32 %v2144_v44, %v6052_v5  ;;  %v2368_v40 = vadd.f32 %v2367_v59, %v5939_v22  ;;  %v2146_v0 = vpop.f32.mrb[86].mxu1  ;;  %v2369_v53 = vpop.f32.mrb[90].mxu0 }
 0x3ec   : > { %v2147_v50 = vadd.f32 %v2146_v0, %v6047_v60  ;;  %v2370_v14 = vadd.f32 %v2369_v53, %v5935_v12  ;;  %v2148_v35 = vpop.f32.mrb[87].mxu1  ;;  %v2371_v61 = vpop.f32.mrb[91].mxu0 }
 0x3ed   : > { %v4451_v3 = vpack.c.bf16 %v2145_v30, %v2143_v45  ;;  %v4452_v48 = vpack.c.bf16 %v2368_v40, %v2366_v46  ;;  %v2149_v2 = vadd.f32 %v2148_v35, %v6052_v5  ;;  %v2372_v39 = vadd.f32 %v2371_v61, %v5939_v22 }
 0x3ef   : > { %3888 = vst [vmem:[%s5950_s19 + $0x300] sm:$0xff] %v4451_v3  ;;  %3889 = vst [vmem:[%s5950_s19 + $0x308] sm:$0xff] %v4452_v48  ;;  %v4455_v38 = vpack.c.bf16 %v2149_v2, %v2147_v50  ;;  %v4456_v29 = vpack.c.bf16 %v2372_v39, %v2370_v14 }
 0x3f0   : > { %2587 = vmatmul.mubr.bf16.gmra.mrb[160].mxu1 %v5958_v41  ;;  %2810 = vmatmul.mubr.bf16.gmra.mrb[164].mxu0 %v5958_v41 }
 0x3f1   : > { %3892 = vst [vmem:[%s5950_s19 + $0x320] sm:$0xff] %v4455_v38  ;;  %3893 = vst [vmem:[%s5950_s19 + $0x328] sm:$0xff] %v4456_v29  ;;  %2596 = vmatprep.mubr.bf16.mxu1 %v5067_v1  ;;  %2819 = vmatprep.mubr.bf16.mxu0 %v5067_v1 }
 0x3f8   : > { %2597 = vmatmul.mubr.bf16.gmra.mrb[164].mxu1 %v5971_v47  ;;  %2820 = vmatmul.mubr.bf16.gmra.mrb[168].mxu0 %v5971_v47 }
 0x3f9   : > { %2606 = vmatprep.mubr.bf16.mxu1 %v5067_v1  ;;  %2829 = vmatprep.mubr.bf16.mxu0 %v5067_v1 }
 0x3fc   : > { %v2152_v10 = vpop.f32.mrb[88].mxu1  ;;  %v2375_v11 = vpop.f32.mrb[92].mxu0 }
 0x3fd   : > { %v2153_v7 = vadd.f32 %v2152_v10, %v6047_v60  ;;  %v2376_v41 = vadd.f32 %v2375_v11, %v5935_v12  ;;  %v2154_v4 = vpop.f32.mrb[89].mxu1  ;;  %v2377_v24 = vpop.f32.mrb[93].mxu0 }
 0x3fe   : > { %v2155_v34 = vadd.f32 %v2154_v4, %v6052_v5  ;;  %v2378_v28 = vadd.f32 %v2377_v24, %v5939_v22  ;;  %v2156_v19 = vpop.f32.mrb[90].mxu1  ;;  %v2379_v47 = vpop.f32.mrb[94].mxu0 }
 0x3ff   : > { %v2157_v20 = vadd.f32 %v2156_v19, %v6047_v60  ;;  %v2380_v31 = vadd.f32 %v2379_v47, %v5935_v12  ;;  %v2158_v6 = vpop.f32.mrb[91].mxu1  ;;  %v2381_v58 = vpop.f32.mrb[95].mxu0 }
 0x400   : > { %v4459_v49 = vpack.c.bf16 %v2155_v34, %v2153_v7  ;;  %v4460_v15 = vpack.c.bf16 %v2378_v28, %v2376_v41  ;;  %v2159_v27 = vadd.f32 %v2158_v6, %v6052_v5  ;;  %v2382_v18 = vadd.f32 %v2381_v58, %v5939_v22  ;;  %2607 = vmatmul.mubr.bf16.gmra.mrb[168].mxu1 %v5986_v55 }
 0x401   : > { %2830 = vmatmul.mubr.bf16.gmra.mrb[172].mxu0 %v5986_v55  ;;  %2616 = vmatprep.mubr.bf16.mxu1 %v5067_v1 }
 0x402   : > { %3896 = vst [vmem:[%s5950_s19 + $0x340] sm:$0xff] %v4459_v49  ;;  %3897 = vst [vmem:[%s5950_s19 + $0x348] sm:$0xff] %v4460_v15  ;;  %v4463_v21 = vpack.c.bf16 %v2159_v27, %v2157_v20  ;;  %v4464_v16 = vpack.c.bf16 %v2382_v18, %v2380_v31  ;;  %2839 = vmatprep.mubr.bf16.mxu0 %v5067_v1 }
 0x404   : > { %3900 = vst [vmem:[%s5950_s19 + $0x360] sm:$0xff] %v4463_v21  ;;  %3901 = vst [vmem:[%s5950_s19 + $0x368] sm:$0xff] %v4464_v16 }
 0x408   : > { %2617 = vmatmul.mubr.bf16.gmra.mrb[172].mxu1 %v6002_v17 }
 0x409   : > { %2840 = vmatmul.mubr.bf16.gmra.mrb[176].mxu0 %v6002_v17  ;;  %2626 = vmatprep.mubr.bf16.mxu1 %v5067_v1 }
 0x40a   : > { %2849 = vmatprep.mubr.bf16.mxu0 %v5067_v1 }
 0x40f   : > { %v2162_v63 = vpop.f32.mrb[92].mxu1  ;;  %v2385_v55 = vpop.f32.mrb[96].mxu0 }
 0x410   : > { %v2163_v43 = vadd.f32 %v2162_v63, %v6047_v60  ;;  %v2386_v23 = vadd.f32 %v2385_v55, %v5935_v12  ;;  %v2164_v62 = vpop.f32.mrb[93].mxu1  ;;  %v2387_v54 = vpop.f32.mrb[97].mxu0  ;;  %2627 = vmatmul.mubr.bf16.gmra.mrb[176].mxu1 %v6016_v8 }
 0x411   : > { %v2165_v51 = vadd.f32 %v2164_v62, %v6052_v5  ;;  %v2388_v17 = vadd.f32 %v2387_v54, %v5939_v22  ;;  %2850 = vmatmul.mubr.bf16.gmra.mrb[180].mxu0 %v6016_v8  ;;  %v2166_v52 = vpop.f32.mrb[94].mxu1  ;;  %v2389_v13 = vpop.f32.mrb[98].mxu0  ;;  %2636 = vmatprep.mubr.bf16.mxu1 %v5067_v1 }
 0x412   : > { %v2167_v25 = vadd.f32 %v2166_v52, %v6047_v60  ;;  %v2390_v33 = vadd.f32 %v2389_v13, %v5935_v12  ;;  %v2168_v32 = vpop.f32.mrb[95].mxu1  ;;  %v2391_v37 = vpop.f32.mrb[99].mxu0  ;;  %2859 = vmatprep.mubr.bf16.mxu0 %v5067_v1 }
 0x413   : > { %v4467_v57 = vpack.c.bf16 %v2165_v51, %v2163_v43  ;;  %v4468_v26 = vpack.c.bf16 %v2388_v17, %v2386_v23  ;;  %v2169_v56 = vadd.f32 %v2168_v32, %v6052_v5  ;;  %v2392_v8 = vadd.f32 %v2391_v37, %v5939_v22 }
 0x415   : > { %3904 = vst [vmem:[%s5950_s19 + $0x380] sm:$0xff] %v4467_v57  ;;  %3905 = vst [vmem:[%s5950_s19 + $0x388] sm:$0xff] %v4468_v26  ;;  %v4471_v45 = vpack.c.bf16 %v2169_v56, %v2167_v25  ;;  %v4472_v46 = vpack.c.bf16 %v2392_v8, %v2390_v33 }
 0x417   : > { %3908 = vst [vmem:[%s5950_s19 + $0x3a0] sm:$0xff] %v4471_v45  ;;  %3909 = vst [vmem:[%s5950_s19 + $0x3a8] sm:$0xff] %v4472_v46 }
 0x418   : > { %2637 = vmatmul.mubr.bf16.gmra.mrb[180].mxu1 %v6030_v42 }
 0x419   : > { %2860 = vmatmul.mubr.bf16.gmra.mrb[184].mxu0 %v6030_v42  ;;  %2646 = vmatprep.mubr.bf16.mxu1 %v5067_v1 }
 0x41a   : > { %2869 = vmatprep.mubr.bf16.mxu0 %v5067_v1 }
 0x420   : > { %2647 = vmatmul.mubr.bf16.gmra.mrb[184].mxu1 %v6054_v9 }
 0x421   : > { %2870 = vmatmul.mubr.bf16.gmra.mrb[188].mxu0 %v6054_v9 }
 0x422   : > { %v2172_v44 = vpop.f32.mrb[96].mxu1  ;;  %v2395_v59 = vpop.f32.mrb[100].mxu0 }
 0x423   : > { %v2173_v30 = vadd.f32 %v2172_v44, %v6047_v60  ;;  %v2396_v40 = vadd.f32 %v2395_v59, %v5935_v12  ;;  %v2174_v0 = vpop.f32.mrb[97].mxu1  ;;  %v2397_v53 = vpop.f32.mrb[101].mxu0 }
 0x424   : > { %v2175_v42 = vadd.f32 %v2174_v0, %v6052_v5  ;;  %v2398_v50 = vadd.f32 %v2397_v53, %v5939_v22  ;;  %v2176_v1 = vpop.f32.mrb[98].mxu1  ;;  %v2399_v14 = vpop.f32.mrb[102].mxu0 }
 0x425   : > { %v2177_v9 = vadd.f32 %v2176_v1, %v6047_v60  ;;  %v2400_v35 = vadd.f32 %v2399_v14, %v5935_v12  ;;  %v2178_v61 = vpop.f32.mrb[99].mxu1  ;;  %v2401_v3 = vpop.f32.mrb[103].mxu0  ;;  %v1654_v1 = vsub.s32 6, %v5431_v36 }
 0x426   : > { %v4475_v48 = vpack.c.bf16 %v2175_v42, %v2173_v30  ;;  %v4476_v2 = vpack.c.bf16 %v2398_v50, %v2396_v40  ;;  %v2179_v39 = vadd.f32 %v2178_v61, %v6052_v5  ;;  %v2402_v38 = vadd.f32 %v2401_v3, %v5939_v22 }
 0x427   : > { %v1646_v50 = vsub.s32 4, %v5431_v36  ;;  %v1650_v3 = vsub.s32 5, %v5431_v36 }
 0x428   : > { %3912 = vst [vmem:[%s5950_s19 + $0x3c0] sm:$0xff] %v4475_v48  ;;  %3913 = vst [vmem:[%s5950_s19 + $0x3c8] sm:$0xff] %v4476_v2  ;;  %v4479_v29 = vpack.c.bf16 %v2179_v39, %v2177_v9  ;;  %v4480_v10 = vpack.c.bf16 %v2402_v38, %v2400_v35  ;;  %v1658_v48 = vsub.s32 7, %v5431_v36 }
 0x42a   : > { %3916 = vst [vmem:[%s5950_s19 + $0x3e0] sm:$0xff] %v4479_v29  ;;  %3917 = vst [vmem:[%s5950_s19 + $0x3e8] sm:$0xff] %v4480_v10 }
 0x435   : > { %v2182_v11 = vpop.f32.mrb[100].mxu1  ;;  %v2405_v7 = vpop.f32.mrb[104].mxu0 }
 0x436   : > { %v2183_v41 = vadd.f32 %v2182_v11, %v6047_v60  ;;  %v2406_v4 = vadd.f32 %v2405_v7, %v5935_v12  ;;  %v2184_v24 = vpop.f32.mrb[101].mxu1  ;;  %v2407_v34 = vpop.f32.mrb[105].mxu0 }
 0x437   : > { %v2185_v28 = vadd.f32 %v2184_v24, %v6052_v5  ;;  %v2408_v19 = vadd.f32 %v2407_v34, %v5939_v22  ;;  %v2186_v47 = vpop.f32.mrb[102].mxu1  ;;  %v2409_v20 = vpop.f32.mrb[106].mxu0 }
 0x438   : > { %v2187_v31 = vadd.f32 %v2186_v47, %v6047_v60  ;;  %v2410_v6 = vadd.f32 %v2409_v20, %v5935_v12  ;;  %v2188_v58 = vpop.f32.mrb[103].mxu1  ;;  %v2411_v49 = vpop.f32.mrb[107].mxu0 }
 0x439   : > { %v4483_v15 = vpack.c.bf16 %v2185_v28, %v2183_v41  ;;  %v4484_v27 = vpack.c.bf16 %v2408_v19, %v2406_v4  ;;  %v2189_v18 = vadd.f32 %v2188_v58, %v6052_v5  ;;  %v2412_v21 = vadd.f32 %v2411_v49, %v5939_v22  ;;  %v4807_v4 = vld [vmem:[#allocation11] sm:$0xff] }
 0x43a   : > { %v6320_v24 = vrot.slane %v4807_v4, %v1646_v50  ;;  %v6322_v34 = vrot.slane %v4807_v4, %v1654_v1  ;;  %v6328_v28 = vrot.slane %v4807_v4, %v1658_v48 }
 0x43b   : > { %3920 = vst [vmem:[%s5950_s19 + $0x400] sm:$0xff] %v4483_v15  ;;  %3921 = vst [vmem:[%s5950_s19 + $0x408] sm:$0xff] %v4484_v27  ;;  %v4487_v16 = vpack.c.bf16 %v2189_v18, %v2187_v31  ;;  %v4488_v63 = vpack.c.bf16 %v2412_v21, %v2410_v6 }
 0x43d   : > { %3924 = vst [vmem:[%s5950_s19 + $0x420] sm:$0xff] %v4487_v16  ;;  %3925 = vst [vmem:[%s5950_s19 + $0x428] sm:$0xff] %v4488_v63 }
 0x448   : > { %v2192_v55 = vpop.f32.mrb[104].mxu1  ;;  %v2415_v43 = vpop.f32.mrb[108].mxu0 }
 0x449   : > { %v2193_v23 = vadd.f32 %v2192_v55, %v6047_v60  ;;  %v2416_v62 = vadd.f32 %v2415_v43, %v5935_v12  ;;  %v2194_v54 = vpop.f32.mrb[105].mxu1  ;;  %v2417_v51 = vpop.f32.mrb[109].mxu0 }
 0x44a   : > { %v2195_v17 = vadd.f32 %v2194_v54, %v6052_v5  ;;  %v2418_v52 = vadd.f32 %v2417_v51, %v5939_v22  ;;  %v2196_v13 = vpop.f32.mrb[106].mxu1  ;;  %v2419_v25 = vpop.f32.mrb[110].mxu0 }
 0x44b   : > { %v2197_v33 = vadd.f32 %v2196_v13, %v6047_v60  ;;  %v2420_v32 = vadd.f32 %v2419_v25, %v5935_v12  ;;  %v2198_v37 = vpop.f32.mrb[107].mxu1  ;;  %v2421_v57 = vpop.f32.mrb[111].mxu0 }
 0x44c   : > { %v4491_v26 = vpack.c.bf16 %v2195_v17, %v2193_v23  ;;  %v4492_v56 = vpack.c.bf16 %v2418_v52, %v2416_v62  ;;  %v2199_v8 = vadd.f32 %v2198_v37, %v6052_v5  ;;  %v2422_v45 = vadd.f32 %v2421_v57, %v5939_v22 }
 0x44e   : > { %3928 = vst [vmem:[%s5950_s19 + $0x440] sm:$0xff] %v4491_v26  ;;  %3929 = vst [vmem:[%s5950_s19 + $0x448] sm:$0xff] %v4492_v56  ;;  %v4495_v46 = vpack.c.bf16 %v2199_v8, %v2197_v33  ;;  %v4496_v44 = vpack.c.bf16 %v2422_v45, %v2420_v32 }
 0x450   : > { %3932 = vst [vmem:[%s5950_s19 + $0x460] sm:$0xff] %v4495_v46  ;;  %3933 = vst [vmem:[%s5950_s19 + $0x468] sm:$0xff] %v4496_v44 }
 0x45b   : > { %v2202_v59 = vpop.f32.mrb[108].mxu1  ;;  %v2425_v30 = vpop.f32.mrb[112].mxu0 }
 0x45c   : > { %v2203_v40 = vadd.f32 %v2202_v59, %v6047_v60  ;;  %v2426_v0 = vadd.f32 %v2425_v30, %v5935_v12  ;;  %v2204_v53 = vpop.f32.mrb[109].mxu1  ;;  %v2427_v42 = vpop.f32.mrb[113].mxu0 }
 0x45d   : > { %v2205_v14 = vadd.f32 %v2204_v53, %v6052_v5  ;;  %v2428_v9 = vadd.f32 %v2427_v42, %v5939_v22  ;;  %v2206_v35 = vpop.f32.mrb[110].mxu1  ;;  %v2429_v61 = vpop.f32.mrb[114].mxu0 }
 0x45e   : > { %v2207_v2 = vadd.f32 %v2206_v35, %v6047_v60  ;;  %v2430_v39 = vadd.f32 %v2429_v61, %v5935_v12  ;;  %v2208_v38 = vpop.f32.mrb[111].mxu1  ;;  %v2431_v29 = vpop.f32.mrb[115].mxu0  ;;  %v6326_v12 = vrot.slane %v4807_v4, %v1650_v3 }
 0x45f   : > { %v4499_v10 = vpack.c.bf16 %v2205_v14, %v2203_v40  ;;  %v4500_v11 = vpack.c.bf16 %v2428_v9, %v2426_v0  ;;  %v2209_v7 = vadd.f32 %v2208_v38, %v6052_v5  ;;  %v2432_v41 = vadd.f32 %v2431_v29, %v5939_v22 }
 0x461   : > { %3936 = vst [vmem:[%s5950_s19 + $0x480] sm:$0xff] %v4499_v10  ;;  %3937 = vst [vmem:[%s5950_s19 + $0x488] sm:$0xff] %v4500_v11  ;;  %v4503_v36 = vpack.c.bf16 %v2209_v7, %v2207_v2  ;;  %v4504_v60 = vpack.c.bf16 %v2432_v41, %v2430_v39 }
 0x463   : > { %3940 = vst [vmem:[%s5950_s19 + $0x4a0] sm:$0xff] %v4503_v36  ;;  %3941 = vst [vmem:[%s5950_s19 + $0x4a8] sm:$0xff] %v4504_v60  ;;  %v2468_v19 = vpop.f32.mrb[112].mxu1  ;;  %v2691_v47 = vpop.f32.mrb[116].mxu0 }
 0x464   : > { %v2469_v5 = vadd.f32 %v2468_v19, %v6320_v24  ;;  %v2692_v22 = vadd.f32 %v2691_v47, %v6322_v34  ;;  %v2470_v20 = vpop.f32.mrb[113].mxu1  ;;  %v2693_v31 = vpop.f32.mrb[117].mxu0 }
 0x465   : > { %v2471_v6 = vadd.f32 %v2470_v20, %v6326_v12  ;;  %v2694_v58 = vadd.f32 %v2693_v31, %v6328_v28  ;;  %v2472_v49 = vpop.f32.mrb[114].mxu1  ;;  %v2695_v15 = vpop.f32.mrb[118].mxu0 }
 0x466   : > { %v2473_v27 = vadd.f32 %v2472_v49, %v6320_v24  ;;  %v2696_v18 = vadd.f32 %v2695_v15, %v6322_v34  ;;  %v2474_v21 = vpop.f32.mrb[115].mxu1  ;;  %v2697_v16 = vpop.f32.mrb[119].mxu0 }
 0x467   : > { %v4357_v63 = vpack.c.bf16 %v2471_v6, %v2469_v5  ;;  %v4358_v55 = vpack.c.bf16 %v2694_v58, %v2692_v22  ;;  %v2475_v43 = vadd.f32 %v2474_v21, %v6326_v12  ;;  %v2698_v23 = vadd.f32 %v2697_v16, %v6328_v28 }
 0x469   : > { %3794 = vst [vmem:[%s5950_s19 + $0x10] sm:$0xff] %v4357_v63  ;;  %3795 = vst [vmem:[%s5950_s19 + $0x18] sm:$0xff] %v4358_v55  ;;  %v4361_v62 = vpack.c.bf16 %v2475_v43, %v2473_v27  ;;  %v4362_v54 = vpack.c.bf16 %v2698_v23, %v2696_v18 }
 0x46b   : > { %3798 = vst [vmem:[%s5950_s19 + $0x30] sm:$0xff] %v4361_v62  ;;  %3799 = vst [vmem:[%s5950_s19 + $0x38] sm:$0xff] %v4362_v54  ;;  %v2478_v51 = vpop.f32.mrb[116].mxu1  ;;  %v2701_v17 = vpop.f32.mrb[120].mxu0 }
 0x46c   : > { %v2479_v52 = vadd.f32 %v2478_v51, %v6320_v24  ;;  %v2702_v13 = vadd.f32 %v2701_v17, %v6322_v34  ;;  %v2480_v25 = vpop.f32.mrb[117].mxu1  ;;  %v2703_v33 = vpop.f32.mrb[121].mxu0 }
 0x46d   : > { %v2481_v32 = vadd.f32 %v2480_v25, %v6326_v12  ;;  %v2704_v37 = vadd.f32 %v2703_v33, %v6328_v28  ;;  %v2482_v57 = vpop.f32.mrb[118].mxu1  ;;  %v2705_v26 = vpop.f32.mrb[122].mxu0 }
 0x46e   : > { %v2483_v56 = vadd.f32 %v2482_v57, %v6320_v24  ;;  %v2706_v8 = vadd.f32 %v2705_v26, %v6322_v34  ;;  %v2484_v45 = vpop.f32.mrb[119].mxu1  ;;  %v2707_v46 = vpop.f32.mrb[123].mxu0 }
 0x46f   : > { %v4365_v44 = vpack.c.bf16 %v2481_v32, %v2479_v52  ;;  %v4366_v59 = vpack.c.bf16 %v2704_v37, %v2702_v13  ;;  %v2485_v30 = vadd.f32 %v2484_v45, %v6326_v12  ;;  %v2708_v40 = vadd.f32 %v2707_v46, %v6328_v28 }
 0x471   : > { %3802 = vst [vmem:[%s5950_s19 + $0x50] sm:$0xff] %v4365_v44  ;;  %3803 = vst [vmem:[%s5950_s19 + $0x58] sm:$0xff] %v4366_v59  ;;  %v4369_v0 = vpack.c.bf16 %v2485_v30, %v2483_v56  ;;  %v4370_v53 = vpack.c.bf16 %v2708_v40, %v2706_v8 }
 0x473   : > { %3806 = vst [vmem:[%s5950_s19 + $0x70] sm:$0xff] %v4369_v0  ;;  %3807 = vst [vmem:[%s5950_s19 + $0x78] sm:$0xff] %v4370_v53  ;;  %v2488_v42 = vpop.f32.mrb[120].mxu1  ;;  %v2711_v50 = vpop.f32.mrb[124].mxu0 }
 0x474   : > { %v2489_v1 = vadd.f32 %v2488_v42, %v6320_v24  ;;  %v2712_v14 = vadd.f32 %v2711_v50, %v6322_v34  ;;  %v2490_v9 = vpop.f32.mrb[121].mxu1  ;;  %v2713_v35 = vpop.f32.mrb[125].mxu0 }
 0x475   : > { %v2491_v61 = vadd.f32 %v2490_v9, %v6326_v12  ;;  %v2714_v3 = vadd.f32 %v2713_v35, %v6328_v28  ;;  %v2492_v48 = vpop.f32.mrb[122].mxu1  ;;  %v2715_v2 = vpop.f32.mrb[126].mxu0 }
 0x476   : > { %v2493_v39 = vadd.f32 %v2492_v48, %v6320_v24  ;;  %v2716_v38 = vadd.f32 %v2715_v2, %v6322_v34  ;;  %v2494_v29 = vpop.f32.mrb[123].mxu1  ;;  %v2717_v10 = vpop.f32.mrb[127].mxu0 }
 0x477   : > { %v4373_v11 = vpack.c.bf16 %v2491_v61, %v2489_v1  ;;  %v4374_v7 = vpack.c.bf16 %v2714_v3, %v2712_v14  ;;  %v2495_v41 = vadd.f32 %v2494_v29, %v6326_v12  ;;  %v2718_v4 = vadd.f32 %v2717_v10, %v6328_v28 }
 0x479   : > { %3810 = vst [vmem:[%s5950_s19 + $0x90] sm:$0xff] %v4373_v11  ;;  %3811 = vst [vmem:[%s5950_s19 + $0x98] sm:$0xff] %v4374_v7  ;;  %v4377_v36 = vpack.c.bf16 %v2495_v41, %v2493_v39  ;;  %v4378_v60 = vpack.c.bf16 %v2718_v4, %v2716_v38 }
 0x47b   : > { %3814 = vst [vmem:[%s5950_s19 + $0xb0] sm:$0xff] %v4377_v36  ;;  %3815 = vst [vmem:[%s5950_s19 + $0xb8] sm:$0xff] %v4378_v60  ;;  %v2498_v19 = vpop.f32.mrb[124].mxu1  ;;  %v2721_v47 = vpop.f32.mrb[128].mxu0 }
 0x47c   : > { %v2499_v5 = vadd.f32 %v2498_v19, %v6320_v24  ;;  %v2722_v22 = vadd.f32 %v2721_v47, %v6322_v34  ;;  %v2500_v20 = vpop.f32.mrb[125].mxu1  ;;  %v2723_v31 = vpop.f32.mrb[129].mxu0 }
 0x47d   : > { %v2501_v6 = vadd.f32 %v2500_v20, %v6326_v12  ;;  %v2724_v58 = vadd.f32 %v2723_v31, %v6328_v28  ;;  %v2502_v49 = vpop.f32.mrb[126].mxu1  ;;  %v2725_v15 = vpop.f32.mrb[130].mxu0 }
 0x47e   : > { %v2503_v27 = vadd.f32 %v2502_v49, %v6320_v24  ;;  %v2726_v18 = vadd.f32 %v2725_v15, %v6322_v34  ;;  %v2504_v21 = vpop.f32.mrb[127].mxu1  ;;  %v2727_v16 = vpop.f32.mrb[131].mxu0 }
 0x47f   : > { %v4381_v63 = vpack.c.bf16 %v2501_v6, %v2499_v5  ;;  %v4382_v55 = vpack.c.bf16 %v2724_v58, %v2722_v22  ;;  %v2505_v43 = vadd.f32 %v2504_v21, %v6326_v12  ;;  %v2728_v23 = vadd.f32 %v2727_v16, %v6328_v28 }
 0x481   : > { %3818 = vst [vmem:[%s5950_s19 + $0xd0] sm:$0xff] %v4381_v63  ;;  %3819 = vst [vmem:[%s5950_s19 + $0xd8] sm:$0xff] %v4382_v55  ;;  %v4385_v62 = vpack.c.bf16 %v2505_v43, %v2503_v27  ;;  %v4386_v54 = vpack.c.bf16 %v2728_v23, %v2726_v18 }
 0x483   : > { %3822 = vst [vmem:[%s5950_s19 + $0xf0] sm:$0xff] %v4385_v62  ;;  %3823 = vst [vmem:[%s5950_s19 + $0xf8] sm:$0xff] %v4386_v54  ;;  %v2508_v51 = vpop.f32.mrb[128].mxu1  ;;  %v2731_v17 = vpop.f32.mrb[132].mxu0 }
 0x484   : > { %v2509_v52 = vadd.f32 %v2508_v51, %v6320_v24  ;;  %v2732_v13 = vadd.f32 %v2731_v17, %v6322_v34  ;;  %v2510_v25 = vpop.f32.mrb[129].mxu1  ;;  %v2733_v33 = vpop.f32.mrb[133].mxu0 }
 0x485   : > { %v2511_v32 = vadd.f32 %v2510_v25, %v6326_v12  ;;  %v2734_v37 = vadd.f32 %v2733_v33, %v6328_v28  ;;  %v2512_v57 = vpop.f32.mrb[130].mxu1  ;;  %v2735_v26 = vpop.f32.mrb[134].mxu0 }
 0x486   : > { %v2513_v56 = vadd.f32 %v2512_v57, %v6320_v24  ;;  %v2736_v8 = vadd.f32 %v2735_v26, %v6322_v34  ;;  %v2514_v45 = vpop.f32.mrb[131].mxu1  ;;  %v2737_v46 = vpop.f32.mrb[135].mxu0 }
 0x487   : > { %v4389_v44 = vpack.c.bf16 %v2511_v32, %v2509_v52  ;;  %v4390_v59 = vpack.c.bf16 %v2734_v37, %v2732_v13  ;;  %v2515_v30 = vadd.f32 %v2514_v45, %v6326_v12  ;;  %v2738_v40 = vadd.f32 %v2737_v46, %v6328_v28 }
 0x489   : > { %3826 = vst [vmem:[%s5950_s19 + $0x110] sm:$0xff] %v4389_v44  ;;  %3827 = vst [vmem:[%s5950_s19 + $0x118] sm:$0xff] %v4390_v59  ;;  %v4393_v0 = vpack.c.bf16 %v2515_v30, %v2513_v56  ;;  %v4394_v53 = vpack.c.bf16 %v2738_v40, %v2736_v8 }
 0x48b   : > { %3830 = vst [vmem:[%s5950_s19 + $0x130] sm:$0xff] %v4393_v0  ;;  %3831 = vst [vmem:[%s5950_s19 + $0x138] sm:$0xff] %v4394_v53  ;;  %v2518_v42 = vpop.f32.mrb[132].mxu1  ;;  %v2741_v50 = vpop.f32.mrb[136].mxu0 }
 0x48c   : > { %v2519_v1 = vadd.f32 %v2518_v42, %v6320_v24  ;;  %v2742_v14 = vadd.f32 %v2741_v50, %v6322_v34  ;;  %v2520_v9 = vpop.f32.mrb[133].mxu1  ;;  %v2743_v35 = vpop.f32.mrb[137].mxu0 }
 0x48d   : > { %v2521_v61 = vadd.f32 %v2520_v9, %v6326_v12  ;;  %v2744_v3 = vadd.f32 %v2743_v35, %v6328_v28  ;;  %v2522_v48 = vpop.f32.mrb[134].mxu1  ;;  %v2745_v2 = vpop.f32.mrb[138].mxu0 }
 0x48e   : > { %v2523_v39 = vadd.f32 %v2522_v48, %v6320_v24  ;;  %v2746_v38 = vadd.f32 %v2745_v2, %v6322_v34  ;;  %v2524_v29 = vpop.f32.mrb[135].mxu1  ;;  %v2747_v10 = vpop.f32.mrb[139].mxu0 }
 0x48f   : > { %v4397_v11 = vpack.c.bf16 %v2521_v61, %v2519_v1  ;;  %v4398_v7 = vpack.c.bf16 %v2744_v3, %v2742_v14  ;;  %v2525_v41 = vadd.f32 %v2524_v29, %v6326_v12  ;;  %v2748_v4 = vadd.f32 %v2747_v10, %v6328_v28 }
 0x491   : > { %3834 = vst [vmem:[%s5950_s19 + $0x150] sm:$0xff] %v4397_v11  ;;  %3835 = vst [vmem:[%s5950_s19 + $0x158] sm:$0xff] %v4398_v7  ;;  %v4401_v36 = vpack.c.bf16 %v2525_v41, %v2523_v39  ;;  %v4402_v60 = vpack.c.bf16 %v2748_v4, %v2746_v38 }
 0x493   : > { %3838 = vst [vmem:[%s5950_s19 + $0x170] sm:$0xff] %v4401_v36  ;;  %3839 = vst [vmem:[%s5950_s19 + $0x178] sm:$0xff] %v4402_v60  ;;  %v2528_v19 = vpop.f32.mrb[136].mxu1  ;;  %v2751_v47 = vpop.f32.mrb[140].mxu0 }
 0x494   : > { %v2529_v5 = vadd.f32 %v2528_v19, %v6320_v24  ;;  %v2752_v22 = vadd.f32 %v2751_v47, %v6322_v34  ;;  %v2530_v20 = vpop.f32.mrb[137].mxu1  ;;  %v2753_v31 = vpop.f32.mrb[141].mxu0 }
 0x495   : > { %v2531_v6 = vadd.f32 %v2530_v20, %v6326_v12  ;;  %v2754_v58 = vadd.f32 %v2753_v31, %v6328_v28  ;;  %v2532_v49 = vpop.f32.mrb[138].mxu1  ;;  %v2755_v15 = vpop.f32.mrb[142].mxu0 }
 0x496   : > { %v2533_v27 = vadd.f32 %v2532_v49, %v6320_v24  ;;  %v2756_v18 = vadd.f32 %v2755_v15, %v6322_v34  ;;  %v2534_v21 = vpop.f32.mrb[139].mxu1  ;;  %v2757_v16 = vpop.f32.mrb[143].mxu0 }
 0x497   : > { %v4405_v63 = vpack.c.bf16 %v2531_v6, %v2529_v5  ;;  %v4406_v55 = vpack.c.bf16 %v2754_v58, %v2752_v22  ;;  %v2535_v43 = vadd.f32 %v2534_v21, %v6326_v12  ;;  %v2758_v23 = vadd.f32 %v2757_v16, %v6328_v28 }
 0x499   : > { %3842 = vst [vmem:[%s5950_s19 + $0x190] sm:$0xff] %v4405_v63  ;;  %3843 = vst [vmem:[%s5950_s19 + $0x198] sm:$0xff] %v4406_v55  ;;  %v4409_v62 = vpack.c.bf16 %v2535_v43, %v2533_v27  ;;  %v4410_v54 = vpack.c.bf16 %v2758_v23, %v2756_v18 }
 0x49b   : > { %3846 = vst [vmem:[%s5950_s19 + $0x1b0] sm:$0xff] %v4409_v62  ;;  %3847 = vst [vmem:[%s5950_s19 + $0x1b8] sm:$0xff] %v4410_v54  ;;  %v2538_v51 = vpop.f32.mrb[140].mxu1  ;;  %v2761_v17 = vpop.f32.mrb[144].mxu0 }
 0x49c   : > { %v2539_v52 = vadd.f32 %v2538_v51, %v6320_v24  ;;  %v2762_v13 = vadd.f32 %v2761_v17, %v6322_v34  ;;  %v2540_v25 = vpop.f32.mrb[141].mxu1  ;;  %v2763_v33 = vpop.f32.mrb[145].mxu0 }
 0x49d   : > { %v2541_v32 = vadd.f32 %v2540_v25, %v6326_v12  ;;  %v2764_v37 = vadd.f32 %v2763_v33, %v6328_v28  ;;  %v2542_v57 = vpop.f32.mrb[142].mxu1  ;;  %v2765_v26 = vpop.f32.mrb[146].mxu0 }
 0x49e   : > { %v2543_v56 = vadd.f32 %v2542_v57, %v6320_v24  ;;  %v2766_v8 = vadd.f32 %v2765_v26, %v6322_v34  ;;  %v2544_v45 = vpop.f32.mrb[143].mxu1  ;;  %v2767_v46 = vpop.f32.mrb[147].mxu0 }
 0x49f   : > { %v4413_v44 = vpack.c.bf16 %v2541_v32, %v2539_v52  ;;  %v4414_v59 = vpack.c.bf16 %v2764_v37, %v2762_v13  ;;  %v2545_v30 = vadd.f32 %v2544_v45, %v6326_v12  ;;  %v2768_v40 = vadd.f32 %v2767_v46, %v6328_v28 }
 0x4a1   : > { %3850 = vst [vmem:[%s5950_s19 + $0x1d0] sm:$0xff] %v4413_v44  ;;  %3851 = vst [vmem:[%s5950_s19 + $0x1d8] sm:$0xff] %v4414_v59  ;;  %v4417_v0 = vpack.c.bf16 %v2545_v30, %v2543_v56  ;;  %v4418_v53 = vpack.c.bf16 %v2768_v40, %v2766_v8 }
 0x4a3   : > { %3854 = vst [vmem:[%s5950_s19 + $0x1f0] sm:$0xff] %v4417_v0  ;;  %3855 = vst [vmem:[%s5950_s19 + $0x1f8] sm:$0xff] %v4418_v53  ;;  %v2548_v42 = vpop.f32.mrb[144].mxu1  ;;  %v2771_v50 = vpop.f32.mrb[148].mxu0 }
 0x4a4   : > { %v2549_v1 = vadd.f32 %v2548_v42, %v6320_v24  ;;  %v2772_v14 = vadd.f32 %v2771_v50, %v6322_v34  ;;  %v2550_v9 = vpop.f32.mrb[145].mxu1  ;;  %v2773_v35 = vpop.f32.mrb[149].mxu0 }
 0x4a5   : > { %v2551_v61 = vadd.f32 %v2550_v9, %v6326_v12  ;;  %v2774_v3 = vadd.f32 %v2773_v35, %v6328_v28  ;;  %v2552_v48 = vpop.f32.mrb[146].mxu1  ;;  %v2775_v2 = vpop.f32.mrb[150].mxu0 }
 0x4a6   : > { %v2553_v39 = vadd.f32 %v2552_v48, %v6320_v24  ;;  %v2776_v38 = vadd.f32 %v2775_v2, %v6322_v34  ;;  %v2554_v29 = vpop.f32.mrb[147].mxu1  ;;  %v2777_v10 = vpop.f32.mrb[151].mxu0 }
 0x4a7   : > { %v4421_v11 = vpack.c.bf16 %v2551_v61, %v2549_v1  ;;  %v4422_v7 = vpack.c.bf16 %v2774_v3, %v2772_v14  ;;  %v2555_v41 = vadd.f32 %v2554_v29, %v6326_v12  ;;  %v2778_v4 = vadd.f32 %v2777_v10, %v6328_v28 }
 0x4a9   : > { %3858 = vst [vmem:[%s5950_s19 + $0x210] sm:$0xff] %v4421_v11  ;;  %3859 = vst [vmem:[%s5950_s19 + $0x218] sm:$0xff] %v4422_v7  ;;  %v4425_v36 = vpack.c.bf16 %v2555_v41, %v2553_v39  ;;  %v4426_v60 = vpack.c.bf16 %v2778_v4, %v2776_v38 }
 0x4ab   : > { %3862 = vst [vmem:[%s5950_s19 + $0x230] sm:$0xff] %v4425_v36  ;;  %3863 = vst [vmem:[%s5950_s19 + $0x238] sm:$0xff] %v4426_v60  ;;  %v2558_v19 = vpop.f32.mrb[148].mxu1  ;;  %v2781_v47 = vpop.f32.mrb[152].mxu0 }
 0x4ac   : > { %v2559_v5 = vadd.f32 %v2558_v19, %v6320_v24  ;;  %v2782_v22 = vadd.f32 %v2781_v47, %v6322_v34  ;;  %v2560_v20 = vpop.f32.mrb[149].mxu1  ;;  %v2783_v31 = vpop.f32.mrb[153].mxu0 }
 0x4ad   : > { %v2561_v6 = vadd.f32 %v2560_v20, %v6326_v12  ;;  %v2784_v58 = vadd.f32 %v2783_v31, %v6328_v28  ;;  %v2562_v49 = vpop.f32.mrb[150].mxu1  ;;  %v2785_v15 = vpop.f32.mrb[154].mxu0 }
 0x4ae   : > { %v2563_v27 = vadd.f32 %v2562_v49, %v6320_v24  ;;  %v2786_v18 = vadd.f32 %v2785_v15, %v6322_v34  ;;  %v2564_v21 = vpop.f32.mrb[151].mxu1  ;;  %v2787_v16 = vpop.f32.mrb[155].mxu0 }
 0x4af   : > { %v4429_v63 = vpack.c.bf16 %v2561_v6, %v2559_v5  ;;  %v4430_v55 = vpack.c.bf16 %v2784_v58, %v2782_v22  ;;  %v2565_v43 = vadd.f32 %v2564_v21, %v6326_v12  ;;  %v2788_v23 = vadd.f32 %v2787_v16, %v6328_v28 }
 0x4b1   : > { %3866 = vst [vmem:[%s5950_s19 + $0x250] sm:$0xff] %v4429_v63  ;;  %3867 = vst [vmem:[%s5950_s19 + $0x258] sm:$0xff] %v4430_v55  ;;  %v4433_v62 = vpack.c.bf16 %v2565_v43, %v2563_v27  ;;  %v4434_v54 = vpack.c.bf16 %v2788_v23, %v2786_v18 }
 0x4b3   : > { %3870 = vst [vmem:[%s5950_s19 + $0x270] sm:$0xff] %v4433_v62  ;;  %3871 = vst [vmem:[%s5950_s19 + $0x278] sm:$0xff] %v4434_v54  ;;  %v2568_v51 = vpop.f32.mrb[152].mxu1  ;;  %v2791_v17 = vpop.f32.mrb[156].mxu0 }
 0x4b4   : > { %v2569_v52 = vadd.f32 %v2568_v51, %v6320_v24  ;;  %v2792_v13 = vadd.f32 %v2791_v17, %v6322_v34  ;;  %v2570_v25 = vpop.f32.mrb[153].mxu1  ;;  %v2793_v33 = vpop.f32.mrb[157].mxu0 }
 0x4b5   : > { %v2571_v32 = vadd.f32 %v2570_v25, %v6326_v12  ;;  %v2794_v37 = vadd.f32 %v2793_v33, %v6328_v28  ;;  %v2572_v57 = vpop.f32.mrb[154].mxu1  ;;  %v2795_v26 = vpop.f32.mrb[158].mxu0 }
 0x4b6   : > { %v2573_v56 = vadd.f32 %v2572_v57, %v6320_v24  ;;  %v2796_v8 = vadd.f32 %v2795_v26, %v6322_v34  ;;  %v2574_v45 = vpop.f32.mrb[155].mxu1  ;;  %v2797_v46 = vpop.f32.mrb[159].mxu0 }
 0x4b7   : > { %v4437_v44 = vpack.c.bf16 %v2571_v32, %v2569_v52  ;;  %v4438_v59 = vpack.c.bf16 %v2794_v37, %v2792_v13  ;;  %v2575_v30 = vadd.f32 %v2574_v45, %v6326_v12  ;;  %v2798_v40 = vadd.f32 %v2797_v46, %v6328_v28 }
 0x4b9   : > { %3874 = vst [vmem:[%s5950_s19 + $0x290] sm:$0xff] %v4437_v44  ;;  %3875 = vst [vmem:[%s5950_s19 + $0x298] sm:$0xff] %v4438_v59  ;;  %v4441_v0 = vpack.c.bf16 %v2575_v30, %v2573_v56  ;;  %v4442_v53 = vpack.c.bf16 %v2798_v40, %v2796_v8 }
 0x4bb   : > { %3878 = vst [vmem:[%s5950_s19 + $0x2b0] sm:$0xff] %v4441_v0  ;;  %3879 = vst [vmem:[%s5950_s19 + $0x2b8] sm:$0xff] %v4442_v53  ;;  %v2578_v42 = vpop.f32.mrb[156].mxu1  ;;  %v2801_v50 = vpop.f32.mrb[160].mxu0 }
 0x4bc   : > { %v2579_v1 = vadd.f32 %v2578_v42, %v6320_v24  ;;  %v2802_v14 = vadd.f32 %v2801_v50, %v6322_v34  ;;  %v2580_v9 = vpop.f32.mrb[157].mxu1  ;;  %v2803_v35 = vpop.f32.mrb[161].mxu0 }
 0x4bd   : > { %v2581_v61 = vadd.f32 %v2580_v9, %v6326_v12  ;;  %v2804_v3 = vadd.f32 %v2803_v35, %v6328_v28  ;;  %v2582_v48 = vpop.f32.mrb[158].mxu1  ;;  %v2805_v2 = vpop.f32.mrb[162].mxu0 }
 0x4be   : > { %v2583_v39 = vadd.f32 %v2582_v48, %v6320_v24  ;;  %v2806_v38 = vadd.f32 %v2805_v2, %v6322_v34  ;;  %v2584_v29 = vpop.f32.mrb[159].mxu1  ;;  %v2807_v10 = vpop.f32.mrb[163].mxu0 }
 0x4bf   : > { %v4445_v11 = vpack.c.bf16 %v2581_v61, %v2579_v1  ;;  %v4446_v7 = vpack.c.bf16 %v2804_v3, %v2802_v14  ;;  %v2585_v41 = vadd.f32 %v2584_v29, %v6326_v12  ;;  %v2808_v4 = vadd.f32 %v2807_v10, %v6328_v28 }
 0x4c1   : > { %3882 = vst [vmem:[%s5950_s19 + $0x2d0] sm:$0xff] %v4445_v11  ;;  %3883 = vst [vmem:[%s5950_s19 + $0x2d8] sm:$0xff] %v4446_v7  ;;  %v4449_v36 = vpack.c.bf16 %v2585_v41, %v2583_v39  ;;  %v4450_v60 = vpack.c.bf16 %v2808_v4, %v2806_v38 }
 0x4c3   : > { %3886 = vst [vmem:[%s5950_s19 + $0x2f0] sm:$0xff] %v4449_v36  ;;  %3887 = vst [vmem:[%s5950_s19 + $0x2f8] sm:$0xff] %v4450_v60  ;;  %v2588_v19 = vpop.f32.mrb[160].mxu1  ;;  %v2811_v47 = vpop.f32.mrb[164].mxu0 }
 0x4c4   : > { %v2589_v5 = vadd.f32 %v2588_v19, %v6320_v24  ;;  %v2812_v22 = vadd.f32 %v2811_v47, %v6322_v34  ;;  %v2590_v20 = vpop.f32.mrb[161].mxu1  ;;  %v2813_v31 = vpop.f32.mrb[165].mxu0 }
 0x4c5   : > { %v2591_v6 = vadd.f32 %v2590_v20, %v6326_v12  ;;  %v2814_v58 = vadd.f32 %v2813_v31, %v6328_v28  ;;  %v2592_v49 = vpop.f32.mrb[162].mxu1  ;;  %v2815_v15 = vpop.f32.mrb[166].mxu0 }
 0x4c6   : > { %v2593_v27 = vadd.f32 %v2592_v49, %v6320_v24  ;;  %v2816_v18 = vadd.f32 %v2815_v15, %v6322_v34  ;;  %v2594_v21 = vpop.f32.mrb[163].mxu1  ;;  %v2817_v16 = vpop.f32.mrb[167].mxu0 }
 0x4c7   : > { %v4453_v63 = vpack.c.bf16 %v2591_v6, %v2589_v5  ;;  %v4454_v55 = vpack.c.bf16 %v2814_v58, %v2812_v22  ;;  %v2595_v43 = vadd.f32 %v2594_v21, %v6326_v12  ;;  %v2818_v23 = vadd.f32 %v2817_v16, %v6328_v28 }
 0x4c9   : > { %3890 = vst [vmem:[%s5950_s19 + $0x310] sm:$0xff] %v4453_v63  ;;  %3891 = vst [vmem:[%s5950_s19 + $0x318] sm:$0xff] %v4454_v55  ;;  %v4457_v62 = vpack.c.bf16 %v2595_v43, %v2593_v27  ;;  %v4458_v54 = vpack.c.bf16 %v2818_v23, %v2816_v18 }
 0x4cb   : > { %3894 = vst [vmem:[%s5950_s19 + $0x330] sm:$0xff] %v4457_v62  ;;  %3895 = vst [vmem:[%s5950_s19 + $0x338] sm:$0xff] %v4458_v54  ;;  %v2598_v51 = vpop.f32.mrb[164].mxu1  ;;  %v2821_v17 = vpop.f32.mrb[168].mxu0 }
 0x4cc   : > { %v2599_v52 = vadd.f32 %v2598_v51, %v6320_v24  ;;  %v2822_v13 = vadd.f32 %v2821_v17, %v6322_v34  ;;  %v2600_v25 = vpop.f32.mrb[165].mxu1  ;;  %v2823_v33 = vpop.f32.mrb[169].mxu0 }
 0x4cd   : > { %v2601_v32 = vadd.f32 %v2600_v25, %v6326_v12  ;;  %v2824_v37 = vadd.f32 %v2823_v33, %v6328_v28  ;;  %v2602_v57 = vpop.f32.mrb[166].mxu1  ;;  %v2825_v26 = vpop.f32.mrb[170].mxu0 }
 0x4ce   : > { %v2603_v56 = vadd.f32 %v2602_v57, %v6320_v24  ;;  %v2826_v8 = vadd.f32 %v2825_v26, %v6322_v34  ;;  %v2604_v45 = vpop.f32.mrb[167].mxu1  ;;  %v2827_v46 = vpop.f32.mrb[171].mxu0 }
 0x4cf   : > { %v4461_v44 = vpack.c.bf16 %v2601_v32, %v2599_v52  ;;  %v4462_v59 = vpack.c.bf16 %v2824_v37, %v2822_v13  ;;  %v2605_v30 = vadd.f32 %v2604_v45, %v6326_v12  ;;  %v2828_v40 = vadd.f32 %v2827_v46, %v6328_v28 }
 0x4d1   : > { %3898 = vst [vmem:[%s5950_s19 + $0x350] sm:$0xff] %v4461_v44  ;;  %3899 = vst [vmem:[%s5950_s19 + $0x358] sm:$0xff] %v4462_v59  ;;  %v4465_v0 = vpack.c.bf16 %v2605_v30, %v2603_v56  ;;  %v4466_v53 = vpack.c.bf16 %v2828_v40, %v2826_v8 }
 0x4d3   : > { %3902 = vst [vmem:[%s5950_s19 + $0x370] sm:$0xff] %v4465_v0  ;;  %3903 = vst [vmem:[%s5950_s19 + $0x378] sm:$0xff] %v4466_v53  ;;  %v2608_v42 = vpop.f32.mrb[168].mxu1 }
 0x4d4   : > { %v2609_v50 = vadd.f32 %v2608_v42, %v6320_v24  ;;  %v2831_v1 = vpop.f32.mrb[172].mxu0  ;;  %v2610_v14 = vpop.f32.mrb[169].mxu1 }
 0x4d5   : > { %v2832_v9 = vadd.f32 %v2831_v1, %v6322_v34  ;;  %v2611_v35 = vadd.f32 %v2610_v14, %v6326_v12  ;;  %v2833_v61 = vpop.f32.mrb[173].mxu0  ;;  %v2612_v3 = vpop.f32.mrb[170].mxu1 }
 0x4d6   : > { %v2834_v48 = vadd.f32 %v2833_v61, %v6328_v28  ;;  %v2613_v2 = vadd.f32 %v2612_v3, %v6320_v24  ;;  %v2835_v39 = vpop.f32.mrb[174].mxu0  ;;  %v2614_v38 = vpop.f32.mrb[171].mxu1 }
 0x4d7   : > { %v4469_v29 = vpack.c.bf16 %v2611_v35, %v2609_v50  ;;  %v2836_v10 = vadd.f32 %v2835_v39, %v6322_v34  ;;  %v2615_v11 = vadd.f32 %v2614_v38, %v6326_v12  ;;  %v2837_v7 = vpop.f32.mrb[175].mxu0 }
 0x4d8   : > { %v4470_v41 = vpack.c.bf16 %v2834_v48, %v2832_v9  ;;  %v2838_v4 = vadd.f32 %v2837_v7, %v6328_v28 }
 0x4d9   : > { %3906 = vst [vmem:[%s5950_s19 + $0x390] sm:$0xff] %v4469_v29  ;;  %v4473_v36 = vpack.c.bf16 %v2615_v11, %v2613_v2 }
 0x4da   : > { %3907 = vst [vmem:[%s5950_s19 + $0x398] sm:$0xff] %v4470_v41  ;;  %v4474_v60 = vpack.c.bf16 %v2838_v4, %v2836_v10 }
 0x4db   : > { %3910 = vst [vmem:[%s5950_s19 + $0x3b0] sm:$0xff] %v4473_v36  ;;  %v2618_v19 = vpop.f32.mrb[172].mxu1 }
 0x4dc   : > { %3911 = vst [vmem:[%s5950_s19 + $0x3b8] sm:$0xff] %v4474_v60  ;;  %v2619_v47 = vadd.f32 %v2618_v19, %v6320_v24  ;;  %v2841_v5 = vpop.f32.mrb[176].mxu0  ;;  %v2620_v22 = vpop.f32.mrb[173].mxu1 }
 0x4dd   : > { %v2842_v20 = vadd.f32 %v2841_v5, %v6322_v34  ;;  %v2621_v31 = vadd.f32 %v2620_v22, %v6326_v12  ;;  %v2843_v6 = vpop.f32.mrb[177].mxu0  ;;  %v2622_v58 = vpop.f32.mrb[174].mxu1 }
 0x4de   : > { %v2844_v49 = vadd.f32 %v2843_v6, %v6328_v28  ;;  %v2623_v15 = vadd.f32 %v2622_v58, %v6320_v24  ;;  %v2845_v27 = vpop.f32.mrb[178].mxu0  ;;  %v2624_v18 = vpop.f32.mrb[175].mxu1 }
 0x4df   : > { %v4477_v21 = vpack.c.bf16 %v2621_v31, %v2619_v47  ;;  %v2846_v16 = vadd.f32 %v2845_v27, %v6322_v34  ;;  %v2625_v63 = vadd.f32 %v2624_v18, %v6326_v12  ;;  %v2847_v55 = vpop.f32.mrb[179].mxu0 }
 0x4e0   : > { %v4478_v43 = vpack.c.bf16 %v2844_v49, %v2842_v20  ;;  %v2848_v23 = vadd.f32 %v2847_v55, %v6328_v28 }
 0x4e1   : > { %3914 = vst [vmem:[%s5950_s19 + $0x3d0] sm:$0xff] %v4477_v21  ;;  %v4481_v62 = vpack.c.bf16 %v2625_v63, %v2623_v15 }
 0x4e2   : > { %3915 = vst [vmem:[%s5950_s19 + $0x3d8] sm:$0xff] %v4478_v43  ;;  %v4482_v54 = vpack.c.bf16 %v2848_v23, %v2846_v16 }
 0x4e3   : > { %3918 = vst [vmem:[%s5950_s19 + $0x3f0] sm:$0xff] %v4481_v62  ;;  %v2628_v51 = vpop.f32.mrb[176].mxu1 }
 0x4e4   : > { %3919 = vst [vmem:[%s5950_s19 + $0x3f8] sm:$0xff] %v4482_v54  ;;  %v2629_v17 = vadd.f32 %v2628_v51, %v6320_v24  ;;  %v2851_v52 = vpop.f32.mrb[180].mxu0  ;;  %v2630_v13 = vpop.f32.mrb[177].mxu1 }
 0x4e5   : > { %v2852_v25 = vadd.f32 %v2851_v52, %v6322_v34  ;;  %v2631_v33 = vadd.f32 %v2630_v13, %v6326_v12  ;;  %v2853_v32 = vpop.f32.mrb[181].mxu0  ;;  %v2632_v37 = vpop.f32.mrb[178].mxu1 }
 0x4e6   : > { %v2854_v57 = vadd.f32 %v2853_v32, %v6328_v28  ;;  %v2633_v26 = vadd.f32 %v2632_v37, %v6320_v24  ;;  %v2855_v56 = vpop.f32.mrb[182].mxu0  ;;  %v2634_v8 = vpop.f32.mrb[179].mxu1 }
 0x4e7   : > { %v4485_v45 = vpack.c.bf16 %v2631_v33, %v2629_v17  ;;  %v2856_v46 = vadd.f32 %v2855_v56, %v6322_v34  ;;  %v2635_v44 = vadd.f32 %v2634_v8, %v6326_v12  ;;  %v2857_v59 = vpop.f32.mrb[183].mxu0 }
 0x4e8   : > { %v4486_v30 = vpack.c.bf16 %v2854_v57, %v2852_v25  ;;  %v2858_v40 = vadd.f32 %v2857_v59, %v6328_v28 }
 0x4e9   : > { %3922 = vst [vmem:[%s5950_s19 + $0x410] sm:$0xff] %v4485_v45  ;;  %v4489_v0 = vpack.c.bf16 %v2635_v44, %v2633_v26 }
 0x4ea   : > { %3923 = vst [vmem:[%s5950_s19 + $0x418] sm:$0xff] %v4486_v30  ;;  %v4490_v53 = vpack.c.bf16 %v2858_v40, %v2856_v46 }
 0x4eb   : > { %3926 = vst [vmem:[%s5950_s19 + $0x430] sm:$0xff] %v4489_v0  ;;  %v2638_v42 = vpop.f32.mrb[180].mxu1 }
 0x4ec   : > { %3927 = vst [vmem:[%s5950_s19 + $0x438] sm:$0xff] %v4490_v53  ;;  %v2639_v50 = vadd.f32 %v2638_v42, %v6320_v24  ;;  %v2861_v1 = vpop.f32.mrb[184].mxu0  ;;  %v2640_v14 = vpop.f32.mrb[181].mxu1 }
 0x4ed   : > { %v2862_v9 = vadd.f32 %v2861_v1, %v6322_v34  ;;  %v2641_v35 = vadd.f32 %v2640_v14, %v6326_v12  ;;  %v2863_v61 = vpop.f32.mrb[185].mxu0  ;;  %v2642_v3 = vpop.f32.mrb[182].mxu1 }
 0x4ee   : > { %v2864_v48 = vadd.f32 %v2863_v61, %v6328_v28  ;;  %v2643_v2 = vadd.f32 %v2642_v3, %v6320_v24  ;;  %v2865_v39 = vpop.f32.mrb[186].mxu0  ;;  %v2644_v38 = vpop.f32.mrb[183].mxu1 }
 0x4ef   : > { %v4493_v29 = vpack.c.bf16 %v2641_v35, %v2639_v50  ;;  %v2866_v10 = vadd.f32 %v2865_v39, %v6322_v34  ;;  %v2645_v11 = vadd.f32 %v2644_v38, %v6326_v12  ;;  %v2867_v7 = vpop.f32.mrb[187].mxu0 }
 0x4f0   : > { %v4494_v41 = vpack.c.bf16 %v2864_v48, %v2862_v9  ;;  %v2868_v4 = vadd.f32 %v2867_v7, %v6328_v28 }
 0x4f1   : > { %3930 = vst [vmem:[%s5950_s19 + $0x450] sm:$0xff] %v4493_v29  ;;  %v4497_v36 = vpack.c.bf16 %v2645_v11, %v2643_v2 }
 0x4f2   : > { %3931 = vst [vmem:[%s5950_s19 + $0x458] sm:$0xff] %v4494_v41  ;;  %v4498_v60 = vpack.c.bf16 %v2868_v4, %v2866_v10 }
 0x4f3   : > { %3934 = vst [vmem:[%s5950_s19 + $0x470] sm:$0xff] %v4497_v36  ;;  %v2648_v19 = vpop.f32.mrb[184].mxu1 }
 0x4f4   : > { %3935 = vst [vmem:[%s5950_s19 + $0x478] sm:$0xff] %v4498_v60  ;;  %v2649_v47 = vadd.f32 %v2648_v19, %v6320_v24  ;;  %v2871_v5 = vpop.f32.mrb[188].mxu0  ;;  %v2650_v22 = vpop.f32.mrb[185].mxu1 }
 0x4f5   : > { %v2872_v20 = vadd.f32 %v2871_v5, %v6322_v34  ;;  %v2651_v31 = vadd.f32 %v2650_v22, %v6326_v12  ;;  %v2873_v6 = vpop.f32.mrb[189].mxu0  ;;  %v2652_v58 = vpop.f32.mrb[186].mxu1 }
 0x4f6   : > { %v2874_v49 = vadd.f32 %v2873_v6, %v6328_v28  ;;  %v2653_v15 = vadd.f32 %v2652_v58, %v6320_v24  ;;  %v2875_v27 = vpop.f32.mrb[190].mxu0  ;;  %v2654_v18 = vpop.f32.mrb[187].mxu1  ;;  %3951 = sbr.rel (!%p6652_p4) target bundleno = 1305 (0x519), region = 76 }
 0x4f7   : > { %v4501_v21 = vpack.c.bf16 %v2651_v31, %v2649_v47  ;;  %v2876_v16 = vadd.f32 %v2875_v27, %v6322_v34  ;;  %v2655_v63 = vadd.f32 %v2654_v18, %v6326_v12  ;;  %v2877_v55 = vpop.f32.mrb[191].mxu0 }
 0x4f8   : > { %v4502_v43 = vpack.c.bf16 %v2874_v49, %v2872_v20  ;;  %v2878_v23 = vadd.f32 %v2877_v55, %v6328_v28 }
 0x4f9   : > { %3938 = vst [vmem:[%s5950_s19 + $0x490] sm:$0xff] %v4501_v21  ;;  %v4505_v62 = vpack.c.bf16 %v2655_v63, %v2653_v15 }
 0x4fa   : > { %3939 = vst [vmem:[%s5950_s19 + $0x498] sm:$0xff] %v4502_v43  ;;  %v4506_v54 = vpack.c.bf16 %v2878_v23, %v2876_v16 }
 0x4fb   : > { %3942 = vst [vmem:[%s5950_s19 + $0x4b0] sm:$0xff] %v4505_v62 }
 0x4fc   : > { %3943 = vst [vmem:[%s5950_s19 + $0x4b8] sm:$0xff] %v4506_v54 }
 0x4fd   : > { %s6660_s15 = smov (!%p3954_p7, %s3953_s15), 38 }
 0x4fe   : > { %s6567_s17 = sshll.u32 %s6660_s15, 9 }
 0x4ff   : > { %s3959_s20 = ssub.s32 19456, %s6567_s17 }
 0x500   : > { %3960 = vsyncadd %s6562_s21, %s3959_s20  ;;  %p4348_p8 = scmp.ne.s32.totalorder %s6567_s17, 0  ;;  %s4510_s23 = smul.u32 19456, %s5135_s28 }
 0x501   : > { %s3966_s16 = sshll.u32 %s5950_s19, 4  ;;  %s5071_s18 = smov [#allocation13]   ;;  %s6579_s16 = int_to_ptr.vmem [resolvable:$true] %s3966_s16 }
 0x502   : > { %s6577_s22 = scalar_lea.hbm %s6630_s7, %s4510_s23  ;;  %s4976_s13 = scalar_lea.vmem %s6579_s16, %s6567_s17 }
 0x503   : > { %p4977_p11 = scmp.ne.s32.totalorder %s6579_s16, %s4976_s13  ;;  %s4980_s9 = sshll.u32 %s5071_s18, 4  ;;  %s4981_s9 = int_to_ptr.vmem [resolvable:$false] %s4980_s9 }
 0x504   : > { %s4982_s28 = scalar_lea.vmem %s4981_s9, 38912  ;;  %p4983_p0 = scmp.lt.s32.totalorder %s6579_s16, %s4981_s9 }
 0x505   : > { %p4978_p13 = pnand %p4977_p11, %p4348_p8  ;;  %p4984_p6 = scmp.lt.s32.totalorder %s4982_s28, %s4976_s13 }
 0x507   : > { %p4979_p1 = pneg %p4978_p13  ;;  %p4985_p5 = por %p4984_p6, %p4983_p0 }
 0x509   : > { %p4986_p9 = pnand %p4985_p5, %p4979_p1 }
 0x50b   : > { %4989 = shalt.err (!%p4986_p9)
}
 0x50c   : > { %s4990_s1 = scalar_lea.hbm %s6577_s22, %s6567_s17  ;;  %s4994_s8 = scalar_lea.hbm %s6630_s7, 38400 }
 0x50d   : > { %p4991_p12 = scmp.ne.s32.totalorder %s6577_s22, %s4990_s1  ;;  %p4995_p3 = scmp.lt.u32.totalorder %s6577_s22, %s6630_s7 }
 0x50e   : > { %p4996_p4 = scmp.lt.u32.totalorder %s4994_s8, %s4990_s1  ;;  %p4998_p11 = scmp.lt.u32.totalorder %s4990_s1, %s6577_s22 }
 0x50f   : > { %p4992_p10 = pnand %p4991_p12, %p4348_p8 }
 0x510   : > { %p4997_p7 = por %p4996_p4, %p4995_p3 }
 0x511   : > { %p4993_p2 = pneg %p4992_p10 }
 0x512   : > { %p4999_p13 = por %p4998_p11, %p4997_p7 }
 0x514   : > { %p5000_p1 = pnand %p4999_p13, %p4993_p2 }
 0x516   : > { %5003 = shalt.err (!%p5000_p1)
}
 0x517   : > { %s5072_s15 = smov 512   ;;  %s5073_s20 = smov 32  }
 0x518   : > { %3972 = dma.vmem_to_hbm [thread:$0]  (%p4348_p8), %s6579_s16, %s6567_s17, %s6577_s22, %s6562_s21, %s5072_s15, %s5072_s15, %s5073_s20  }
 0x519 PF: > { %p4687_p0 = scmp.ge.s32.totalorder %s5054_s27, 2  ;;  %s3981_s23 = sand.u32 1, %s5042_s24  }
 0x51a   : > { %p6653_p6 = scmp.ne.s32.totalorder %s6637_s12, 0  ;;  %s3982_s11 = scalar_lea.sflag [#allocation4], %s3981_s23 }
 0x51c   : > { %p4672_p5 = pnand %p4687_p0, %p6653_p6 }
 0x51e   : > { %5037 = dma.done.wait (!%p4672_p5), %s3982_s11, 19456  }
 0x51f   : > { %5039 = vsyncadd (!%p4672_p5), %s3982_s11, 4294947840  ;;  %s6654_s10 = sld [smem:[#allocation19_spill]]  ;;  %p21_p9 = scmp.ge.s32.totalorder %s5139_s30, 4  }
 0x520   : > { %s6655_s24 = smov %s5046_s25  ;;  %s6656_s25 = smov %s5050_s26 }
 0x521   : > { %s6658_s27 = smov %s5139_s30  ;;  %23 = sbr.rel (!%p21_p9) target bundleno = 10 (0xa), region = 108 }
 0x525   : > { %s6657_s26 = smov %s6654_s10 }
 0x528   :  { %3987 = vsyncpa [#allocation3], 1 }
 0x529   :  { %3989 = vsyncpa [#allocation3 + $0x1], 1 }
 0x52a   :  { %3990 = vsyncpa [#allocation6], 1 }
 0x52b   :  { %3991 = vsyncpa [#allocation9], 1 }
 0x52c   :  { %3992 = vsyncpa [#allocation12], 1 }
 0x52d   :  { %3993 = vsyncpa [#allocation4], 1 }
 0x52e   :  { %3995 = vsyncpa [#allocation4 + $0x1], 1 }

</bundles_post_ra>
